<compile_context>
chip_gen: v6e
topology: v6e:2x2x1
jax: 0.10.0
libtpu: 0.0.40
codegen_flags: <defaults>
</compile_context>

<pallas_src>
import functools
import math

import jax
import jax.numpy as jnp
from jax.experimental import pallas as pl
from jax.experimental.pallas import tpu as pltpu

# MXU runs bf16 operand passes at default precision anyway, so bf16 weight
# storage halves VMEM/DMA/vld traffic at no extra numerical cost.
WEIGHT_DTYPE = jnp.bfloat16


def _round_up(n, m):
    return ((n + m - 1) // m) * m


def _device_kind():
    try:
        return jax.devices()[0].device_kind.lower()
    except Exception:
        return ""


def _lstm_dimension_semantics():
    # v7x has 2 TensorCores/chip: put the two independent serial recurrences
    # (fwd/rev) on separate cores. Elsewhere plain "parallel" is a safe no-op.
    if "v7" in _device_kind():
        return (pltpu.CORE_PARALLEL, pltpu.ARBITRARY)
    return (pltpu.PARALLEL, pltpu.ARBITRARY)


# ---------------------------------------------------------------------------
# Fused bidirectional LSTM layer kernel (one grid point = one direction x chunk)
# ---------------------------------------------------------------------------
def _bilstm_chunk_kernel(x_ref, wih_ref, whh_ref, b_ref, out_ref,
                         gx_sc, h_sc, c_sc, *, t_real, needs_mask, unroll):
    # x_ref  : (S, Tc, B, K) f32   input chunk (S=1 raw x; S=2 fwd/rev halves)
    # wih_ref: (1, S, K, 4H) bf16  input->gate weights for THIS direction
    # whh_ref: (1, H, 4H)    bf16  hidden->gate weights for THIS direction
    # b_ref  : (1, 1, 4H)    f32   b_ih + b_hh for THIS direction
    # out_ref: (1, Tc, B, H) f32   hidden outputs for this direction/chunk
    # gx_sc  : (Tc*B, 4H)    f32   hoisted input projection for the chunk
    # h_sc/c_sc: (2, B, H)   f32   per-direction recurrent state across chunks
    d = pl.program_id(0)                      # 0 = forward, 1 = reverse
    c = pl.program_id(1)
    nc = pl.num_programs(1)
    S, Tc, B, K = x_ref.shape
    H = whh_ref.shape[1]
    tb = d * (nc - 1 - c) + (1 - d) * c       # global time-block index of chunk

    @pl.when(c == 0)
    def _init():
        h_sc[d] = jnp.zeros((B, H), jnp.float32)
        c_sc[d] = jnp.zeros((B, H), jnp.float32)

    # Hoisted input projection: one big MXU matmul per chunk (M = Tc*B rows),
    # bf16 operands, f32 accumulation.
    acc = jnp.dot(x_ref[0].reshape(Tc * B, K).astype(WEIGHT_DTYPE),
                  wih_ref[0, 0], preferred_element_type=jnp.float32)
    for s in range(1, S):
        acc = acc + jnp.dot(x_ref[s].reshape(Tc * B, K).astype(WEIGHT_DTYPE),
                            wih_ref[0, s], preferred_element_type=jnp.float32)
    gx_sc[...] = acc + b_ref[0]

    whh = whh_ref[0]                          # (H, 4H) bf16, single-buffered
    # TODO(synk): for H <= 256, latch whh across the unrolled time loop with
    #             pltpu.matmul_push_rhs / matmul_acc_lhs (the per-step matmul is
    #             weight-streaming bound at M=B rows).

    def step(i, carry):
        h, cell = carry
        # forward: local time i ; reverse: local time Tc-1-i
        tt = (1 - d) * i + d * (Tc - 1 - i)
        row = pl.multiple_of(tt * B, B)
        g = gx_sc[pl.ds(row, B), :] + jnp.dot(
            h.astype(WEIGHT_DTYPE), whh, preferred_element_type=jnp.float32)
        i_g = jax.nn.sigmoid(g[:, 0 * H:1 * H])
        f_g = jax.nn.sigmoid(g[:, 1 * H:2 * H])
        g_g = jnp.tanh(g[:, 2 * H:3 * H])
        o_g = jax.nn.sigmoid(g[:, 3 * H:4 * H])
        c_new = f_g * cell + i_g * g_g
        h_new = o_g * jnp.tanh(c_new)
        if needs_mask:
            # Padded tail timesteps (global t >= t_real) must not advance state:
            # for the reverse direction they are processed FIRST, so holding the
            # state here is what keeps the real steps correct.
            valid = (tb * Tc + tt) < t_real
            h_new = jnp.where(valid, h_new, h)
            c_new = jnp.where(valid, c_new, cell)
        out_ref[0, tt] = h_new.astype(out_ref.dtype)
        return h_new, c_new

    h_fin, c_fin = jax.lax.fori_loop(0, Tc, step, (h_sc[d], c_sc[d]),
                                     unroll=unroll)
    h_sc[d] = h_fin
    c_sc[d] = c_fin


def bilstm_layer(x_s, wih_s, whh_s, b_s, *, time_chunk, t_real, unroll=8):
    """One bidirectional LSTM layer.

    x_s  : (S, T, B, K) f32    (S=1: raw input; S=2: fwd/rev halves of prev layer)
    wih_s: (2, S, K, 4H) bf16  per-direction input->gate weights (transposed)
    whh_s: (2, H, 4H) bf16
    b_s  : (2, 1, 4H) f32
    returns (2, T, B, H) f32   (index 0 = forward, 1 = reverse)
    """
    S, T, B, K = x_s.shape
    H = whh_s.shape[1]
    Tc = time_chunk
    assert T % Tc == 0
    nc = T // Tc
    needs_mask = (t_real != T)
    unroll = max(1, min(unroll, Tc))

    def t_idx(d, c):
        # chunk index along time: c for forward, nc-1-c for reverse
        return d * (nc - 1 - c) + (1 - d) * c

    # VMEM accounting: double-buffered activation tiles, single-buffered weights.
    act = jnp.dtype(x_s.dtype).itemsize
    wb = jnp.dtype(wih_s.dtype).itemsize
    need = (2 * S * Tc * B * K * act          # x chunk   x2 buffers
            + 2 * Tc * B * H * 4              # out chunk x2 buffers
            + S * K * 4 * H * wb              # wih       x1 buffer
            + H * 4 * H * wb                  # whh       x1 buffer
            + 4 * H * 4                       # bias
            + Tc * B * 4 * H * 4              # gx scratch
            + 2 * 2 * B * H * 4)              # h/c state (per-direction)
    vmem_limit = int(min(max(need + need // 2 + (2 << 20), 32 << 20), 60 << 20))

    kernel = functools.partial(_bilstm_chunk_kernel, t_real=t_real,
                               needs_mask=needs_mask, unroll=unroll)

    return pl.pallas_call(
        kernel,
        out_shape=jax.ShapeDtypeStruct((2, T, B, H), jnp.float32),
        grid_spec=pltpu.PrefetchScalarGridSpec(
            num_scalar_prefetch=0,
            grid=(2, nc),
            in_specs=[
                pl.BlockSpec((S, Tc, B, K), lambda d, c: (0, t_idx(d, c), 0, 0)),
                pl.BlockSpec((1, S, K, 4 * H), lambda d, c: (d, 0, 0, 0),
                             pipeline_mode=pl.Buffered(1)),
                pl.BlockSpec((1, H, 4 * H), lambda d, c: (d, 0, 0),
                             pipeline_mode=pl.Buffered(1)),
                pl.BlockSpec((1, 1, 4 * H), lambda d, c: (d, 0, 0),
                             pipeline_mode=pl.Buffered(1)),
            ],
            out_specs=pl.BlockSpec((1, Tc, B, H),
                                   lambda d, c: (d, t_idx(d, c), 0, 0)),
            scratch_shapes=[
                pltpu.VMEM((Tc * B, 4 * H), jnp.float32),   # hoisted gate inputs
                pltpu.VMEM((2, B, H), jnp.float32),         # h state (per dir)
                pltpu.VMEM((2, B, H), jnp.float32),         # c state (per dir)
            ],
        ),
        compiler_params=pltpu.CompilerParams(
            dimension_semantics=_lstm_dimension_semantics(),
            vmem_limit_bytes=vmem_limit),
    )(x_s, wih_s, whh_s, b_s)


# ---------------------------------------------------------------------------
# Projection kernel: y = [h_fwd, h_rev] @ W^T + b, consuming the (2,T,B,H)
# layout directly (no concatenate), tiled over ~1-2K output rows.
# ---------------------------------------------------------------------------
def _proj_kernel(h_ref, w_ref, b_ref, o_ref):
    # h_ref: (2, Tp, B, H) f32; w_ref: (2, H, D) bf16; b_ref: (1, D) f32
    _, Tp, B, H = h_ref.shape
    D = w_ref.shape[2]
    acc = jnp.dot(h_ref[0].reshape(Tp * B, H).astype(w_ref.dtype), w_ref[0],
                  preferred_element_type=jnp.float32)
    acc = acc + jnp.dot(h_ref[1].reshape(Tp * B, H).astype(w_ref.dtype), w_ref[1],
                        preferred_element_type=jnp.float32)
    o_ref[...] = (acc + b_ref[...]).reshape(Tp, B, D)


def bilinear_proj(h2, w2, b2, *, time_chunk):
    """h2: (2, T, B, H) f32, w2: (2, H, D) bf16, b2: (1, D) f32 -> (T, B, D) f32."""
    _, T, B, H = h2.shape
    D = w2.shape[2]
    Tp = time_chunk
    assert T % Tp == 0
    nc = T // Tp
    act = jnp.dtype(h2.dtype).itemsize
    need = (2 * 2 * Tp * B * H * act + 2 * H * D * 2 + D * 4 + 2 * Tp * B * D * 4)
    vmem_limit = int(min(max(need + need // 2 + (2 << 20), 32 << 20), 60 << 20))
    return pl.pallas_call(
        _proj_kernel,
        out_shape=jax.ShapeDtypeStruct((T, B, D), jnp.float32),
        grid_spec=pltpu.PrefetchScalarGridSpec(
            num_scalar_prefetch=0,
            grid=(nc,),
            in_specs=[
                pl.BlockSpec((2, Tp, B, H), lambda c: (0, c, 0, 0)),
                pl.BlockSpec((2, H, D), lambda c: (0, 0, 0),
                             pipeline_mode=pl.Buffered(1)),
                pl.BlockSpec((1, D), lambda c: (0, 0),
                             pipeline_mode=pl.Buffered(1)),
            ],
            out_specs=pl.BlockSpec((Tp, B, D), lambda c: (c, 0, 0)),
        ),
        compiler_params=pltpu.CompilerParams(
            dimension_semantics=(pltpu.PARALLEL,),
            vmem_limit_bytes=vmem_limit),
    )(h2, w2, b2)


# ---------------------------------------------------------------------------
# Parameter re-layout (torch layout -> kernel layout), weights cast to bf16
# ---------------------------------------------------------------------------
def _prepare_params(params, d_model):
    H = d_model
    layers = []
    for layer in params["layers"]:
        in_dim = layer["w_ih_f"].shape[1]
        if in_dim == H:                                   # first layer: raw x
            wih_f = layer["w_ih_f"].T[None]               # (1, H, 4H)
            wih_r = layer["w_ih_r"].T[None]
        else:                                             # later layers: fwd/rev halves
            wih_f = jnp.stack([layer["w_ih_f"][:, :H].T, layer["w_ih_f"][:, H:].T])
            wih_r = jnp.stack([layer["w_ih_r"][:, :H].T, layer["w_ih_r"][:, H:].T])
        wih_s = jnp.stack([wih_f, wih_r]).astype(WEIGHT_DTYPE)        # (2, S, K, 4H)
        whh_s = jnp.stack([layer["w_hh_f"].T,
                           layer["w_hh_r"].T]).astype(WEIGHT_DTYPE)   # (2, H, 4H)
        b_s = jnp.stack([layer["b_f"].reshape(1, 4 * H),
                         layer["b_r"].reshape(1, 4 * H)]).astype(jnp.float32)
        layers.append((wih_s, whh_s, b_s))
    wp = params["w_proj"]                                 # (D, 2D)
    w_proj2 = jnp.stack([wp[:, :H].T, wp[:, H:].T]).astype(WEIGHT_DTYPE)  # (2, H, D)
    b_proj2 = params["b_proj"].reshape(1, H).astype(jnp.float32)
    return layers, w_proj2, b_proj2


def _shrink_tc_for_vmem(tc, B, H, layers, budget=44 << 20):
    """Cap the time chunk so tiles + scratch + bf16 weights fit a v7x-safe budget."""
    fixed = per_t = 0
    for (wih_s, _whh, _b) in layers:
        S, K = wih_s.shape[1], wih_s.shape[2]
        fixed = max(fixed,
                    (S * K * 4 * H + H * 4 * H) * 2 + 4 * H * 4 + 4 * B * H * 4)
        per_t = max(per_t, B * (2 * S * K * 4 + 2 * H * 4 + 4 * H * 4))
    while tc > 8 and fixed + tc * per_t > budget:
        tc -= 8
    # TODO(synk): for H >= 1024 on v7x, move x@W_ih^T+b into a separate parallel
    #             pre-pass writing gx to HBM so W_ih never enters this kernel.
    return max(tc, 8)


# ---------------------------------------------------------------------------
# Full module forward
# ---------------------------------------------------------------------------
def lstm_encoder_forward(x, params):
    """x: (B, T, D) float32 -> (B, T, D) float32."""
    B, T, D = x.shape
    Bp = _round_up(B, 8)                       # sublane-aligned batch
    layers, w_proj2, b_proj2 = _prepare_params(params, D)

    # Time chunk: aim for Tc*Bp >= 256 rows (fills a 256-wide MXU pass on
    # v6e/v7x), capped by T and a conservative VMEM budget; pad T to a multiple
    # of Tc and mask the tail inside the recurrence.
    tc_target = min(64, _round_up(max(8, -(-256 // Bp)), 8))
    Tc = min(tc_target, _round_up(T, 8))
    Tc = _shrink_tc_for_vmem(Tc, Bp, D, layers)
    T_pad = _round_up(T, Tc)
    nc = T_pad // Tc

    # Projection row tile: Tp*Bp ~ 1024-2048 rows (mem-bound roofline), Tp = Tc*m
    # with m a divisor of nc so blocks tile exactly.
    m_max = max(1, 2048 // max(1, Tc * Bp))
    m = 1
    for cand in range(min(nc, m_max), 0, -1):
        if nc % cand == 0:
            m = cand
            break
    Tp = Tc * m

    xt = jnp.transpose(x, (1, 0, 2))           # time-major (T, B, D), done once
    xt = jnp.pad(xt, ((0, T_pad - T), (0, Bp - B), (0, 0)))
    h = xt[None].astype(jnp.float32)           # (1, T_pad, Bp, D)

    for (wih_s, whh_s, b_s) in layers:
        h = bilstm_layer(h, wih_s, whh_s, b_s, time_chunk=Tc, t_real=T)

    y = bilinear_proj(h, w_proj2, b_proj2, time_chunk=Tp)   # (T_pad, Bp, D)
    return jnp.transpose(y, (1, 0, 2))[:B, :T]               # (B, T, D)


# ---------------------------------------------------------------------------
# Pure-JAX reference (for correctness check)
# ---------------------------------------------------------------------------
def _lstm_dir_ref(x_tbd, w_ih, w_hh, b):
    H = w_hh.shape[1]

    def step(carry, x_t):
        hprev, cprev = carry
        gates = x_t @ w_ih.T + hprev @ w_hh.T + b
        i = jax.nn.sigmoid(gates[:, 0 * H:1 * H])
        f = jax.nn.sigmoid(gates[:, 1 * H:2 * H])
        g = jnp.tanh(gates[:, 2 * H:3 * H])
        o = jax.nn.sigmoid(gates[:, 3 * H:4 * H])
        c = f * cprev + i * g
        hnew = o * jnp.tanh(c)
        return (hnew, c), hnew

    Bn = x_tbd.shape[1]
    init = (jnp.zeros((Bn, H), jnp.float32), jnp.zeros((Bn, H), jnp.float32))
    _, hs = jax.lax.scan(step, init, x_tbd)
    return hs


def lstm_encoder_ref(x, params):
    B, T, D = x.shape
    h = jnp.transpose(x, (1, 0, 2))
    for layer in params["layers"]:
        fwd = _lstm_dir_ref(h, layer["w_ih_f"], layer["w_hh_f"], layer["b_f"])
        rev = _lstm_dir_ref(h[::-1], layer["w_ih_r"], layer["w_hh_r"], layer["b_r"])[::-1]
        h = jnp.concatenate([fwd, rev], axis=-1)
    flat = jnp.transpose(h, (1, 0, 2)).reshape(B * T, 2 * D)
    out = flat @ params["w_proj"].T + params["b_proj"]
    return out.reshape(B, T, D)


# ---------------------------------------------------------------------------
# Deterministic parameter init (PyTorch-style uniform(-1/sqrt(H), 1/sqrt(H)))
# ---------------------------------------------------------------------------
def init_params(key, d_model, num_layers):
    H = d_model
    k = 1.0 / math.sqrt(H)

    def u(key, shape):
        return jax.random.uniform(key, shape, jnp.float32, minval=-k, maxval=k)

    layers = []
    for layer in range(num_layers):
        in_dim = d_model if layer == 0 else 2 * d_model
        keys = jax.random.split(jax.random.fold_in(key, layer), 8)
        layers.append(dict(
            w_ih_f=u(keys[0], (4 * H, in_dim)),
            w_hh_f=u(keys[1], (4 * H, H)),
            b_f=u(keys[2], (4 * H,)) + u(keys[3], (4 * H,)),  # b_ih + b_hh
            w_ih_r=u(keys[4], (4 * H, in_dim)),
            w_hh_r=u(keys[5], (4 * H, H)),
            b_r=u(keys[6], (4 * H,)) + u(keys[7], (4 * H,)),
        ))
    pk = jax.random.split(jax.random.fold_in(key, 1000), 2)
    kp = 1.0 / math.sqrt(2 * d_model)
    w_proj = jax.random.uniform(pk[0], (d_model, 2 * d_model), jnp.float32, -kp, kp)
    b_proj = jax.random.uniform(pk[1], (d_model,), jnp.float32, -kp, kp)
    return dict(layers=layers, w_proj=w_proj, b_proj=b_proj)


if __name__ == "__main__":
    d_model = 32
    num_layers = 2
    B = 2

    root = jax.random.PRNGKey(0)
    x_key, p_key = jax.random.split(root)
    params = init_params(p_key, d_model, num_layers)

    # T=8 exercises the exact-fit (no pad) path; T=10 exercises T-padding + the
    # in-kernel tail masking of the recurrence.
    for T in (8, 10):
        x = jax.random.normal(jax.random.fold_in(x_key, T), (B, T, d_model),
                              jnp.float32)
        out = jax.block_until_ready(jax.jit(lstm_encoder_forward)(x, params))
        ref = lstm_encoder_ref(x, params)
        assert out.shape == (B, T, d_model)
        # bf16 weight storage (the MXU runs bf16 operand passes at default
        # precision anyway) => compare at a bf16-appropriate tolerance.
        err = float(jnp.max(jnp.abs(out - ref)))
        assert jnp.allclose(out, ref, atol=2e-2, rtol=2e-2), \
            f"mismatch vs. JAX reference (T={T}, max abs err={err})"

    print("KERNEL_OK")
</pallas_src>

<mosaic_0001>
module attributes {stable_mosaic.version = 11 : i64} {
  func.func @_proj_kernel(%arg0: i32, %arg1: memref<2x8x8x32xf32, #tpu.memory_space<vmem>>, %arg2: memref<2x32x32xbf16, #tpu.memory_space<vmem>>, %arg3: memref<1x32xf32, #tpu.memory_space<vmem>>, %arg4: memref<8x8x32xf32, #tpu.memory_space<vmem>>) attributes {dimension_semantics = [#tpu.dimension_semantics<parallel>], iteration_bounds = array<i64: 1>, scalar_prefetch = 0 : i64, scratch_operands = 0 : i64, tpu.core_type = #tpu.core_type<tc>, window_params = [{transform_indices = @transform_0, window_bounds = array<i64: 2, 8, 8, 32>}, {pipeline_mode = #tpu.pipeline_mode<synchronous>, transform_indices = @transform_1, window_bounds = array<i64: 2, 32, 32>}, {pipeline_mode = #tpu.pipeline_mode<synchronous>, transform_indices = @transform_2, window_bounds = array<i64: 1, 32>}, {transform_indices = @transform_3, window_bounds = array<i64: 8, 8, 32>}]} {
    %c0 = arith.constant 0 : index
    %c0_0 = arith.constant 0 : index
    %c0_1 = arith.constant 0 : index
    %c0_2 = arith.constant 0 : index
    %0 = vector.load %arg1[%c0, %c0_0, %c0_1, %c0_2] : memref<2x8x8x32xf32, #tpu.memory_space<vmem>>, vector<1x8x8x32xf32>
    %1 = vector.shape_cast %0 : vector<1x8x8x32xf32> to vector<8x8x32xf32>
    %2 = vector.shape_cast %1 : vector<8x8x32xf32> to vector<64x32xf32>
    %3 = arith.truncf %2 : vector<64x32xf32> to vector<64x32xbf16>
    %c0_3 = arith.constant 0 : index
    %c0_4 = arith.constant 0 : index
    %c0_5 = arith.constant 0 : index
    %4 = vector.load %arg2[%c0_3, %c0_4, %c0_5] : memref<2x32x32xbf16, #tpu.memory_space<vmem>>, vector<1x32x32xbf16>
    %5 = vector.shape_cast %4 : vector<1x32x32xbf16> to vector<32x32xbf16>
    %cst = arith.constant dense<0.000000e+00> : vector<64x32xf32>
    %6 = tpu.matmul %3, %5, %cst {dimension_numbers = #tpu.dot_dimension_numbers<[1], [0], [0], [1], [0, 0, 1, 1], [], []>} : vector<64x32xbf16>, vector<32x32xbf16>, vector<64x32xf32> -> vector<64x32xf32>
    %c1 = arith.constant 1 : index
    %c0_6 = arith.constant 0 : index
    %c0_7 = arith.constant 0 : index
    %c0_8 = arith.constant 0 : index
    %7 = vector.load %arg1[%c1, %c0_6, %c0_7, %c0_8] : memref<2x8x8x32xf32, #tpu.memory_space<vmem>>, vector<1x8x8x32xf32>
    %8 = vector.shape_cast %7 : vector<1x8x8x32xf32> to vector<8x8x32xf32>
    %9 = vector.shape_cast %8 : vector<8x8x32xf32> to vector<64x32xf32>
    %10 = arith.truncf %9 : vector<64x32xf32> to vector<64x32xbf16>
    %c1_9 = arith.constant 1 : index
    %c0_10 = arith.constant 0 : index
    %c0_11 = arith.constant 0 : index
    %11 = vector.load %arg2[%c1_9, %c0_10, %c0_11] : memref<2x32x32xbf16, #tpu.memory_space<vmem>>, vector<1x32x32xbf16>
    %12 = vector.shape_cast %11 : vector<1x32x32xbf16> to vector<32x32xbf16>
    %cst_12 = arith.constant dense<0.000000e+00> : vector<64x32xf32>
    %13 = tpu.matmul %10, %12, %cst_12 {dimension_numbers = #tpu.dot_dimension_numbers<[1], [0], [0], [1], [0, 0, 1, 1], [], []>} : vector<64x32xbf16>, vector<32x32xbf16>, vector<64x32xf32> -> vector<64x32xf32>
    %14 = arith.addf %6, %13 : vector<64x32xf32>
    %c0_13 = arith.constant 0 : index
    %c0_14 = arith.constant 0 : index
    %15 = vector.load %arg3[%c0_13, %c0_14] : memref<1x32xf32, #tpu.memory_space<vmem>>, vector<1x32xf32>
    %16 = vector.broadcast %15 : vector<1x32xf32> to vector<64x32xf32>
    %17 = arith.addf %14, %16 : vector<64x32xf32>
    %18 = vector.shape_cast %17 : vector<64x32xf32> to vector<8x8x32xf32>
    %c0_15 = arith.constant 0 : index
    %c0_16 = arith.constant 0 : index
    %c0_17 = arith.constant 0 : index
    %19 = vector.load %arg4[%c0_15, %c0_16, %c0_17] : memref<8x8x32xf32, #tpu.memory_space<vmem>>, vector<8x8x32xf32>
    tpu.vector_store %arg4[%c0_15, %c0_16, %c0_17], %18 {strides = array<i32>} : memref<8x8x32xf32, #tpu.memory_space<vmem>>, vector<8x8x32xf32>,
    return
  }
  func.func @transform_0(%arg0: i32) -> (i32, i32, i32, i32) {
    %c0_i32 = arith.constant 0 : i32
    %c0_i32_0 = arith.constant 0 : i32
    %c0_i32_1 = arith.constant 0 : i32
    %c0_i32_2 = arith.constant 0 : i32
    return %c0_i32, %arg0, %c0_i32_0, %c0_i32_1 : i32, i32, i32, i32
  }
  func.func @transform_1(%arg0: i32) -> (i32, i32, i32) {
    %c0_i32 = arith.constant 0 : i32
    %c0_i32_0 = arith.constant 0 : i32
    %c0_i32_1 = arith.constant 0 : i32
    %c0_i32_2 = arith.constant 0 : i32
    return %c0_i32, %c0_i32_0, %c0_i32_1 : i32, i32, i32
  }
  func.func @transform_2(%arg0: i32) -> (i32, i32) {
    %c0_i32 = arith.constant 0 : i32
    %c0_i32_0 = arith.constant 0 : i32
    %c0_i32_1 = arith.constant 0 : i32
    return %c0_i32, %c0_i32_0 : i32, i32
  }
  func.func @transform_3(%arg0: i32) -> (i32, i32, i32) {
    %c0_i32 = arith.constant 0 : i32
    %c0_i32_0 = arith.constant 0 : i32
    %c0_i32_1 = arith.constant 0 : i32
    return %arg0, %c0_i32, %c0_i32_0 : i32, i32, i32
  }
}

module attributes {stable_mosaic.version = 11 : i64} {
  func.func @_bilstm_chunk_kernel(%arg0: i32, %arg1: i32, %arg2: memref<2x8x8x32xf32, #tpu.memory_space<vmem>>, %arg3: memref<1x2x32x128xbf16, #tpu.memory_space<vmem>>, %arg4: memref<1x32x128xbf16, #tpu.memory_space<vmem>>, %arg5: memref<1x1x128xf32, #tpu.memory_space<vmem>>, %arg6: memref<1x8x8x32xf32, #tpu.memory_space<vmem>>, %arg7: memref<64x128xf32, #tpu.memory_space<vmem>>, %arg8: memref<2x8x32xf32, #tpu.memory_space<vmem>>, %arg9: memref<2x8x32xf32, #tpu.memory_space<vmem>>) attributes {dimension_semantics = [#tpu.dimension_semantics<parallel>, #tpu.dimension_semantics<arbitrary>], iteration_bounds = array<i64: 2, 1>, scalar_prefetch = 0 : i64, scratch_operands = 3 : i64, tpu.core_type = #tpu.core_type<tc>, window_params = [{transform_indices = @transform_0, window_bounds = array<i64: 2, 8, 8, 32>}, {pipeline_mode = #tpu.pipeline_mode<synchronous>, transform_indices = @transform_1, window_bounds = array<i64: 1, 2, 32, 128>}, {pipeline_mode = #tpu.pipeline_mode<synchronous>, transform_indices = @transform_2, window_bounds = array<i64: 1, 32, 128>}, {pipeline_mode = #tpu.pipeline_mode<synchronous>, transform_indices = @transform_3, window_bounds = array<i64: 1, 1, 128>}, {transform_indices = @transform_4, window_bounds = array<i64: 1, 8, 8, 32>}]} {
    %c0_i32 = arith.constant 0 : i32
    %0 = arith.cmpi eq, %arg1, %c0_i32 : i32
    %1 = arith.extui %0 : i1 to i32
    %c0_i32_0 = arith.constant 0 : i32
    %2 = arith.cmpi ne, %1, %c0_i32_0 : i32
    scf.if %2 {
      %cst_121 = arith.constant 0.000000e+00 : f32
      %367 = vector.broadcast %cst_121 : f32 to vector<8x32xf32>
      %368 = arith.index_cast %arg0 : i32 to index
      %c0_122 = arith.constant 0 : index
      %c0_123 = arith.constant 0 : index
      %369 = vector.load %arg8[%368, %c0_122, %c0_123] : memref<2x8x32xf32, #tpu.memory_space<vmem>>, vector<1x8x32xf32>
      %370 = vector.shape_cast %369 : vector<1x8x32xf32> to vector<8x32xf32>
      %371 = vector.shape_cast %367 : vector<8x32xf32> to vector<1x8x32xf32>
      tpu.vector_store %arg8[%368, %c0_122, %c0_123], %371 {strides = array<i32>} : memref<2x8x32xf32, #tpu.memory_space<vmem>>, vector<1x8x32xf32>,
      %cst_124 = arith.constant 0.000000e+00 : f32
      %372 = vector.broadcast %cst_124 : f32 to vector<8x32xf32>
      %373 = arith.index_cast %arg0 : i32 to index
      %c0_125 = arith.constant 0 : index
      %c0_126 = arith.constant 0 : index
      %374 = vector.load %arg9[%373, %c0_125, %c0_126] : memref<2x8x32xf32, #tpu.memory_space<vmem>>, vector<1x8x32xf32>
      %375 = vector.shape_cast %374 : vector<1x8x32xf32> to vector<8x32xf32>
      %376 = vector.shape_cast %372 : vector<8x32xf32> to vector<1x8x32xf32>
      tpu.vector_store %arg9[%373, %c0_125, %c0_126], %376 {strides = array<i32>} : memref<2x8x32xf32, #tpu.memory_space<vmem>>, vector<1x8x32xf32>,
    } else {
    }
    %c0 = arith.constant 0 : index
    %c0_1 = arith.constant 0 : index
    %c0_2 = arith.constant 0 : index
    %c0_3 = arith.constant 0 : index
    %3 = vector.load %arg2[%c0, %c0_1, %c0_2, %c0_3] : memref<2x8x8x32xf32, #tpu.memory_space<vmem>>, vector<1x8x8x32xf32>
    %4 = vector.shape_cast %3 : vector<1x8x8x32xf32> to vector<8x8x32xf32>
    %5 = vector.shape_cast %4 : vector<8x8x32xf32> to vector<64x32xf32>
    %6 = arith.truncf %5 : vector<64x32xf32> to vector<64x32xbf16>
    %c0_4 = arith.constant 0 : index
    %c0_5 = arith.constant 0 : index
    %c0_6 = arith.constant 0 : index
    %c0_7 = arith.constant 0 : index
    %7 = vector.load %arg3[%c0_4, %c0_5, %c0_6, %c0_7] : memref<1x2x32x128xbf16, #tpu.memory_space<vmem>>, vector<1x1x32x128xbf16>
    %8 = vector.shape_cast %7 : vector<1x1x32x128xbf16> to vector<32x128xbf16>
    %cst = arith.constant dense<0.000000e+00> : vector<64x128xf32>
    %9 = tpu.matmul %6, %8, %cst {dimension_numbers = #tpu.dot_dimension_numbers<[1], [0], [0], [1], [0, 0, 1, 1], [], []>} : vector<64x32xbf16>, vector<32x128xbf16>, vector<64x128xf32> -> vector<64x128xf32>
    %c1 = arith.constant 1 : index
    %c0_8 = arith.constant 0 : index
    %c0_9 = arith.constant 0 : index
    %c0_10 = arith.constant 0 : index
    %10 = vector.load %arg2[%c1, %c0_8, %c0_9, %c0_10] : memref<2x8x8x32xf32, #tpu.memory_space<vmem>>, vector<1x8x8x32xf32>
    %11 = vector.shape_cast %10 : vector<1x8x8x32xf32> to vector<8x8x32xf32>
    %12 = vector.shape_cast %11 : vector<8x8x32xf32> to vector<64x32xf32>
    %13 = arith.truncf %12 : vector<64x32xf32> to vector<64x32xbf16>
    %c0_11 = arith.constant 0 : index
    %c1_12 = arith.constant 1 : index
    %c0_13 = arith.constant 0 : index
    %c0_14 = arith.constant 0 : index
    %14 = vector.load %arg3[%c0_11, %c1_12, %c0_13, %c0_14] : memref<1x2x32x128xbf16, #tpu.memory_space<vmem>>, vector<1x1x32x128xbf16>
    %15 = vector.shape_cast %14 : vector<1x1x32x128xbf16> to vector<32x128xbf16>
    %cst_15 = arith.constant dense<0.000000e+00> : vector<64x128xf32>
    %16 = tpu.matmul %13, %15, %cst_15 {dimension_numbers = #tpu.dot_dimension_numbers<[1], [0], [0], [1], [0, 0, 1, 1], [], []>} : vector<64x32xbf16>, vector<32x128xbf16>, vector<64x128xf32> -> vector<64x128xf32>
    %17 = arith.addf %9, %16 : vector<64x128xf32>
    %c0_16 = arith.constant 0 : index
    %c0_17 = arith.constant 0 : index
    %c0_18 = arith.constant 0 : index
    %18 = vector.load %arg5[%c0_16, %c0_17, %c0_18] : memref<1x1x128xf32, #tpu.memory_space<vmem>>, vector<1x1x128xf32>
    %19 = vector.shape_cast %18 : vector<1x1x128xf32> to vector<1x128xf32>
    %20 = vector.broadcast %19 : vector<1x128xf32> to vector<64x128xf32>
    %21 = arith.addf %17, %20 : vector<64x128xf32>
    %c0_19 = arith.constant 0 : index
    %c0_20 = arith.constant 0 : index
    %22 = vector.load %arg7[%c0_19, %c0_20] : memref<64x128xf32, #tpu.memory_space<vmem>>, vector<64x128xf32>
    tpu.vector_store %arg7[%c0_19, %c0_20], %21 {strides = array<i32>} : memref<64x128xf32, #tpu.memory_space<vmem>>, vector<64x128xf32>,
    %c0_21 = arith.constant 0 : index
    %c0_22 = arith.constant 0 : index
    %c0_23 = arith.constant 0 : index
    %23 = vector.load %arg4[%c0_21, %c0_22, %c0_23] : memref<1x32x128xbf16, #tpu.memory_space<vmem>>, vector<1x32x128xbf16>
    %24 = vector.shape_cast %23 : vector<1x32x128xbf16> to vector<32x128xbf16>
    %25 = arith.index_cast %arg0 : i32 to index
    %c0_24 = arith.constant 0 : index
    %c0_25 = arith.constant 0 : index
    %26 = vector.load %arg8[%25, %c0_24, %c0_25] : memref<2x8x32xf32, #tpu.memory_space<vmem>>, vector<1x8x32xf32>
    %27 = vector.shape_cast %26 : vector<1x8x32xf32> to vector<8x32xf32>
    %28 = arith.index_cast %arg0 : i32 to index
    %c0_26 = arith.constant 0 : index
    %c0_27 = arith.constant 0 : index
    %29 = vector.load %arg9[%28, %c0_26, %c0_27] : memref<2x8x32xf32, #tpu.memory_space<vmem>>, vector<1x8x32xf32>
    %30 = vector.shape_cast %29 : vector<1x8x32xf32> to vector<8x32xf32>
    %c0_i32_28 = arith.constant 0 : i32
    %c1_i32 = arith.constant 1 : i32
    %31 = arith.subi %c1_i32, %arg0 : i32
    %32 = arith.muli %31, %c0_i32_28 : i32
    %c7_i32 = arith.constant 7 : i32
    %33 = arith.subi %c7_i32, %c0_i32_28 : i32
    %34 = arith.muli %arg0, %33 : i32
    %35 = arith.addi %32, %34 : i32
    %c8_i32 = arith.constant 8 : i32
    %36 = arith.muli %35, %c8_i32 : i32
    %37 = tpu.assume_multiple %36, 8 : i32
    %38 = arith.index_cast %37 : i32 to index
    %c0_29 = arith.constant 0 : index
    %39 = vector.load %arg7[%38, %c0_29] : memref<64x128xf32, #tpu.memory_space<vmem>>, vector<8x128xf32>
    %40 = arith.truncf %27 : vector<8x32xf32> to vector<8x32xbf16>
    %cst_30 = arith.constant dense<0.000000e+00> : vector<8x128xf32>
    %41 = tpu.matmul %40, %24, %cst_30 {dimension_numbers = #tpu.dot_dimension_numbers<[1], [0], [0], [1], [0, 0, 1, 1], [], []>} : vector<8x32xbf16>, vector<32x128xbf16>, vector<8x128xf32> -> vector<8x128xf32>
    %42 = arith.addf %39, %41 : vector<8x128xf32>
    %43 = vector.extract_strided_slice %42 {offsets = [0, 0], sizes = [8, 32], strides = [1, 1]} : vector<8x128xf32> to vector<8x32xf32>
    %44 = arith.negf %43 : vector<8x32xf32>
    %45 = math.exp %44 : vector<8x32xf32>
    %cst_31 = arith.constant 1.000000e+00 : f32
    %46 = vector.broadcast %cst_31 : f32 to vector<8x32xf32>
    %47 = arith.addf %46, %45 : vector<8x32xf32>
    %48 = arith.divf %46, %47 : vector<8x32xf32>
    %49 = vector.extract_strided_slice %42 {offsets = [0, 32], sizes = [8, 32], strides = [1, 1]} : vector<8x128xf32> to vector<8x32xf32>
    %50 = arith.negf %49 : vector<8x32xf32>
    %51 = math.exp %50 : vector<8x32xf32>
    %cst_32 = arith.constant 1.000000e+00 : f32
    %52 = vector.broadcast %cst_32 : f32 to vector<8x32xf32>
    %53 = arith.addf %52, %51 : vector<8x32xf32>
    %54 = arith.divf %52, %53 : vector<8x32xf32>
    %55 = vector.extract_strided_slice %42 {offsets = [0, 64], sizes = [8, 32], strides = [1, 1]} : vector<8x128xf32> to vector<8x32xf32>
    %56 = math.tanh %55 : vector<8x32xf32>
    %57 = vector.extract_strided_slice %42 {offsets = [0, 96], sizes = [8, 32], strides = [1, 1]} : vector<8x128xf32> to vector<8x32xf32>
    %58 = arith.negf %57 : vector<8x32xf32>
    %59 = math.exp %58 : vector<8x32xf32>
    %cst_33 = arith.constant 1.000000e+00 : f32
    %60 = vector.broadcast %cst_33 : f32 to vector<8x32xf32>
    %61 = arith.addf %60, %59 : vector<8x32xf32>
    %62 = arith.divf %60, %61 : vector<8x32xf32>
    %63 = arith.mulf %54, %30 : vector<8x32xf32>
    %64 = arith.mulf %48, %56 : vector<8x32xf32>
    %65 = arith.addf %63, %64 : vector<8x32xf32>
    %66 = math.tanh %65 : vector<8x32xf32>
    %67 = arith.mulf %62, %66 : vector<8x32xf32>
    %c0_34 = arith.constant 0 : index
    %68 = arith.index_cast %35 : i32 to index
    %c0_35 = arith.constant 0 : index
    %c0_36 = arith.constant 0 : index
    %69 = vector.load %arg6[%c0_34, %68, %c0_35, %c0_36] : memref<1x8x8x32xf32, #tpu.memory_space<vmem>>, vector<1x1x8x32xf32>
    %70 = vector.shape_cast %69 : vector<1x1x8x32xf32> to vector<8x32xf32>
    %71 = vector.shape_cast %67 : vector<8x32xf32> to vector<1x1x8x32xf32>
    tpu.vector_store %arg6[%c0_34, %68, %c0_35, %c0_36], %71 {strides = array<i32>} : memref<1x8x8x32xf32, #tpu.memory_space<vmem>>, vector<1x1x8x32xf32>,
    %c1_i32_37 = arith.constant 1 : i32
    %c1_i32_38 = arith.constant 1 : i32
    %72 = arith.subi %c1_i32_38, %arg0 : i32
    %73 = arith.muli %72, %c1_i32_37 : i32
    %c7_i32_39 = arith.constant 7 : i32
    %74 = arith.subi %c7_i32_39, %c1_i32_37 : i32
    %75 = arith.muli %arg0, %74 : i32
    %76 = arith.addi %73, %75 : i32
    %c8_i32_40 = arith.constant 8 : i32
    %77 = arith.muli %76, %c8_i32_40 : i32
    %78 = tpu.assume_multiple %77, 8 : i32
    %79 = arith.index_cast %78 : i32 to index
    %c0_41 = arith.constant 0 : index
    %80 = vector.load %arg7[%79, %c0_41] : memref<64x128xf32, #tpu.memory_space<vmem>>, vector<8x128xf32>
    %81 = arith.truncf %67 : vector<8x32xf32> to vector<8x32xbf16>
    %cst_42 = arith.constant dense<0.000000e+00> : vector<8x128xf32>
    %82 = tpu.matmul %81, %24, %cst_42 {dimension_numbers = #tpu.dot_dimension_numbers<[1], [0], [0], [1], [0, 0, 1, 1], [], []>} : vector<8x32xbf16>, vector<32x128xbf16>, vector<8x128xf32> -> vector<8x128xf32>
    %83 = arith.addf %80, %82 : vector<8x128xf32>
    %84 = vector.extract_strided_slice %83 {offsets = [0, 0], sizes = [8, 32], strides = [1, 1]} : vector<8x128xf32> to vector<8x32xf32>
    %85 = arith.negf %84 : vector<8x32xf32>
    %86 = math.exp %85 : vector<8x32xf32>
    %cst_43 = arith.constant 1.000000e+00 : f32
    %87 = vector.broadcast %cst_43 : f32 to vector<8x32xf32>
    %88 = arith.addf %87, %86 : vector<8x32xf32>
    %89 = arith.divf %87, %88 : vector<8x32xf32>
    %90 = vector.extract_strided_slice %83 {offsets = [0, 32], sizes = [8, 32], strides = [1, 1]} : vector<8x128xf32> to vector<8x32xf32>
    %91 = arith.negf %90 : vector<8x32xf32>
    %92 = math.exp %91 : vector<8x32xf32>
    %cst_44 = arith.constant 1.000000e+00 : f32
    %93 = vector.broadcast %cst_44 : f32 to vector<8x32xf32>
    %94 = arith.addf %93, %92 : vector<8x32xf32>
    %95 = arith.divf %93, %94 : vector<8x32xf32>
    %96 = vector.extract_strided_slice %83 {offsets = [0, 64], sizes = [8, 32], strides = [1, 1]} : vector<8x128xf32> to vector<8x32xf32>
    %97 = math.tanh %96 : vector<8x32xf32>
    %98 = vector.extract_strided_slice %83 {offsets = [0, 96], sizes = [8, 32], strides = [1, 1]} : vector<8x128xf32> to vector<8x32xf32>
    %99 = arith.negf %98 : vector<8x32xf32>
    %100 = math.exp %99 : vector<8x32xf32>
    %cst_45 = arith.constant 1.000000e+00 : f32
    %101 = vector.broadcast %cst_45 : f32 to vector<8x32xf32>
    %102 = arith.addf %101, %100 : vector<8x32xf32>
    %103 = arith.divf %101, %102 : vector<8x32xf32>
    %104 = arith.mulf %95, %65 : vector<8x32xf32>
    %105 = arith.mulf %89, %97 : vector<8x32xf32>
    %106 = arith.addf %104, %105 : vector<8x32xf32>
    %107 = math.tanh %106 : vector<8x32xf32>
    %108 = arith.mulf %103, %107 : vector<8x32xf32>
    %c0_46 = arith.constant 0 : index
    %109 = arith.index_cast %76 : i32 to index
    %c0_47 = arith.constant 0 : index
    %c0_48 = arith.constant 0 : index
    %110 = vector.load %arg6[%c0_46, %109, %c0_47, %c0_48] : memref<1x8x8x32xf32, #tpu.memory_space<vmem>>, vector<1x1x8x32xf32>
    %111 = vector.shape_cast %110 : vector<1x1x8x32xf32> to vector<8x32xf32>
    %112 = vector.shape_cast %108 : vector<8x32xf32> to vector<1x1x8x32xf32>
    tpu.vector_store %arg6[%c0_46, %109, %c0_47, %c0_48], %112 {strides = array<i32>} : memref<1x8x8x32xf32, #tpu.memory_space<vmem>>, vector<1x1x8x32xf32>,
    %c2_i32 = arith.constant 2 : i32
    %c1_i32_49 = arith.constant 1 : i32
    %113 = arith.subi %c1_i32_49, %arg0 : i32
    %114 = arith.muli %113, %c2_i32 : i32
    %c7_i32_50 = arith.constant 7 : i32
    %115 = arith.subi %c7_i32_50, %c2_i32 : i32
    %116 = arith.muli %arg0, %115 : i32
    %117 = arith.addi %114, %116 : i32
    %c8_i32_51 = arith.constant 8 : i32
    %118 = arith.muli %117, %c8_i32_51 : i32
    %119 = tpu.assume_multiple %118, 8 : i32
    %120 = arith.index_cast %119 : i32 to index
    %c0_52 = arith.constant 0 : index
    %121 = vector.load %arg7[%120, %c0_52] : memref<64x128xf32, #tpu.memory_space<vmem>>, vector<8x128xf32>
    %122 = arith.truncf %108 : vector<8x32xf32> to vector<8x32xbf16>
    %cst_53 = arith.constant dense<0.000000e+00> : vector<8x128xf32>
    %123 = tpu.matmul %122, %24, %cst_53 {dimension_numbers = #tpu.dot_dimension_numbers<[1], [0], [0], [1], [0, 0, 1, 1], [], []>} : vector<8x32xbf16>, vector<32x128xbf16>, vector<8x128xf32> -> vector<8x128xf32>
    %124 = arith.addf %121, %123 : vector<8x128xf32>
    %125 = vector.extract_strided_slice %124 {offsets = [0, 0], sizes = [8, 32], strides = [1, 1]} : vector<8x128xf32> to vector<8x32xf32>
    %126 = arith.negf %125 : vector<8x32xf32>
    %127 = math.exp %126 : vector<8x32xf32>
    %cst_54 = arith.constant 1.000000e+00 : f32
    %128 = vector.broadcast %cst_54 : f32 to vector<8x32xf32>
    %129 = arith.addf %128, %127 : vector<8x32xf32>
    %130 = arith.divf %128, %129 : vector<8x32xf32>
    %131 = vector.extract_strided_slice %124 {offsets = [0, 32], sizes = [8, 32], strides = [1, 1]} : vector<8x128xf32> to vector<8x32xf32>
    %132 = arith.negf %131 : vector<8x32xf32>
    %133 = math.exp %132 : vector<8x32xf32>
    %cst_55 = arith.constant 1.000000e+00 : f32
    %134 = vector.broadcast %cst_55 : f32 to vector<8x32xf32>
    %135 = arith.addf %134, %133 : vector<8x32xf32>
    %136 = arith.divf %134, %135 : vector<8x32xf32>
    %137 = vector.extract_strided_slice %124 {offsets = [0, 64], sizes = [8, 32], strides = [1, 1]} : vector<8x128xf32> to vector<8x32xf32>
    %138 = math.tanh %137 : vector<8x32xf32>
    %139 = vector.extract_strided_slice %124 {offsets = [0, 96], sizes = [8, 32], strides = [1, 1]} : vector<8x128xf32> to vector<8x32xf32>
    %140 = arith.negf %139 : vector<8x32xf32>
    %141 = math.exp %140 : vector<8x32xf32>
    %cst_56 = arith.constant 1.000000e+00 : f32
    %142 = vector.broadcast %cst_56 : f32 to vector<8x32xf32>
    %143 = arith.addf %142, %141 : vector<8x32xf32>
    %144 = arith.divf %142, %143 : vector<8x32xf32>
    %145 = arith.mulf %136, %106 : vector<8x32xf32>
    %146 = arith.mulf %130, %138 : vector<8x32xf32>
    %147 = arith.addf %145, %146 : vector<8x32xf32>
    %148 = math.tanh %147 : vector<8x32xf32>
    %149 = arith.mulf %144, %148 : vector<8x32xf32>
    %c0_57 = arith.constant 0 : index
    %150 = arith.index_cast %117 : i32 to index
    %c0_58 = arith.constant 0 : index
    %c0_59 = arith.constant 0 : index
    %151 = vector.load %arg6[%c0_57, %150, %c0_58, %c0_59] : memref<1x8x8x32xf32, #tpu.memory_space<vmem>>, vector<1x1x8x32xf32>
    %152 = vector.shape_cast %151 : vector<1x1x8x32xf32> to vector<8x32xf32>
    %153 = vector.shape_cast %149 : vector<8x32xf32> to vector<1x1x8x32xf32>
    tpu.vector_store %arg6[%c0_57, %150, %c0_58, %c0_59], %153 {strides = array<i32>} : memref<1x8x8x32xf32, #tpu.memory_space<vmem>>, vector<1x1x8x32xf32>,
    %c3_i32 = arith.constant 3 : i32
    %c1_i32_60 = arith.constant 1 : i32
    %154 = arith.subi %c1_i32_60, %arg0 : i32
    %155 = arith.muli %154, %c3_i32 : i32
    %c7_i32_61 = arith.constant 7 : i32
    %156 = arith.subi %c7_i32_61, %c3_i32 : i32
    %157 = arith.muli %arg0, %156 : i32
    %158 = arith.addi %155, %157 : i32
    %c8_i32_62 = arith.constant 8 : i32
    %159 = arith.muli %158, %c8_i32_62 : i32
    %160 = tpu.assume_multiple %159, 8 : i32
    %161 = arith.index_cast %160 : i32 to index
    %c0_63 = arith.constant 0 : index
    %162 = vector.load %arg7[%161, %c0_63] : memref<64x128xf32, #tpu.memory_space<vmem>>, vector<8x128xf32>
    %163 = arith.truncf %149 : vector<8x32xf32> to vector<8x32xbf16>
    %cst_64 = arith.constant dense<0.000000e+00> : vector<8x128xf32>
    %164 = tpu.matmul %163, %24, %cst_64 {dimension_numbers = #tpu.dot_dimension_numbers<[1], [0], [0], [1], [0, 0, 1, 1], [], []>} : vector<8x32xbf16>, vector<32x128xbf16>, vector<8x128xf32> -> vector<8x128xf32>
    %165 = arith.addf %162, %164 : vector<8x128xf32>
    %166 = vector.extract_strided_slice %165 {offsets = [0, 0], sizes = [8, 32], strides = [1, 1]} : vector<8x128xf32> to vector<8x32xf32>
    %167 = arith.negf %166 : vector<8x32xf32>
    %168 = math.exp %167 : vector<8x32xf32>
    %cst_65 = arith.constant 1.000000e+00 : f32
    %169 = vector.broadcast %cst_65 : f32 to vector<8x32xf32>
    %170 = arith.addf %169, %168 : vector<8x32xf32>
    %171 = arith.divf %169, %170 : vector<8x32xf32>
    %172 = vector.extract_strided_slice %165 {offsets = [0, 32], sizes = [8, 32], strides = [1, 1]} : vector<8x128xf32> to vector<8x32xf32>
    %173 = arith.negf %172 : vector<8x32xf32>
    %174 = math.exp %173 : vector<8x32xf32>
    %cst_66 = arith.constant 1.000000e+00 : f32
    %175 = vector.broadcast %cst_66 : f32 to vector<8x32xf32>
    %176 = arith.addf %175, %174 : vector<8x32xf32>
    %177 = arith.divf %175, %176 : vector<8x32xf32>
    %178 = vector.extract_strided_slice %165 {offsets = [0, 64], sizes = [8, 32], strides = [1, 1]} : vector<8x128xf32> to vector<8x32xf32>
    %179 = math.tanh %178 : vector<8x32xf32>
    %180 = vector.extract_strided_slice %165 {offsets = [0, 96], sizes = [8, 32], strides = [1, 1]} : vector<8x128xf32> to vector<8x32xf32>
    %181 = arith.negf %180 : vector<8x32xf32>
    %182 = math.exp %181 : vector<8x32xf32>
    %cst_67 = arith.constant 1.000000e+00 : f32
    %183 = vector.broadcast %cst_67 : f32 to vector<8x32xf32>
    %184 = arith.addf %183, %182 : vector<8x32xf32>
    %185 = arith.divf %183, %184 : vector<8x32xf32>
    %186 = arith.mulf %177, %147 : vector<8x32xf32>
    %187 = arith.mulf %171, %179 : vector<8x32xf32>
    %188 = arith.addf %186, %187 : vector<8x32xf32>
    %189 = math.tanh %188 : vector<8x32xf32>
    %190 = arith.mulf %185, %189 : vector<8x32xf32>
    %c0_68 = arith.constant 0 : index
    %191 = arith.index_cast %158 : i32 to index
    %c0_69 = arith.constant 0 : index
    %c0_70 = arith.constant 0 : index
    %192 = vector.load %arg6[%c0_68, %191, %c0_69, %c0_70] : memref<1x8x8x32xf32, #tpu.memory_space<vmem>>, vector<1x1x8x32xf32>
    %193 = vector.shape_cast %192 : vector<1x1x8x32xf32> to vector<8x32xf32>
    %194 = vector.shape_cast %190 : vector<8x32xf32> to vector<1x1x8x32xf32>
    tpu.vector_store %arg6[%c0_68, %191, %c0_69, %c0_70], %194 {strides = array<i32>} : memref<1x8x8x32xf32, #tpu.memory_space<vmem>>, vector<1x1x8x32xf32>,
    %c4_i32 = arith.constant 4 : i32
    %c1_i32_71 = arith.constant 1 : i32
    %195 = arith.subi %c1_i32_71, %arg0 : i32
    %196 = arith.muli %195, %c4_i32 : i32
    %c7_i32_72 = arith.constant 7 : i32
    %197 = arith.subi %c7_i32_72, %c4_i32 : i32
    %198 = arith.muli %arg0, %197 : i32
    %199 = arith.addi %196, %198 : i32
    %c8_i32_73 = arith.constant 8 : i32
    %200 = arith.muli %199, %c8_i32_73 : i32
    %201 = tpu.assume_multiple %200, 8 : i32
    %202 = arith.index_cast %201 : i32 to index
    %c0_74 = arith.constant 0 : index
    %203 = vector.load %arg7[%202, %c0_74] : memref<64x128xf32, #tpu.memory_space<vmem>>, vector<8x128xf32>
    %204 = arith.truncf %190 : vector<8x32xf32> to vector<8x32xbf16>
    %cst_75 = arith.constant dense<0.000000e+00> : vector<8x128xf32>
    %205 = tpu.matmul %204, %24, %cst_75 {dimension_numbers = #tpu.dot_dimension_numbers<[1], [0], [0], [1], [0, 0, 1, 1], [], []>} : vector<8x32xbf16>, vector<32x128xbf16>, vector<8x128xf32> -> vector<8x128xf32>
    %206 = arith.addf %203, %205 : vector<8x128xf32>
    %207 = vector.extract_strided_slice %206 {offsets = [0, 0], sizes = [8, 32], strides = [1, 1]} : vector<8x128xf32> to vector<8x32xf32>
    %208 = arith.negf %207 : vector<8x32xf32>
    %209 = math.exp %208 : vector<8x32xf32>
    %cst_76 = arith.constant 1.000000e+00 : f32
    %210 = vector.broadcast %cst_76 : f32 to vector<8x32xf32>
    %211 = arith.addf %210, %209 : vector<8x32xf32>
    %212 = arith.divf %210, %211 : vector<8x32xf32>
    %213 = vector.extract_strided_slice %206 {offsets = [0, 32], sizes = [8, 32], strides = [1, 1]} : vector<8x128xf32> to vector<8x32xf32>
    %214 = arith.negf %213 : vector<8x32xf32>
    %215 = math.exp %214 : vector<8x32xf32>
    %cst_77 = arith.constant 1.000000e+00 : f32
    %216 = vector.broadcast %cst_77 : f32 to vector<8x32xf32>
    %217 = arith.addf %216, %215 : vector<8x32xf32>
    %218 = arith.divf %216, %217 : vector<8x32xf32>
    %219 = vector.extract_strided_slice %206 {offsets = [0, 64], sizes = [8, 32], strides = [1, 1]} : vector<8x128xf32> to vector<8x32xf32>
    %220 = math.tanh %219 : vector<8x32xf32>
    %221 = vector.extract_strided_slice %206 {offsets = [0, 96], sizes = [8, 32], strides = [1, 1]} : vector<8x128xf32> to vector<8x32xf32>
    %222 = arith.negf %221 : vector<8x32xf32>
    %223 = math.exp %222 : vector<8x32xf32>
    %cst_78 = arith.constant 1.000000e+00 : f32
    %224 = vector.broadcast %cst_78 : f32 to vector<8x32xf32>
    %225 = arith.addf %224, %223 : vector<8x32xf32>
    %226 = arith.divf %224, %225 : vector<8x32xf32>
    %227 = arith.mulf %218, %188 : vector<8x32xf32>
    %228 = arith.mulf %212, %220 : vector<8x32xf32>
    %229 = arith.addf %227, %228 : vector<8x32xf32>
    %230 = math.tanh %229 : vector<8x32xf32>
    %231 = arith.mulf %226, %230 : vector<8x32xf32>
    %c0_79 = arith.constant 0 : index
    %232 = arith.index_cast %199 : i32 to index
    %c0_80 = arith.constant 0 : index
    %c0_81 = arith.constant 0 : index
    %233 = vector.load %arg6[%c0_79, %232, %c0_80, %c0_81] : memref<1x8x8x32xf32, #tpu.memory_space<vmem>>, vector<1x1x8x32xf32>
    %234 = vector.shape_cast %233 : vector<1x1x8x32xf32> to vector<8x32xf32>
    %235 = vector.shape_cast %231 : vector<8x32xf32> to vector<1x1x8x32xf32>
    tpu.vector_store %arg6[%c0_79, %232, %c0_80, %c0_81], %235 {strides = array<i32>} : memref<1x8x8x32xf32, #tpu.memory_space<vmem>>, vector<1x1x8x32xf32>,
    %c5_i32 = arith.constant 5 : i32
    %c1_i32_82 = arith.constant 1 : i32
    %236 = arith.subi %c1_i32_82, %arg0 : i32
    %237 = arith.muli %236, %c5_i32 : i32
    %c7_i32_83 = arith.constant 7 : i32
    %238 = arith.subi %c7_i32_83, %c5_i32 : i32
    %239 = arith.muli %arg0, %238 : i32
    %240 = arith.addi %237, %239 : i32
    %c8_i32_84 = arith.constant 8 : i32
    %241 = arith.muli %240, %c8_i32_84 : i32
    %242 = tpu.assume_multiple %241, 8 : i32
    %243 = arith.index_cast %242 : i32 to index
    %c0_85 = arith.constant 0 : index
    %244 = vector.load %arg7[%243, %c0_85] : memref<64x128xf32, #tpu.memory_space<vmem>>, vector<8x128xf32>
    %245 = arith.truncf %231 : vector<8x32xf32> to vector<8x32xbf16>
    %cst_86 = arith.constant dense<0.000000e+00> : vector<8x128xf32>
    %246 = tpu.matmul %245, %24, %cst_86 {dimension_numbers = #tpu.dot_dimension_numbers<[1], [0], [0], [1], [0, 0, 1, 1], [], []>} : vector<8x32xbf16>, vector<32x128xbf16>, vector<8x128xf32> -> vector<8x128xf32>
    %247 = arith.addf %244, %246 : vector<8x128xf32>
    %248 = vector.extract_strided_slice %247 {offsets = [0, 0], sizes = [8, 32], strides = [1, 1]} : vector<8x128xf32> to vector<8x32xf32>
    %249 = arith.negf %248 : vector<8x32xf32>
    %250 = math.exp %249 : vector<8x32xf32>
    %cst_87 = arith.constant 1.000000e+00 : f32
    %251 = vector.broadcast %cst_87 : f32 to vector<8x32xf32>
    %252 = arith.addf %251, %250 : vector<8x32xf32>
    %253 = arith.divf %251, %252 : vector<8x32xf32>
    %254 = vector.extract_strided_slice %247 {offsets = [0, 32], sizes = [8, 32], strides = [1, 1]} : vector<8x128xf32> to vector<8x32xf32>
    %255 = arith.negf %254 : vector<8x32xf32>
    %256 = math.exp %255 : vector<8x32xf32>
    %cst_88 = arith.constant 1.000000e+00 : f32
    %257 = vector.broadcast %cst_88 : f32 to vector<8x32xf32>
    %258 = arith.addf %257, %256 : vector<8x32xf32>
    %259 = arith.divf %257, %258 : vector<8x32xf32>
    %260 = vector.extract_strided_slice %247 {offsets = [0, 64], sizes = [8, 32], strides = [1, 1]} : vector<8x128xf32> to vector<8x32xf32>
    %261 = math.tanh %260 : vector<8x32xf32>
    %262 = vector.extract_strided_slice %247 {offsets = [0, 96], sizes = [8, 32], strides = [1, 1]} : vector<8x128xf32> to vector<8x32xf32>
    %263 = arith.negf %262 : vector<8x32xf32>
    %264 = math.exp %263 : vector<8x32xf32>
    %cst_89 = arith.constant 1.000000e+00 : f32
    %265 = vector.broadcast %cst_89 : f32 to vector<8x32xf32>
    %266 = arith.addf %265, %264 : vector<8x32xf32>
    %267 = arith.divf %265, %266 : vector<8x32xf32>
    %268 = arith.mulf %259, %229 : vector<8x32xf32>
    %269 = arith.mulf %253, %261 : vector<8x32xf32>
    %270 = arith.addf %268, %269 : vector<8x32xf32>
    %271 = math.tanh %270 : vector<8x32xf32>
    %272 = arith.mulf %267, %271 : vector<8x32xf32>
    %c0_90 = arith.constant 0 : index
    %273 = arith.index_cast %240 : i32 to index
    %c0_91 = arith.constant 0 : index
    %c0_92 = arith.constant 0 : index
    %274 = vector.load %arg6[%c0_90, %273, %c0_91, %c0_92] : memref<1x8x8x32xf32, #tpu.memory_space<vmem>>, vector<1x1x8x32xf32>
    %275 = vector.shape_cast %274 : vector<1x1x8x32xf32> to vector<8x32xf32>
    %276 = vector.shape_cast %272 : vector<8x32xf32> to vector<1x1x8x32xf32>
    tpu.vector_store %arg6[%c0_90, %273, %c0_91, %c0_92], %276 {strides = array<i32>} : memref<1x8x8x32xf32, #tpu.memory_space<vmem>>, vector<1x1x8x32xf32>,
    %c6_i32 = arith.constant 6 : i32
    %c1_i32_93 = arith.constant 1 : i32
    %277 = arith.subi %c1_i32_93, %arg0 : i32
    %278 = arith.muli %277, %c6_i32 : i32
    %c7_i32_94 = arith.constant 7 : i32
    %279 = arith.subi %c7_i32_94, %c6_i32 : i32
    %280 = arith.muli %arg0, %279 : i32
    %281 = arith.addi %278, %280 : i32
    %c8_i32_95 = arith.constant 8 : i32
    %282 = arith.muli %281, %c8_i32_95 : i32
    %283 = tpu.assume_multiple %282, 8 : i32
    %284 = arith.index_cast %283 : i32 to index
    %c0_96 = arith.constant 0 : index
    %285 = vector.load %arg7[%284, %c0_96] : memref<64x128xf32, #tpu.memory_space<vmem>>, vector<8x128xf32>
    %286 = arith.truncf %272 : vector<8x32xf32> to vector<8x32xbf16>
    %cst_97 = arith.constant dense<0.000000e+00> : vector<8x128xf32>
    %287 = tpu.matmul %286, %24, %cst_97 {dimension_numbers = #tpu.dot_dimension_numbers<[1], [0], [0], [1], [0, 0, 1, 1], [], []>} : vector<8x32xbf16>, vector<32x128xbf16>, vector<8x128xf32> -> vector<8x128xf32>
    %288 = arith.addf %285, %287 : vector<8x128xf32>
    %289 = vector.extract_strided_slice %288 {offsets = [0, 0], sizes = [8, 32], strides = [1, 1]} : vector<8x128xf32> to vector<8x32xf32>
    %290 = arith.negf %289 : vector<8x32xf32>
    %291 = math.exp %290 : vector<8x32xf32>
    %cst_98 = arith.constant 1.000000e+00 : f32
    %292 = vector.broadcast %cst_98 : f32 to vector<8x32xf32>
    %293 = arith.addf %292, %291 : vector<8x32xf32>
    %294 = arith.divf %292, %293 : vector<8x32xf32>
    %295 = vector.extract_strided_slice %288 {offsets = [0, 32], sizes = [8, 32], strides = [1, 1]} : vector<8x128xf32> to vector<8x32xf32>
    %296 = arith.negf %295 : vector<8x32xf32>
    %297 = math.exp %296 : vector<8x32xf32>
    %cst_99 = arith.constant 1.000000e+00 : f32
    %298 = vector.broadcast %cst_99 : f32 to vector<8x32xf32>
    %299 = arith.addf %298, %297 : vector<8x32xf32>
    %300 = arith.divf %298, %299 : vector<8x32xf32>
    %301 = vector.extract_strided_slice %288 {offsets = [0, 64], sizes = [8, 32], strides = [1, 1]} : vector<8x128xf32> to vector<8x32xf32>
    %302 = math.tanh %301 : vector<8x32xf32>
    %303 = vector.extract_strided_slice %288 {offsets = [0, 96], sizes = [8, 32], strides = [1, 1]} : vector<8x128xf32> to vector<8x32xf32>
    %304 = arith.negf %303 : vector<8x32xf32>
    %305 = math.exp %304 : vector<8x32xf32>
    %cst_100 = arith.constant 1.000000e+00 : f32
    %306 = vector.broadcast %cst_100 : f32 to vector<8x32xf32>
    %307 = arith.addf %306, %305 : vector<8x32xf32>
    %308 = arith.divf %306, %307 : vector<8x32xf32>
    %309 = arith.mulf %300, %270 : vector<8x32xf32>
    %310 = arith.mulf %294, %302 : vector<8x32xf32>
    %311 = arith.addf %309, %310 : vector<8x32xf32>
    %312 = math.tanh %311 : vector<8x32xf32>
    %313 = arith.mulf %308, %312 : vector<8x32xf32>
    %c0_101 = arith.constant 0 : index
    %314 = arith.index_cast %281 : i32 to index
    %c0_102 = arith.constant 0 : index
    %c0_103 = arith.constant 0 : index
    %315 = vector.load %arg6[%c0_101, %314, %c0_102, %c0_103] : memref<1x8x8x32xf32, #tpu.memory_space<vmem>>, vector<1x1x8x32xf32>
    %316 = vector.shape_cast %315 : vector<1x1x8x32xf32> to vector<8x32xf32>
    %317 = vector.shape_cast %313 : vector<8x32xf32> to vector<1x1x8x32xf32>
    tpu.vector_store %arg6[%c0_101, %314, %c0_102, %c0_103], %317 {strides = array<i32>} : memref<1x8x8x32xf32, #tpu.memory_space<vmem>>, vector<1x1x8x32xf32>,
    %c7_i32_104 = arith.constant 7 : i32
    %c1_i32_105 = arith.constant 1 : i32
    %318 = arith.subi %c1_i32_105, %arg0 : i32
    %319 = arith.muli %318, %c7_i32_104 : i32
    %c7_i32_106 = arith.constant 7 : i32
    %320 = arith.subi %c7_i32_106, %c7_i32_104 : i32
    %321 = arith.muli %arg0, %320 : i32
    %322 = arith.addi %319, %321 : i32
    %c8_i32_107 = arith.constant 8 : i32
    %323 = arith.muli %322, %c8_i32_107 : i32
    %324 = tpu.assume_multiple %323, 8 : i32
    %325 = arith.index_cast %324 : i32 to index
    %c0_108 = arith.constant 0 : index
    %326 = vector.load %arg7[%325, %c0_108] : memref<64x128xf32, #tpu.memory_space<vmem>>, vector<8x128xf32>
    %327 = arith.truncf %313 : vector<8x32xf32> to vector<8x32xbf16>
    %cst_109 = arith.constant dense<0.000000e+00> : vector<8x128xf32>
    %328 = tpu.matmul %327, %24, %cst_109 {dimension_numbers = #tpu.dot_dimension_numbers<[1], [0], [0], [1], [0, 0, 1, 1], [], []>} : vector<8x32xbf16>, vector<32x128xbf16>, vector<8x128xf32> -> vector<8x128xf32>
    %329 = arith.addf %326, %328 : vector<8x128xf32>
    %330 = vector.extract_strided_slice %329 {offsets = [0, 0], sizes = [8, 32], strides = [1, 1]} : vector<8x128xf32> to vector<8x32xf32>
    %331 = arith.negf %330 : vector<8x32xf32>
    %332 = math.exp %331 : vector<8x32xf32>
    %cst_110 = arith.constant 1.000000e+00 : f32
    %333 = vector.broadcast %cst_110 : f32 to vector<8x32xf32>
    %334 = arith.addf %333, %332 : vector<8x32xf32>
    %335 = arith.divf %333, %334 : vector<8x32xf32>
    %336 = vector.extract_strided_slice %329 {offsets = [0, 32], sizes = [8, 32], strides = [1, 1]} : vector<8x128xf32> to vector<8x32xf32>
    %337 = arith.negf %336 : vector<8x32xf32>
    %338 = math.exp %337 : vector<8x32xf32>
    %cst_111 = arith.constant 1.000000e+00 : f32
    %339 = vector.broadcast %cst_111 : f32 to vector<8x32xf32>
    %340 = arith.addf %339, %338 : vector<8x32xf32>
    %341 = arith.divf %339, %340 : vector<8x32xf32>
    %342 = vector.extract_strided_slice %329 {offsets = [0, 64], sizes = [8, 32], strides = [1, 1]} : vector<8x128xf32> to vector<8x32xf32>
    %343 = math.tanh %342 : vector<8x32xf32>
    %344 = vector.extract_strided_slice %329 {offsets = [0, 96], sizes = [8, 32], strides = [1, 1]} : vector<8x128xf32> to vector<8x32xf32>
    %345 = arith.negf %344 : vector<8x32xf32>
    %346 = math.exp %345 : vector<8x32xf32>
    %cst_112 = arith.constant 1.000000e+00 : f32
    %347 = vector.broadcast %cst_112 : f32 to vector<8x32xf32>
    %348 = arith.addf %347, %346 : vector<8x32xf32>
    %349 = arith.divf %347, %348 : vector<8x32xf32>
    %350 = arith.mulf %341, %311 : vector<8x32xf32>
    %351 = arith.mulf %335, %343 : vector<8x32xf32>
    %352 = arith.addf %350, %351 : vector<8x32xf32>
    %353 = math.tanh %352 : vector<8x32xf32>
    %354 = arith.mulf %349, %353 : vector<8x32xf32>
    %c0_113 = arith.constant 0 : index
    %355 = arith.index_cast %322 : i32 to index
    %c0_114 = arith.constant 0 : index
    %c0_115 = arith.constant 0 : index
    %356 = vector.load %arg6[%c0_113, %355, %c0_114, %c0_115] : memref<1x8x8x32xf32, #tpu.memory_space<vmem>>, vector<1x1x8x32xf32>
    %357 = vector.shape_cast %356 : vector<1x1x8x32xf32> to vector<8x32xf32>
    %358 = vector.shape_cast %354 : vector<8x32xf32> to vector<1x1x8x32xf32>
    tpu.vector_store %arg6[%c0_113, %355, %c0_114, %c0_115], %358 {strides = array<i32>} : memref<1x8x8x32xf32, #tpu.memory_space<vmem>>, vector<1x1x8x32xf32>,
    %c8_i32_116 = arith.constant 8 : i32
    %359 = arith.index_cast %arg0 : i32 to index
    %c0_117 = arith.constant 0 : index
    %c0_118 = arith.constant 0 : index
    %360 = vector.load %arg8[%359, %c0_117, %c0_118] : memref<2x8x32xf32, #tpu.memory_space<vmem>>, vector<1x8x32xf32>
    %361 = vector.shape_cast %360 : vector<1x8x32xf32> to vector<8x32xf32>
    %362 = vector.shape_cast %354 : vector<8x32xf32> to vector<1x8x32xf32>
    tpu.vector_store %arg8[%359, %c0_117, %c0_118], %362 {strides = array<i32>} : memref<2x8x32xf32, #tpu.memory_space<vmem>>, vector<1x8x32xf32>,
    %363 = arith.index_cast %arg0 : i32 to index
    %c0_119 = arith.constant 0 : index
    %c0_120 = arith.constant 0 : index
    %364 = vector.load %arg9[%363, %c0_119, %c0_120] : memref<2x8x32xf32, #tpu.memory_space<vmem>>, vector<1x8x32xf32>
    %365 = vector.shape_cast %364 : vector<1x8x32xf32> to vector<8x32xf32>
    %366 = vector.shape_cast %352 : vector<8x32xf32> to vector<1x8x32xf32>
    tpu.vector_store %arg9[%363, %c0_119, %c0_120], %366 {strides = array<i32>} : memref<2x8x32xf32, #tpu.memory_space<vmem>>, vector<1x8x32xf32>,
    return
  }
  func.func @transform_0(%arg0: i32, %arg1: i32) -> (i32, i32, i32, i32) {
    %c0_i32 = arith.constant 0 : i32
    %0 = arith.subi %c0_i32, %arg1 : i32
    %1 = arith.muli %arg0, %0 : i32
    %c1_i32 = arith.constant 1 : i32
    %2 = arith.subi %c1_i32, %arg0 : i32
    %3 = arith.muli %2, %arg1 : i32
    %4 = arith.addi %1, %3 : i32
    %c0_i32_0 = arith.constant 0 : i32
    %c0_i32_1 = arith.constant 0 : i32
    %c0_i32_2 = arith.constant 0 : i32
    %c0_i32_3 = arith.constant 0 : i32
    return %c0_i32_0, %4, %c0_i32_1, %c0_i32_2 : i32, i32, i32, i32
  }
  func.func @transform_1(%arg0: i32, %arg1: i32) -> (i32, i32, i32, i32) {
    %c0_i32 = arith.constant 0 : i32
    %c0_i32_0 = arith.constant 0 : i32
    %c0_i32_1 = arith.constant 0 : i32
    %c0_i32_2 = arith.constant 0 : i32
    return %arg0, %c0_i32, %c0_i32_0, %c0_i32_1 : i32, i32, i32, i32
  }
  func.func @transform_2(%arg0: i32, %arg1: i32) -> (i32, i32, i32) {
    %c0_i32 = arith.constant 0 : i32
    %c0_i32_0 = arith.constant 0 : i32
    %c0_i32_1 = arith.constant 0 : i32
    return %arg0, %c0_i32, %c0_i32_0 : i32, i32, i32
  }
  func.func @transform_3(%arg0: i32, %arg1: i32) -> (i32, i32, i32) {
    %c0_i32 = arith.constant 0 : i32
    %c0_i32_0 = arith.constant 0 : i32
    %c0_i32_1 = arith.constant 0 : i32
    return %arg0, %c0_i32, %c0_i32_0 : i32, i32, i32
  }
  func.func @transform_4(%arg0: i32, %arg1: i32) -> (i32, i32, i32, i32) {
    %c0_i32 = arith.constant 0 : i32
    %0 = arith.subi %c0_i32, %arg1 : i32
    %1 = arith.muli %arg0, %0 : i32
    %c1_i32 = arith.constant 1 : i32
    %2 = arith.subi %c1_i32, %arg0 : i32
    %3 = arith.muli %2, %arg1 : i32
    %4 = arith.addi %1, %3 : i32
    %c0_i32_0 = arith.constant 0 : i32
    %c0_i32_1 = arith.constant 0 : i32
    %c0_i32_2 = arith.constant 0 : i32
    return %arg0, %4, %c0_i32_0, %c0_i32_1 : i32, i32, i32, i32
  }
}

module attributes {stable_mosaic.version = 11 : i64} {
  func.func @_bilstm_chunk_kernel(%arg0: i32, %arg1: i32, %arg2: memref<1x8x8x32xf32, #tpu.memory_space<vmem>>, %arg3: memref<1x1x32x128xbf16, #tpu.memory_space<vmem>>, %arg4: memref<1x32x128xbf16, #tpu.memory_space<vmem>>, %arg5: memref<1x1x128xf32, #tpu.memory_space<vmem>>, %arg6: memref<1x8x8x32xf32, #tpu.memory_space<vmem>>, %arg7: memref<64x128xf32, #tpu.memory_space<vmem>>, %arg8: memref<2x8x32xf32, #tpu.memory_space<vmem>>, %arg9: memref<2x8x32xf32, #tpu.memory_space<vmem>>) attributes {dimension_semantics = [#tpu.dimension_semantics<parallel>, #tpu.dimension_semantics<arbitrary>], iteration_bounds = array<i64: 2, 1>, scalar_prefetch = 0 : i64, scratch_operands = 3 : i64, tpu.core_type = #tpu.core_type<tc>, window_params = [{transform_indices = @transform_0, window_bounds = array<i64: 1, 8, 8, 32>}, {pipeline_mode = #tpu.pipeline_mode<synchronous>, transform_indices = @transform_1, window_bounds = array<i64: 1, 1, 32, 128>}, {pipeline_mode = #tpu.pipeline_mode<synchronous>, transform_indices = @transform_2, window_bounds = array<i64: 1, 32, 128>}, {pipeline_mode = #tpu.pipeline_mode<synchronous>, transform_indices = @transform_3, window_bounds = array<i64: 1, 1, 128>}, {transform_indices = @transform_4, window_bounds = array<i64: 1, 8, 8, 32>}]} {
    %c0_i32 = arith.constant 0 : i32
    %0 = arith.cmpi eq, %arg1, %c0_i32 : i32
    %1 = arith.extui %0 : i1 to i32
    %c0_i32_0 = arith.constant 0 : i32
    %2 = arith.cmpi ne, %1, %c0_i32_0 : i32
    scf.if %2 {
      %cst_113 = arith.constant 0.000000e+00 : f32
      %359 = vector.broadcast %cst_113 : f32 to vector<8x32xf32>
      %360 = arith.index_cast %arg0 : i32 to index
      %c0_114 = arith.constant 0 : index
      %c0_115 = arith.constant 0 : index
      %361 = vector.load %arg8[%360, %c0_114, %c0_115] : memref<2x8x32xf32, #tpu.memory_space<vmem>>, vector<1x8x32xf32>
      %362 = vector.shape_cast %361 : vector<1x8x32xf32> to vector<8x32xf32>
      %363 = vector.shape_cast %359 : vector<8x32xf32> to vector<1x8x32xf32>
      tpu.vector_store %arg8[%360, %c0_114, %c0_115], %363 {strides = array<i32>} : memref<2x8x32xf32, #tpu.memory_space<vmem>>, vector<1x8x32xf32>,
      %cst_116 = arith.constant 0.000000e+00 : f32
      %364 = vector.broadcast %cst_116 : f32 to vector<8x32xf32>
      %365 = arith.index_cast %arg0 : i32 to index
      %c0_117 = arith.constant 0 : index
      %c0_118 = arith.constant 0 : index
      %366 = vector.load %arg9[%365, %c0_117, %c0_118] : memref<2x8x32xf32, #tpu.memory_space<vmem>>, vector<1x8x32xf32>
      %367 = vector.shape_cast %366 : vector<1x8x32xf32> to vector<8x32xf32>
      %368 = vector.shape_cast %364 : vector<8x32xf32> to vector<1x8x32xf32>
      tpu.vector_store %arg9[%365, %c0_117, %c0_118], %368 {strides = array<i32>} : memref<2x8x32xf32, #tpu.memory_space<vmem>>, vector<1x8x32xf32>,
    } else {
    }
    %c0 = arith.constant 0 : index
    %c0_1 = arith.constant 0 : index
    %c0_2 = arith.constant 0 : index
    %c0_3 = arith.constant 0 : index
    %3 = vector.load %arg2[%c0, %c0_1, %c0_2, %c0_3] : memref<1x8x8x32xf32, #tpu.memory_space<vmem>>, vector<1x8x8x32xf32>
    %4 = vector.shape_cast %3 : vector<1x8x8x32xf32> to vector<8x8x32xf32>
    %5 = vector.shape_cast %4 : vector<8x8x32xf32> to vector<64x32xf32>
    %6 = arith.truncf %5 : vector<64x32xf32> to vector<64x32xbf16>
    %c0_4 = arith.constant 0 : index
    %c0_5 = arith.constant 0 : index
    %c0_6 = arith.constant 0 : index
    %c0_7 = arith.constant 0 : index
    %7 = vector.load %arg3[%c0_4, %c0_5, %c0_6, %c0_7] : memref<1x1x32x128xbf16, #tpu.memory_space<vmem>>, vector<1x1x32x128xbf16>
    %8 = vector.shape_cast %7 : vector<1x1x32x128xbf16> to vector<32x128xbf16>
    %cst = arith.constant dense<0.000000e+00> : vector<64x128xf32>
    %9 = tpu.matmul %6, %8, %cst {dimension_numbers = #tpu.dot_dimension_numbers<[1], [0], [0], [1], [0, 0, 1, 1], [], []>} : vector<64x32xbf16>, vector<32x128xbf16>, vector<64x128xf32> -> vector<64x128xf32>
    %c0_8 = arith.constant 0 : index
    %c0_9 = arith.constant 0 : index
    %c0_10 = arith.constant 0 : index
    %10 = vector.load %arg5[%c0_8, %c0_9, %c0_10] : memref<1x1x128xf32, #tpu.memory_space<vmem>>, vector<1x1x128xf32>
    %11 = vector.shape_cast %10 : vector<1x1x128xf32> to vector<1x128xf32>
    %12 = vector.broadcast %11 : vector<1x128xf32> to vector<64x128xf32>
    %13 = arith.addf %9, %12 : vector<64x128xf32>
    %c0_11 = arith.constant 0 : index
    %c0_12 = arith.constant 0 : index
    %14 = vector.load %arg7[%c0_11, %c0_12] : memref<64x128xf32, #tpu.memory_space<vmem>>, vector<64x128xf32>
    tpu.vector_store %arg7[%c0_11, %c0_12], %13 {strides = array<i32>} : memref<64x128xf32, #tpu.memory_space<vmem>>, vector<64x128xf32>,
    %c0_13 = arith.constant 0 : index
    %c0_14 = arith.constant 0 : index
    %c0_15 = arith.constant 0 : index
    %15 = vector.load %arg4[%c0_13, %c0_14, %c0_15] : memref<1x32x128xbf16, #tpu.memory_space<vmem>>, vector<1x32x128xbf16>
    %16 = vector.shape_cast %15 : vector<1x32x128xbf16> to vector<32x128xbf16>
    %17 = arith.index_cast %arg0 : i32 to index
    %c0_16 = arith.constant 0 : index
    %c0_17 = arith.constant 0 : index
    %18 = vector.load %arg8[%17, %c0_16, %c0_17] : memref<2x8x32xf32, #tpu.memory_space<vmem>>, vector<1x8x32xf32>
    %19 = vector.shape_cast %18 : vector<1x8x32xf32> to vector<8x32xf32>
    %20 = arith.index_cast %arg0 : i32 to index
    %c0_18 = arith.constant 0 : index
    %c0_19 = arith.constant 0 : index
    %21 = vector.load %arg9[%20, %c0_18, %c0_19] : memref<2x8x32xf32, #tpu.memory_space<vmem>>, vector<1x8x32xf32>
    %22 = vector.shape_cast %21 : vector<1x8x32xf32> to vector<8x32xf32>
    %c0_i32_20 = arith.constant 0 : i32
    %c1_i32 = arith.constant 1 : i32
    %23 = arith.subi %c1_i32, %arg0 : i32
    %24 = arith.muli %23, %c0_i32_20 : i32
    %c7_i32 = arith.constant 7 : i32
    %25 = arith.subi %c7_i32, %c0_i32_20 : i32
    %26 = arith.muli %arg0, %25 : i32
    %27 = arith.addi %24, %26 : i32
    %c8_i32 = arith.constant 8 : i32
    %28 = arith.muli %27, %c8_i32 : i32
    %29 = tpu.assume_multiple %28, 8 : i32
    %30 = arith.index_cast %29 : i32 to index
    %c0_21 = arith.constant 0 : index
    %31 = vector.load %arg7[%30, %c0_21] : memref<64x128xf32, #tpu.memory_space<vmem>>, vector<8x128xf32>
    %32 = arith.truncf %19 : vector<8x32xf32> to vector<8x32xbf16>
    %cst_22 = arith.constant dense<0.000000e+00> : vector<8x128xf32>
    %33 = tpu.matmul %32, %16, %cst_22 {dimension_numbers = #tpu.dot_dimension_numbers<[1], [0], [0], [1], [0, 0, 1, 1], [], []>} : vector<8x32xbf16>, vector<32x128xbf16>, vector<8x128xf32> -> vector<8x128xf32>
    %34 = arith.addf %31, %33 : vector<8x128xf32>
    %35 = vector.extract_strided_slice %34 {offsets = [0, 0], sizes = [8, 32], strides = [1, 1]} : vector<8x128xf32> to vector<8x32xf32>
    %36 = arith.negf %35 : vector<8x32xf32>
    %37 = math.exp %36 : vector<8x32xf32>
    %cst_23 = arith.constant 1.000000e+00 : f32
    %38 = vector.broadcast %cst_23 : f32 to vector<8x32xf32>
    %39 = arith.addf %38, %37 : vector<8x32xf32>
    %40 = arith.divf %38, %39 : vector<8x32xf32>
    %41 = vector.extract_strided_slice %34 {offsets = [0, 32], sizes = [8, 32], strides = [1, 1]} : vector<8x128xf32> to vector<8x32xf32>
    %42 = arith.negf %41 : vector<8x32xf32>
    %43 = math.exp %42 : vector<8x32xf32>
    %cst_24 = arith.constant 1.000000e+00 : f32
    %44 = vector.broadcast %cst_24 : f32 to vector<8x32xf32>
    %45 = arith.addf %44, %43 : vector<8x32xf32>
    %46 = arith.divf %44, %45 : vector<8x32xf32>
    %47 = vector.extract_strided_slice %34 {offsets = [0, 64], sizes = [8, 32], strides = [1, 1]} : vector<8x128xf32> to vector<8x32xf32>
    %48 = math.tanh %47 : vector<8x32xf32>
    %49 = vector.extract_strided_slice %34 {offsets = [0, 96], sizes = [8, 32], strides = [1, 1]} : vector<8x128xf32> to vector<8x32xf32>
    %50 = arith.negf %49 : vector<8x32xf32>
    %51 = math.exp %50 : vector<8x32xf32>
    %cst_25 = arith.constant 1.000000e+00 : f32
    %52 = vector.broadcast %cst_25 : f32 to vector<8x32xf32>
    %53 = arith.addf %52, %51 : vector<8x32xf32>
    %54 = arith.divf %52, %53 : vector<8x32xf32>
    %55 = arith.mulf %46, %22 : vector<8x32xf32>
    %56 = arith.mulf %40, %48 : vector<8x32xf32>
    %57 = arith.addf %55, %56 : vector<8x32xf32>
    %58 = math.tanh %57 : vector<8x32xf32>
    %59 = arith.mulf %54, %58 : vector<8x32xf32>
    %c0_26 = arith.constant 0 : index
    %60 = arith.index_cast %27 : i32 to index
    %c0_27 = arith.constant 0 : index
    %c0_28 = arith.constant 0 : index
    %61 = vector.load %arg6[%c0_26, %60, %c0_27, %c0_28] : memref<1x8x8x32xf32, #tpu.memory_space<vmem>>, vector<1x1x8x32xf32>
    %62 = vector.shape_cast %61 : vector<1x1x8x32xf32> to vector<8x32xf32>
    %63 = vector.shape_cast %59 : vector<8x32xf32> to vector<1x1x8x32xf32>
    tpu.vector_store %arg6[%c0_26, %60, %c0_27, %c0_28], %63 {strides = array<i32>} : memref<1x8x8x32xf32, #tpu.memory_space<vmem>>, vector<1x1x8x32xf32>,
    %c1_i32_29 = arith.constant 1 : i32
    %c1_i32_30 = arith.constant 1 : i32
    %64 = arith.subi %c1_i32_30, %arg0 : i32
    %65 = arith.muli %64, %c1_i32_29 : i32
    %c7_i32_31 = arith.constant 7 : i32
    %66 = arith.subi %c7_i32_31, %c1_i32_29 : i32
    %67 = arith.muli %arg0, %66 : i32
    %68 = arith.addi %65, %67 : i32
    %c8_i32_32 = arith.constant 8 : i32
    %69 = arith.muli %68, %c8_i32_32 : i32
    %70 = tpu.assume_multiple %69, 8 : i32
    %71 = arith.index_cast %70 : i32 to index
    %c0_33 = arith.constant 0 : index
    %72 = vector.load %arg7[%71, %c0_33] : memref<64x128xf32, #tpu.memory_space<vmem>>, vector<8x128xf32>
    %73 = arith.truncf %59 : vector<8x32xf32> to vector<8x32xbf16>
    %cst_34 = arith.constant dense<0.000000e+00> : vector<8x128xf32>
    %74 = tpu.matmul %73, %16, %cst_34 {dimension_numbers = #tpu.dot_dimension_numbers<[1], [0], [0], [1], [0, 0, 1, 1], [], []>} : vector<8x32xbf16>, vector<32x128xbf16>, vector<8x128xf32> -> vector<8x128xf32>
    %75 = arith.addf %72, %74 : vector<8x128xf32>
    %76 = vector.extract_strided_slice %75 {offsets = [0, 0], sizes = [8, 32], strides = [1, 1]} : vector<8x128xf32> to vector<8x32xf32>
    %77 = arith.negf %76 : vector<8x32xf32>
    %78 = math.exp %77 : vector<8x32xf32>
    %cst_35 = arith.constant 1.000000e+00 : f32
    %79 = vector.broadcast %cst_35 : f32 to vector<8x32xf32>
    %80 = arith.addf %79, %78 : vector<8x32xf32>
    %81 = arith.divf %79, %80 : vector<8x32xf32>
    %82 = vector.extract_strided_slice %75 {offsets = [0, 32], sizes = [8, 32], strides = [1, 1]} : vector<8x128xf32> to vector<8x32xf32>
    %83 = arith.negf %82 : vector<8x32xf32>
    %84 = math.exp %83 : vector<8x32xf32>
    %cst_36 = arith.constant 1.000000e+00 : f32
    %85 = vector.broadcast %cst_36 : f32 to vector<8x32xf32>
    %86 = arith.addf %85, %84 : vector<8x32xf32>
    %87 = arith.divf %85, %86 : vector<8x32xf32>
    %88 = vector.extract_strided_slice %75 {offsets = [0, 64], sizes = [8, 32], strides = [1, 1]} : vector<8x128xf32> to vector<8x32xf32>
    %89 = math.tanh %88 : vector<8x32xf32>
    %90 = vector.extract_strided_slice %75 {offsets = [0, 96], sizes = [8, 32], strides = [1, 1]} : vector<8x128xf32> to vector<8x32xf32>
    %91 = arith.negf %90 : vector<8x32xf32>
    %92 = math.exp %91 : vector<8x32xf32>
    %cst_37 = arith.constant 1.000000e+00 : f32
    %93 = vector.broadcast %cst_37 : f32 to vector<8x32xf32>
    %94 = arith.addf %93, %92 : vector<8x32xf32>
    %95 = arith.divf %93, %94 : vector<8x32xf32>
    %96 = arith.mulf %87, %57 : vector<8x32xf32>
    %97 = arith.mulf %81, %89 : vector<8x32xf32>
    %98 = arith.addf %96, %97 : vector<8x32xf32>
    %99 = math.tanh %98 : vector<8x32xf32>
    %100 = arith.mulf %95, %99 : vector<8x32xf32>
    %c0_38 = arith.constant 0 : index
    %101 = arith.index_cast %68 : i32 to index
    %c0_39 = arith.constant 0 : index
    %c0_40 = arith.constant 0 : index
    %102 = vector.load %arg6[%c0_38, %101, %c0_39, %c0_40] : memref<1x8x8x32xf32, #tpu.memory_space<vmem>>, vector<1x1x8x32xf32>
    %103 = vector.shape_cast %102 : vector<1x1x8x32xf32> to vector<8x32xf32>
    %104 = vector.shape_cast %100 : vector<8x32xf32> to vector<1x1x8x32xf32>
    tpu.vector_store %arg6[%c0_38, %101, %c0_39, %c0_40], %104 {strides = array<i32>} : memref<1x8x8x32xf32, #tpu.memory_space<vmem>>, vector<1x1x8x32xf32>,
    %c2_i32 = arith.constant 2 : i32
    %c1_i32_41 = arith.constant 1 : i32
    %105 = arith.subi %c1_i32_41, %arg0 : i32
    %106 = arith.muli %105, %c2_i32 : i32
    %c7_i32_42 = arith.constant 7 : i32
    %107 = arith.subi %c7_i32_42, %c2_i32 : i32
    %108 = arith.muli %arg0, %107 : i32
    %109 = arith.addi %106, %108 : i32
    %c8_i32_43 = arith.constant 8 : i32
    %110 = arith.muli %109, %c8_i32_43 : i32
    %111 = tpu.assume_multiple %110, 8 : i32
    %112 = arith.index_cast %111 : i32 to index
    %c0_44 = arith.constant 0 : index
    %113 = vector.load %arg7[%112, %c0_44] : memref<64x128xf32, #tpu.memory_space<vmem>>, vector<8x128xf32>
    %114 = arith.truncf %100 : vector<8x32xf32> to vector<8x32xbf16>
    %cst_45 = arith.constant dense<0.000000e+00> : vector<8x128xf32>
    %115 = tpu.matmul %114, %16, %cst_45 {dimension_numbers = #tpu.dot_dimension_numbers<[1], [0], [0], [1], [0, 0, 1, 1], [], []>} : vector<8x32xbf16>, vector<32x128xbf16>, vector<8x128xf32> -> vector<8x128xf32>
    %116 = arith.addf %113, %115 : vector<8x128xf32>
    %117 = vector.extract_strided_slice %116 {offsets = [0, 0], sizes = [8, 32], strides = [1, 1]} : vector<8x128xf32> to vector<8x32xf32>
    %118 = arith.negf %117 : vector<8x32xf32>
    %119 = math.exp %118 : vector<8x32xf32>
    %cst_46 = arith.constant 1.000000e+00 : f32
    %120 = vector.broadcast %cst_46 : f32 to vector<8x32xf32>
    %121 = arith.addf %120, %119 : vector<8x32xf32>
    %122 = arith.divf %120, %121 : vector<8x32xf32>
    %123 = vector.extract_strided_slice %116 {offsets = [0, 32], sizes = [8, 32], strides = [1, 1]} : vector<8x128xf32> to vector<8x32xf32>
    %124 = arith.negf %123 : vector<8x32xf32>
    %125 = math.exp %124 : vector<8x32xf32>
    %cst_47 = arith.constant 1.000000e+00 : f32
    %126 = vector.broadcast %cst_47 : f32 to vector<8x32xf32>
    %127 = arith.addf %126, %125 : vector<8x32xf32>
    %128 = arith.divf %126, %127 : vector<8x32xf32>
    %129 = vector.extract_strided_slice %116 {offsets = [0, 64], sizes = [8, 32], strides = [1, 1]} : vector<8x128xf32> to vector<8x32xf32>
    %130 = math.tanh %129 : vector<8x32xf32>
    %131 = vector.extract_strided_slice %116 {offsets = [0, 96], sizes = [8, 32], strides = [1, 1]} : vector<8x128xf32> to vector<8x32xf32>
    %132 = arith.negf %131 : vector<8x32xf32>
    %133 = math.exp %132 : vector<8x32xf32>
    %cst_48 = arith.constant 1.000000e+00 : f32
    %134 = vector.broadcast %cst_48 : f32 to vector<8x32xf32>
    %135 = arith.addf %134, %133 : vector<8x32xf32>
    %136 = arith.divf %134, %135 : vector<8x32xf32>
    %137 = arith.mulf %128, %98 : vector<8x32xf32>
    %138 = arith.mulf %122, %130 : vector<8x32xf32>
    %139 = arith.addf %137, %138 : vector<8x32xf32>
    %140 = math.tanh %139 : vector<8x32xf32>
    %141 = arith.mulf %136, %140 : vector<8x32xf32>
    %c0_49 = arith.constant 0 : index
    %142 = arith.index_cast %109 : i32 to index
    %c0_50 = arith.constant 0 : index
    %c0_51 = arith.constant 0 : index
    %143 = vector.load %arg6[%c0_49, %142, %c0_50, %c0_51] : memref<1x8x8x32xf32, #tpu.memory_space<vmem>>, vector<1x1x8x32xf32>
    %144 = vector.shape_cast %143 : vector<1x1x8x32xf32> to vector<8x32xf32>
    %145 = vector.shape_cast %141 : vector<8x32xf32> to vector<1x1x8x32xf32>
    tpu.vector_store %arg6[%c0_49, %142, %c0_50, %c0_51], %145 {strides = array<i32>} : memref<1x8x8x32xf32, #tpu.memory_space<vmem>>, vector<1x1x8x32xf32>,
    %c3_i32 = arith.constant 3 : i32
    %c1_i32_52 = arith.constant 1 : i32
    %146 = arith.subi %c1_i32_52, %arg0 : i32
    %147 = arith.muli %146, %c3_i32 : i32
    %c7_i32_53 = arith.constant 7 : i32
    %148 = arith.subi %c7_i32_53, %c3_i32 : i32
    %149 = arith.muli %arg0, %148 : i32
    %150 = arith.addi %147, %149 : i32
    %c8_i32_54 = arith.constant 8 : i32
    %151 = arith.muli %150, %c8_i32_54 : i32
    %152 = tpu.assume_multiple %151, 8 : i32
    %153 = arith.index_cast %152 : i32 to index
    %c0_55 = arith.constant 0 : index
    %154 = vector.load %arg7[%153, %c0_55] : memref<64x128xf32, #tpu.memory_space<vmem>>, vector<8x128xf32>
    %155 = arith.truncf %141 : vector<8x32xf32> to vector<8x32xbf16>
    %cst_56 = arith.constant dense<0.000000e+00> : vector<8x128xf32>
    %156 = tpu.matmul %155, %16, %cst_56 {dimension_numbers = #tpu.dot_dimension_numbers<[1], [0], [0], [1], [0, 0, 1, 1], [], []>} : vector<8x32xbf16>, vector<32x128xbf16>, vector<8x128xf32> -> vector<8x128xf32>
    %157 = arith.addf %154, %156 : vector<8x128xf32>
    %158 = vector.extract_strided_slice %157 {offsets = [0, 0], sizes = [8, 32], strides = [1, 1]} : vector<8x128xf32> to vector<8x32xf32>
    %159 = arith.negf %158 : vector<8x32xf32>
    %160 = math.exp %159 : vector<8x32xf32>
    %cst_57 = arith.constant 1.000000e+00 : f32
    %161 = vector.broadcast %cst_57 : f32 to vector<8x32xf32>
    %162 = arith.addf %161, %160 : vector<8x32xf32>
    %163 = arith.divf %161, %162 : vector<8x32xf32>
    %164 = vector.extract_strided_slice %157 {offsets = [0, 32], sizes = [8, 32], strides = [1, 1]} : vector<8x128xf32> to vector<8x32xf32>
    %165 = arith.negf %164 : vector<8x32xf32>
    %166 = math.exp %165 : vector<8x32xf32>
    %cst_58 = arith.constant 1.000000e+00 : f32
    %167 = vector.broadcast %cst_58 : f32 to vector<8x32xf32>
    %168 = arith.addf %167, %166 : vector<8x32xf32>
    %169 = arith.divf %167, %168 : vector<8x32xf32>
    %170 = vector.extract_strided_slice %157 {offsets = [0, 64], sizes = [8, 32], strides = [1, 1]} : vector<8x128xf32> to vector<8x32xf32>
    %171 = math.tanh %170 : vector<8x32xf32>
    %172 = vector.extract_strided_slice %157 {offsets = [0, 96], sizes = [8, 32], strides = [1, 1]} : vector<8x128xf32> to vector<8x32xf32>
    %173 = arith.negf %172 : vector<8x32xf32>
    %174 = math.exp %173 : vector<8x32xf32>
    %cst_59 = arith.constant 1.000000e+00 : f32
    %175 = vector.broadcast %cst_59 : f32 to vector<8x32xf32>
    %176 = arith.addf %175, %174 : vector<8x32xf32>
    %177 = arith.divf %175, %176 : vector<8x32xf32>
    %178 = arith.mulf %169, %139 : vector<8x32xf32>
    %179 = arith.mulf %163, %171 : vector<8x32xf32>
    %180 = arith.addf %178, %179 : vector<8x32xf32>
    %181 = math.tanh %180 : vector<8x32xf32>
    %182 = arith.mulf %177, %181 : vector<8x32xf32>
    %c0_60 = arith.constant 0 : index
    %183 = arith.index_cast %150 : i32 to index
    %c0_61 = arith.constant 0 : index
    %c0_62 = arith.constant 0 : index
    %184 = vector.load %arg6[%c0_60, %183, %c0_61, %c0_62] : memref<1x8x8x32xf32, #tpu.memory_space<vmem>>, vector<1x1x8x32xf32>
    %185 = vector.shape_cast %184 : vector<1x1x8x32xf32> to vector<8x32xf32>
    %186 = vector.shape_cast %182 : vector<8x32xf32> to vector<1x1x8x32xf32>
    tpu.vector_store %arg6[%c0_60, %183, %c0_61, %c0_62], %186 {strides = array<i32>} : memref<1x8x8x32xf32, #tpu.memory_space<vmem>>, vector<1x1x8x32xf32>,
    %c4_i32 = arith.constant 4 : i32
    %c1_i32_63 = arith.constant 1 : i32
    %187 = arith.subi %c1_i32_63, %arg0 : i32
    %188 = arith.muli %187, %c4_i32 : i32
    %c7_i32_64 = arith.constant 7 : i32
    %189 = arith.subi %c7_i32_64, %c4_i32 : i32
    %190 = arith.muli %arg0, %189 : i32
    %191 = arith.addi %188, %190 : i32
    %c8_i32_65 = arith.constant 8 : i32
    %192 = arith.muli %191, %c8_i32_65 : i32
    %193 = tpu.assume_multiple %192, 8 : i32
    %194 = arith.index_cast %193 : i32 to index
    %c0_66 = arith.constant 0 : index
    %195 = vector.load %arg7[%194, %c0_66] : memref<64x128xf32, #tpu.memory_space<vmem>>, vector<8x128xf32>
    %196 = arith.truncf %182 : vector<8x32xf32> to vector<8x32xbf16>
    %cst_67 = arith.constant dense<0.000000e+00> : vector<8x128xf32>
    %197 = tpu.matmul %196, %16, %cst_67 {dimension_numbers = #tpu.dot_dimension_numbers<[1], [0], [0], [1], [0, 0, 1, 1], [], []>} : vector<8x32xbf16>, vector<32x128xbf16>, vector<8x128xf32> -> vector<8x128xf32>
    %198 = arith.addf %195, %197 : vector<8x128xf32>
    %199 = vector.extract_strided_slice %198 {offsets = [0, 0], sizes = [8, 32], strides = [1, 1]} : vector<8x128xf32> to vector<8x32xf32>
    %200 = arith.negf %199 : vector<8x32xf32>
    %201 = math.exp %200 : vector<8x32xf32>
    %cst_68 = arith.constant 1.000000e+00 : f32
    %202 = vector.broadcast %cst_68 : f32 to vector<8x32xf32>
    %203 = arith.addf %202, %201 : vector<8x32xf32>
    %204 = arith.divf %202, %203 : vector<8x32xf32>
    %205 = vector.extract_strided_slice %198 {offsets = [0, 32], sizes = [8, 32], strides = [1, 1]} : vector<8x128xf32> to vector<8x32xf32>
    %206 = arith.negf %205 : vector<8x32xf32>
    %207 = math.exp %206 : vector<8x32xf32>
    %cst_69 = arith.constant 1.000000e+00 : f32
    %208 = vector.broadcast %cst_69 : f32 to vector<8x32xf32>
    %209 = arith.addf %208, %207 : vector<8x32xf32>
    %210 = arith.divf %208, %209 : vector<8x32xf32>
    %211 = vector.extract_strided_slice %198 {offsets = [0, 64], sizes = [8, 32], strides = [1, 1]} : vector<8x128xf32> to vector<8x32xf32>
    %212 = math.tanh %211 : vector<8x32xf32>
    %213 = vector.extract_strided_slice %198 {offsets = [0, 96], sizes = [8, 32], strides = [1, 1]} : vector<8x128xf32> to vector<8x32xf32>
    %214 = arith.negf %213 : vector<8x32xf32>
    %215 = math.exp %214 : vector<8x32xf32>
    %cst_70 = arith.constant 1.000000e+00 : f32
    %216 = vector.broadcast %cst_70 : f32 to vector<8x32xf32>
    %217 = arith.addf %216, %215 : vector<8x32xf32>
    %218 = arith.divf %216, %217 : vector<8x32xf32>
    %219 = arith.mulf %210, %180 : vector<8x32xf32>
    %220 = arith.mulf %204, %212 : vector<8x32xf32>
    %221 = arith.addf %219, %220 : vector<8x32xf32>
    %222 = math.tanh %221 : vector<8x32xf32>
    %223 = arith.mulf %218, %222 : vector<8x32xf32>
    %c0_71 = arith.constant 0 : index
    %224 = arith.index_cast %191 : i32 to index
    %c0_72 = arith.constant 0 : index
    %c0_73 = arith.constant 0 : index
    %225 = vector.load %arg6[%c0_71, %224, %c0_72, %c0_73] : memref<1x8x8x32xf32, #tpu.memory_space<vmem>>, vector<1x1x8x32xf32>
    %226 = vector.shape_cast %225 : vector<1x1x8x32xf32> to vector<8x32xf32>
    %227 = vector.shape_cast %223 : vector<8x32xf32> to vector<1x1x8x32xf32>
    tpu.vector_store %arg6[%c0_71, %224, %c0_72, %c0_73], %227 {strides = array<i32>} : memref<1x8x8x32xf32, #tpu.memory_space<vmem>>, vector<1x1x8x32xf32>,
    %c5_i32 = arith.constant 5 : i32
    %c1_i32_74 = arith.constant 1 : i32
    %228 = arith.subi %c1_i32_74, %arg0 : i32
    %229 = arith.muli %228, %c5_i32 : i32
    %c7_i32_75 = arith.constant 7 : i32
    %230 = arith.subi %c7_i32_75, %c5_i32 : i32
    %231 = arith.muli %arg0, %230 : i32
    %232 = arith.addi %229, %231 : i32
    %c8_i32_76 = arith.constant 8 : i32
    %233 = arith.muli %232, %c8_i32_76 : i32
    %234 = tpu.assume_multiple %233, 8 : i32
    %235 = arith.index_cast %234 : i32 to index
    %c0_77 = arith.constant 0 : index
    %236 = vector.load %arg7[%235, %c0_77] : memref<64x128xf32, #tpu.memory_space<vmem>>, vector<8x128xf32>
    %237 = arith.truncf %223 : vector<8x32xf32> to vector<8x32xbf16>
    %cst_78 = arith.constant dense<0.000000e+00> : vector<8x128xf32>
    %238 = tpu.matmul %237, %16, %cst_78 {dimension_numbers = #tpu.dot_dimension_numbers<[1], [0], [0], [1], [0, 0, 1, 1], [], []>} : vector<8x32xbf16>, vector<32x128xbf16>, vector<8x128xf32> -> vector<8x128xf32>
    %239 = arith.addf %236, %238 : vector<8x128xf32>
    %240 = vector.extract_strided_slice %239 {offsets = [0, 0], sizes = [8, 32], strides = [1, 1]} : vector<8x128xf32> to vector<8x32xf32>
    %241 = arith.negf %240 : vector<8x32xf32>
    %242 = math.exp %241 : vector<8x32xf32>
    %cst_79 = arith.constant 1.000000e+00 : f32
    %243 = vector.broadcast %cst_79 : f32 to vector<8x32xf32>
    %244 = arith.addf %243, %242 : vector<8x32xf32>
    %245 = arith.divf %243, %244 : vector<8x32xf32>
    %246 = vector.extract_strided_slice %239 {offsets = [0, 32], sizes = [8, 32], strides = [1, 1]} : vector<8x128xf32> to vector<8x32xf32>
    %247 = arith.negf %246 : vector<8x32xf32>
    %248 = math.exp %247 : vector<8x32xf32>
    %cst_80 = arith.constant 1.000000e+00 : f32
    %249 = vector.broadcast %cst_80 : f32 to vector<8x32xf32>
    %250 = arith.addf %249, %248 : vector<8x32xf32>
    %251 = arith.divf %249, %250 : vector<8x32xf32>
    %252 = vector.extract_strided_slice %239 {offsets = [0, 64], sizes = [8, 32], strides = [1, 1]} : vector<8x128xf32> to vector<8x32xf32>
    %253 = math.tanh %252 : vector<8x32xf32>
    %254 = vector.extract_strided_slice %239 {offsets = [0, 96], sizes = [8, 32], strides = [1, 1]} : vector<8x128xf32> to vector<8x32xf32>
    %255 = arith.negf %254 : vector<8x32xf32>
    %256 = math.exp %255 : vector<8x32xf32>
    %cst_81 = arith.constant 1.000000e+00 : f32
    %257 = vector.broadcast %cst_81 : f32 to vector<8x32xf32>
    %258 = arith.addf %257, %256 : vector<8x32xf32>
    %259 = arith.divf %257, %258 : vector<8x32xf32>
    %260 = arith.mulf %251, %221 : vector<8x32xf32>
    %261 = arith.mulf %245, %253 : vector<8x32xf32>
    %262 = arith.addf %260, %261 : vector<8x32xf32>
    %263 = math.tanh %262 : vector<8x32xf32>
    %264 = arith.mulf %259, %263 : vector<8x32xf32>
    %c0_82 = arith.constant 0 : index
    %265 = arith.index_cast %232 : i32 to index
    %c0_83 = arith.constant 0 : index
    %c0_84 = arith.constant 0 : index
    %266 = vector.load %arg6[%c0_82, %265, %c0_83, %c0_84] : memref<1x8x8x32xf32, #tpu.memory_space<vmem>>, vector<1x1x8x32xf32>
    %267 = vector.shape_cast %266 : vector<1x1x8x32xf32> to vector<8x32xf32>
    %268 = vector.shape_cast %264 : vector<8x32xf32> to vector<1x1x8x32xf32>
    tpu.vector_store %arg6[%c0_82, %265, %c0_83, %c0_84], %268 {strides = array<i32>} : memref<1x8x8x32xf32, #tpu.memory_space<vmem>>, vector<1x1x8x32xf32>,
    %c6_i32 = arith.constant 6 : i32
    %c1_i32_85 = arith.constant 1 : i32
    %269 = arith.subi %c1_i32_85, %arg0 : i32
    %270 = arith.muli %269, %c6_i32 : i32
    %c7_i32_86 = arith.constant 7 : i32
    %271 = arith.subi %c7_i32_86, %c6_i32 : i32
    %272 = arith.muli %arg0, %271 : i32
    %273 = arith.addi %270, %272 : i32
    %c8_i32_87 = arith.constant 8 : i32
    %274 = arith.muli %273, %c8_i32_87 : i32
    %275 = tpu.assume_multiple %274, 8 : i32
    %276 = arith.index_cast %275 : i32 to index
    %c0_88 = arith.constant 0 : index
    %277 = vector.load %arg7[%276, %c0_88] : memref<64x128xf32, #tpu.memory_space<vmem>>, vector<8x128xf32>
    %278 = arith.truncf %264 : vector<8x32xf32> to vector<8x32xbf16>
    %cst_89 = arith.constant dense<0.000000e+00> : vector<8x128xf32>
    %279 = tpu.matmul %278, %16, %cst_89 {dimension_numbers = #tpu.dot_dimension_numbers<[1], [0], [0], [1], [0, 0, 1, 1], [], []>} : vector<8x32xbf16>, vector<32x128xbf16>, vector<8x128xf32> -> vector<8x128xf32>
    %280 = arith.addf %277, %279 : vector<8x128xf32>
    %281 = vector.extract_strided_slice %280 {offsets = [0, 0], sizes = [8, 32], strides = [1, 1]} : vector<8x128xf32> to vector<8x32xf32>
    %282 = arith.negf %281 : vector<8x32xf32>
    %283 = math.exp %282 : vector<8x32xf32>
    %cst_90 = arith.constant 1.000000e+00 : f32
    %284 = vector.broadcast %cst_90 : f32 to vector<8x32xf32>
    %285 = arith.addf %284, %283 : vector<8x32xf32>
    %286 = arith.divf %284, %285 : vector<8x32xf32>
    %287 = vector.extract_strided_slice %280 {offsets = [0, 32], sizes = [8, 32], strides = [1, 1]} : vector<8x128xf32> to vector<8x32xf32>
    %288 = arith.negf %287 : vector<8x32xf32>
    %289 = math.exp %288 : vector<8x32xf32>
    %cst_91 = arith.constant 1.000000e+00 : f32
    %290 = vector.broadcast %cst_91 : f32 to vector<8x32xf32>
    %291 = arith.addf %290, %289 : vector<8x32xf32>
    %292 = arith.divf %290, %291 : vector<8x32xf32>
    %293 = vector.extract_strided_slice %280 {offsets = [0, 64], sizes = [8, 32], strides = [1, 1]} : vector<8x128xf32> to vector<8x32xf32>
    %294 = math.tanh %293 : vector<8x32xf32>
    %295 = vector.extract_strided_slice %280 {offsets = [0, 96], sizes = [8, 32], strides = [1, 1]} : vector<8x128xf32> to vector<8x32xf32>
    %296 = arith.negf %295 : vector<8x32xf32>
    %297 = math.exp %296 : vector<8x32xf32>
    %cst_92 = arith.constant 1.000000e+00 : f32
    %298 = vector.broadcast %cst_92 : f32 to vector<8x32xf32>
    %299 = arith.addf %298, %297 : vector<8x32xf32>
    %300 = arith.divf %298, %299 : vector<8x32xf32>
    %301 = arith.mulf %292, %262 : vector<8x32xf32>
    %302 = arith.mulf %286, %294 : vector<8x32xf32>
    %303 = arith.addf %301, %302 : vector<8x32xf32>
    %304 = math.tanh %303 : vector<8x32xf32>
    %305 = arith.mulf %300, %304 : vector<8x32xf32>
    %c0_93 = arith.constant 0 : index
    %306 = arith.index_cast %273 : i32 to index
    %c0_94 = arith.constant 0 : index
    %c0_95 = arith.constant 0 : index
    %307 = vector.load %arg6[%c0_93, %306, %c0_94, %c0_95] : memref<1x8x8x32xf32, #tpu.memory_space<vmem>>, vector<1x1x8x32xf32>
    %308 = vector.shape_cast %307 : vector<1x1x8x32xf32> to vector<8x32xf32>
    %309 = vector.shape_cast %305 : vector<8x32xf32> to vector<1x1x8x32xf32>
    tpu.vector_store %arg6[%c0_93, %306, %c0_94, %c0_95], %309 {strides = array<i32>} : memref<1x8x8x32xf32, #tpu.memory_space<vmem>>, vector<1x1x8x32xf32>,
    %c7_i32_96 = arith.constant 7 : i32
    %c1_i32_97 = arith.constant 1 : i32
    %310 = arith.subi %c1_i32_97, %arg0 : i32
    %311 = arith.muli %310, %c7_i32_96 : i32
    %c7_i32_98 = arith.constant 7 : i32
    %312 = arith.subi %c7_i32_98, %c7_i32_96 : i32
    %313 = arith.muli %arg0, %312 : i32
    %314 = arith.addi %311, %313 : i32
    %c8_i32_99 = arith.constant 8 : i32
    %315 = arith.muli %314, %c8_i32_99 : i32
    %316 = tpu.assume_multiple %315, 8 : i32
    %317 = arith.index_cast %316 : i32 to index
    %c0_100 = arith.constant 0 : index
    %318 = vector.load %arg7[%317, %c0_100] : memref<64x128xf32, #tpu.memory_space<vmem>>, vector<8x128xf32>
    %319 = arith.truncf %305 : vector<8x32xf32> to vector<8x32xbf16>
    %cst_101 = arith.constant dense<0.000000e+00> : vector<8x128xf32>
    %320 = tpu.matmul %319, %16, %cst_101 {dimension_numbers = #tpu.dot_dimension_numbers<[1], [0], [0], [1], [0, 0, 1, 1], [], []>} : vector<8x32xbf16>, vector<32x128xbf16>, vector<8x128xf32> -> vector<8x128xf32>
    %321 = arith.addf %318, %320 : vector<8x128xf32>
    %322 = vector.extract_strided_slice %321 {offsets = [0, 0], sizes = [8, 32], strides = [1, 1]} : vector<8x128xf32> to vector<8x32xf32>
    %323 = arith.negf %322 : vector<8x32xf32>
    %324 = math.exp %323 : vector<8x32xf32>
    %cst_102 = arith.constant 1.000000e+00 : f32
    %325 = vector.broadcast %cst_102 : f32 to vector<8x32xf32>
    %326 = arith.addf %325, %324 : vector<8x32xf32>
    %327 = arith.divf %325, %326 : vector<8x32xf32>
    %328 = vector.extract_strided_slice %321 {offsets = [0, 32], sizes = [8, 32], strides = [1, 1]} : vector<8x128xf32> to vector<8x32xf32>
    %329 = arith.negf %328 : vector<8x32xf32>
    %330 = math.exp %329 : vector<8x32xf32>
    %cst_103 = arith.constant 1.000000e+00 : f32
    %331 = vector.broadcast %cst_103 : f32 to vector<8x32xf32>
    %332 = arith.addf %331, %330 : vector<8x32xf32>
    %333 = arith.divf %331, %332 : vector<8x32xf32>
    %334 = vector.extract_strided_slice %321 {offsets = [0, 64], sizes = [8, 32], strides = [1, 1]} : vector<8x128xf32> to vector<8x32xf32>
    %335 = math.tanh %334 : vector<8x32xf32>
    %336 = vector.extract_strided_slice %321 {offsets = [0, 96], sizes = [8, 32], strides = [1, 1]} : vector<8x128xf32> to vector<8x32xf32>
    %337 = arith.negf %336 : vector<8x32xf32>
    %338 = math.exp %337 : vector<8x32xf32>
    %cst_104 = arith.constant 1.000000e+00 : f32
    %339 = vector.broadcast %cst_104 : f32 to vector<8x32xf32>
    %340 = arith.addf %339, %338 : vector<8x32xf32>
    %341 = arith.divf %339, %340 : vector<8x32xf32>
    %342 = arith.mulf %333, %303 : vector<8x32xf32>
    %343 = arith.mulf %327, %335 : vector<8x32xf32>
    %344 = arith.addf %342, %343 : vector<8x32xf32>
    %345 = math.tanh %344 : vector<8x32xf32>
    %346 = arith.mulf %341, %345 : vector<8x32xf32>
    %c0_105 = arith.constant 0 : index
    %347 = arith.index_cast %314 : i32 to index
    %c0_106 = arith.constant 0 : index
    %c0_107 = arith.constant 0 : index
    %348 = vector.load %arg6[%c0_105, %347, %c0_106, %c0_107] : memref<1x8x8x32xf32, #tpu.memory_space<vmem>>, vector<1x1x8x32xf32>
    %349 = vector.shape_cast %348 : vector<1x1x8x32xf32> to vector<8x32xf32>
    %350 = vector.shape_cast %346 : vector<8x32xf32> to vector<1x1x8x32xf32>
    tpu.vector_store %arg6[%c0_105, %347, %c0_106, %c0_107], %350 {strides = array<i32>} : memref<1x8x8x32xf32, #tpu.memory_space<vmem>>, vector<1x1x8x32xf32>,
    %c8_i32_108 = arith.constant 8 : i32
    %351 = arith.index_cast %arg0 : i32 to index
    %c0_109 = arith.constant 0 : index
    %c0_110 = arith.constant 0 : index
    %352 = vector.load %arg8[%351, %c0_109, %c0_110] : memref<2x8x32xf32, #tpu.memory_space<vmem>>, vector<1x8x32xf32>
    %353 = vector.shape_cast %352 : vector<1x8x32xf32> to vector<8x32xf32>
    %354 = vector.shape_cast %346 : vector<8x32xf32> to vector<1x8x32xf32>
    tpu.vector_store %arg8[%351, %c0_109, %c0_110], %354 {strides = array<i32>} : memref<2x8x32xf32, #tpu.memory_space<vmem>>, vector<1x8x32xf32>,
    %355 = arith.index_cast %arg0 : i32 to index
    %c0_111 = arith.constant 0 : index
    %c0_112 = arith.constant 0 : index
    %356 = vector.load %arg9[%355, %c0_111, %c0_112] : memref<2x8x32xf32, #tpu.memory_space<vmem>>, vector<1x8x32xf32>
    %357 = vector.shape_cast %356 : vector<1x8x32xf32> to vector<8x32xf32>
    %358 = vector.shape_cast %344 : vector<8x32xf32> to vector<1x8x32xf32>
    tpu.vector_store %arg9[%355, %c0_111, %c0_112], %358 {strides = array<i32>} : memref<2x8x32xf32, #tpu.memory_space<vmem>>, vector<1x8x32xf32>,
    return
  }
  func.func @transform_0(%arg0: i32, %arg1: i32) -> (i32, i32, i32, i32) {
    %c0_i32 = arith.constant 0 : i32
    %0 = arith.subi %c0_i32, %arg1 : i32
    %1 = arith.muli %arg0, %0 : i32
    %c1_i32 = arith.constant 1 : i32
    %2 = arith.subi %c1_i32, %arg0 : i32
    %3 = arith.muli %2, %arg1 : i32
    %4 = arith.addi %1, %3 : i32
    %c0_i32_0 = arith.constant 0 : i32
    %c0_i32_1 = arith.constant 0 : i32
    %c0_i32_2 = arith.constant 0 : i32
    %c0_i32_3 = arith.constant 0 : i32
    return %c0_i32_0, %4, %c0_i32_1, %c0_i32_2 : i32, i32, i32, i32
  }
  func.func @transform_1(%arg0: i32, %arg1: i32) -> (i32, i32, i32, i32) {
    %c0_i32 = arith.constant 0 : i32
    %c0_i32_0 = arith.constant 0 : i32
    %c0_i32_1 = arith.constant 0 : i32
    %c0_i32_2 = arith.constant 0 : i32
    return %arg0, %c0_i32, %c0_i32_0, %c0_i32_1 : i32, i32, i32, i32
  }
  func.func @transform_2(%arg0: i32, %arg1: i32) -> (i32, i32, i32) {
    %c0_i32 = arith.constant 0 : i32
    %c0_i32_0 = arith.constant 0 : i32
    %c0_i32_1 = arith.constant 0 : i32
    return %arg0, %c0_i32, %c0_i32_0 : i32, i32, i32
  }
  func.func @transform_3(%arg0: i32, %arg1: i32) -> (i32, i32, i32) {
    %c0_i32 = arith.constant 0 : i32
    %c0_i32_0 = arith.constant 0 : i32
    %c0_i32_1 = arith.constant 0 : i32
    return %arg0, %c0_i32, %c0_i32_0 : i32, i32, i32
  }
  func.func @transform_4(%arg0: i32, %arg1: i32) -> (i32, i32, i32, i32) {
    %c0_i32 = arith.constant 0 : i32
    %0 = arith.subi %c0_i32, %arg1 : i32
    %1 = arith.muli %arg0, %0 : i32
    %c1_i32 = arith.constant 1 : i32
    %2 = arith.subi %c1_i32, %arg0 : i32
    %3 = arith.muli %2, %arg1 : i32
    %4 = arith.addi %1, %3 : i32
    %c0_i32_0 = arith.constant 0 : i32
    %c0_i32_1 = arith.constant 0 : i32
    %c0_i32_2 = arith.constant 0 : i32
    return %arg0, %4, %c0_i32_0, %c0_i32_1 : i32, i32, i32, i32
  }
}

</mosaic_0001>

<bundles_post_ra>
// kernel: lstm_encoder_forward.5
= control target key start
LH: loop header
LB: loop body
LE: loop exit
PB: predicated region body
PF: predicated region fallthrough
CT: control target
= control target key end

     0   :  { %vm61_vm0 = vcmask 261120   ;;  %s443_s1 = inlined_call_operand.vmem [shape: bf16[2,32,32], index: 1, kind: input, shape index: {}]   ;;  %s444_s0 = inlined_call_operand.vmem [shape: f32[2,8,8,32], index: 0, kind: input, shape index: {}]   ;;  %s445_s2 = inlined_call_operand.vmem [shape: f32[1,32], index: 2, kind: input, shape index: {}]   ;;  %s446_s3 = inlined_call_operand.vmem [shape: f32[8,8,32], index: 3, kind: output, shape index: {}]  }
   0x1   :  { %v316_v0 = vld [vmem:[%s443_s1 + $0x18] sm:$0xff]   ;;  %v317_v1 = vld [vmem:[%s443_s1 + $0x8] sm:$0xff]   ;;  %v318_v2 = vld [vmem:[%s443_s1 + $0x10] sm:$0xff]  }
   0x2   :  { %292 = vmatprep.subr.bf16.mxu0 %v316_v0  ;;  %304 = vmatprep.subr.bf16.mxu1 %v317_v1  ;;  %v319_v3 = vld [vmem:[%s443_s1] sm:$0xff]   ;;  %v256_v5 = vld [vmem:[%s444_s0 + $0x48] sm:$0xff]  ;;  %v257_v9 = vld [vmem:[%s444_s0 + $0x50] sm:$0xff] }
   0x3   :  { %293 = vmatpush3.bf16.msra.mxu0 %v316_v0  ;;  %305 = vmatpush3.bf16.msra.mxu1 %v317_v1  ;;  %v255_v4 = vld [vmem:[%s444_s0 + $0x40] sm:$0xff]  ;;  %v16_v8 = vld [vmem:[%s444_s0 + $0x8] sm:$0xff]  ;;  %v258_v10 = vld [vmem:[%s444_s0 + $0x58] sm:$0xff] }
   0x4   :  { %294 = vmatprep.subr.bf16.mxu0 %v318_v2  ;;  %v15_v6 = vld [vmem:[%s444_s0] sm:$0xff]  ;;  %306 = vmatprep.subr.bf16.mxu1 %v319_v3  ;;  %v40_v7 = vpack.c.bf16 %v256_v5, %v255_v4  ;;  %v41_v12 = vpack.c.bf16 %v258_v10, %v257_v9  ;;  %v17_v13 = vld [vmem:[%s444_s0 + $0x10] sm:$0xff]  ;;  %v18_v14 = vld [vmem:[%s444_s0 + $0x18] sm:$0xff] }
   0x5   :  { %v23_v11 = vpack.c.bf16 %v16_v8, %v15_v6  ;;  %v259_v15 = vld [vmem:[%s444_s0 + $0x60] sm:$0xff]  ;;  %v24_v16 = vpack.c.bf16 %v18_v14, %v17_v13  ;;  %v260_v17 = vld [vmem:[%s444_s0 + $0x68] sm:$0xff]  ;;  %v261_v22 = vld [vmem:[%s444_s0 + $0x70] sm:$0xff] }
   0x6   :  { %296 = vmatprep.mubr.msk.bf16.mxu0 %vm61_vm0, %v40_v7  ;;  %v19_v18 = vld [vmem:[%s444_s0 + $0x20] sm:$0xff]  ;;  %v20_v19 = vld [vmem:[%s444_s0 + $0x28] sm:$0xff]  ;;  %v42_v20 = vpack.c.bf16 %v260_v17, %v259_v15  ;;  %v262_v23 = vld [vmem:[%s444_s0 + $0x78] sm:$0xff] }
   0x7   :  { %295 = vmatpush3.bf16.msra.mxu0 %v318_v2  ;;  %307 = vmatpush3.bf16.msra.mxu1 %v319_v3  ;;  %v25_v21 = vpack.c.bf16 %v20_v19, %v19_v18  ;;  %v21_v24 = vld [vmem:[%s444_s0 + $0x30] sm:$0xff]  ;;  %v22_v25 = vld [vmem:[%s444_s0 + $0x38] sm:$0xff]  ;;  %v43_v26 = vpack.c.bf16 %v262_v23, %v261_v22  ;;  %v279_v30 = vld [vmem:[%s445_s2] ss:$0 sm:$0xff] }
   0x8   :  { %308 = vmatprep.mubr.msk.bf16.mxu1 %vm61_vm0, %v23_v11  ;;  %v26_v27 = vpack.c.bf16 %v22_v25, %v21_v24 }
   0xa   :  { %297 = vmatmul.mubr.msk.bf16.vlgmr.msra.gmra.mxu0 %vm61_vm0, %v41_v12  ;;  %309 = vmatmul.mubr.msk.bf16.vlgmr.msra.gmra.mxu1 %vm61_vm0, %v24_v16 }
   0xb   :  { %300 = vmatprep.mubr.msk.bf16.mxu0 %vm61_vm0, %v42_v20  ;;  %312 = vmatprep.mubr.msk.bf16.mxu1 %vm61_vm0, %v25_v21 }
  0x12   :  { %301 = vmatmul.mubr.msk.bf16.gmra.mxu0 %vm61_vm0, %v43_v26  ;;  %313 = vmatmul.mubr.msk.bf16.gmra.mxu1 %vm61_vm0, %v26_v27 }
  0xca   :  { %v298_v28 = vpop.f32.mrf.mxu0  ;;  %v310_v29 = vpop.f32.mrf.mxu1 }
  0xcb   :  { %v206_v31 = vadd.f32 %v310_v29, %v298_v28 }
  0xcc   :  { %v108_v32 = vpop.f32.mrf.mxu0  ;;  %v197_v33 = vpop.f32.mrf.mxu1 }
  0xcd   :  { %v237_v34 = vadd.f32 %v279_v30, %v206_v31  ;;  %v198_v35 = vadd.f32 %v197_v33, %v108_v32 }
  0xce   :  { %v299_v36 = vpop.f32.mrf.mxu0  ;;  %v311_v37 = vpop.f32.mrf.mxu1 }
  0xcf   :  { %245 = vst.msk [vmem:[%s446_s3 + $0x10] sm:$0xff] %vm61_vm0, %v237_v34  ;;  %v235_v38 = vadd.f32 %v279_v30, %v198_v35  ;;  %v209_v39 = vadd.f32 %v311_v37, %v299_v36 }
  0xd0   :  { %v111_v40 = vpop.f32.mrf.mxu0  ;;  %v200_v41 = vpop.f32.mrf.mxu1 }
  0xd1   :  { %243 = vst.msk [vmem:[%s446_s3] sm:$0xff] %vm61_vm0, %v235_v38  ;;  %v238_v42 = vadd.f32 %v279_v30, %v209_v39  ;;  %v201_v43 = vadd.f32 %v200_v41, %v111_v40 }
  0xd2   :  { %v302_v44 = vpop.f32.mrf.mxu0  ;;  %v314_v45 = vpop.f32.mrf.mxu1 }
  0xd3   :  { %246 = vst.msk [vmem:[%s446_s3 + $0x18] sm:$0xff] %vm61_vm0, %v238_v42  ;;  %v236_v46 = vadd.f32 %v279_v30, %v201_v43  ;;  %v222_v47 = vadd.f32 %v314_v45, %v302_v44 }
  0xd4   :  { %v124_v48 = vpop.f32.mrf.mxu0  ;;  %v213_v49 = vpop.f32.mrf.mxu1 }
  0xd5   :  { %244 = vst.msk [vmem:[%s446_s3 + $0x8] sm:$0xff] %vm61_vm0, %v236_v46  ;;  %v241_v50 = vadd.f32 %v279_v30, %v222_v47  ;;  %v214_v51 = vadd.f32 %v213_v49, %v124_v48 }
  0xd6   :  { %v303_v52 = vpop.f32.mrf.mxu0  ;;  %v315_v53 = vpop.f32.mrf.mxu1 }
  0xd7   :  { %249 = vst.msk [vmem:[%s446_s3 + $0x30] sm:$0xff] %vm61_vm0, %v241_v50  ;;  %v239_v54 = vadd.f32 %v279_v30, %v214_v51  ;;  %v225_v55 = vadd.f32 %v315_v53, %v303_v52 }
  0xd8   :  { %v127_v56 = vpop.f32.mrf.mxu0  ;;  %v216_v57 = vpop.f32.mrf.mxu1 }
  0xd9   :  { %247 = vst.msk [vmem:[%s446_s3 + $0x20] sm:$0xff] %vm61_vm0, %v239_v54  ;;  %v242_v58 = vadd.f32 %v279_v30, %v225_v55  ;;  %v217_v59 = vadd.f32 %v216_v57, %v127_v56 }
  0xdb   :  { %250 = vst.msk [vmem:[%s446_s3 + $0x38] sm:$0xff] %vm61_vm0, %v242_v58  ;;  %v240_v60 = vadd.f32 %v279_v30, %v217_v59 }
  0xdd   :  { %248 = vst.msk [vmem:[%s446_s3 + $0x28] sm:$0xff] %vm61_vm0, %v240_v60 }

// kernel: lstm_encoder_forward.4
= control target key start
LH: loop header
LB: loop body
LE: loop exit
PB: predicated region body
PF: predicated region fallthrough
CT: control target
= control target key end

     0   :  { %s1842_s15 = smov 0   ;;  %s1844_s16 = smov 0   ;;  %s2183_s0 = inlined_call_operand.vmem [shape: f32[2,8,8,32], index: 0, kind: input, shape index: {}]   ;;  %s2184_s1 = inlined_call_operand.vmem [shape: bf16[2,2,32,128], index: 1, kind: input, shape index: {}]   ;;  %s2185_s2 = inlined_call_operand.vmem [shape: bf16[2,32,128], index: 2, kind: input, shape index: {}]   ;;  %s2186_s3 = inlined_call_operand.vmem [shape: f32[2,1,128], index: 3, kind: input, shape index: {}]   ;;  %s2187_s4 = inlined_call_operand.vmem [shape: f32[2,8,8,32], index: 4, kind: output, shape index: {}]  }
   0x1   :  { %s1846_s17 = smov 0  }
   0x2 LB: > { %s26_s18 = sadd.s32 1, %s1806_s16  ;;  %p1496_p0 = scmp.ge.s32.totalorder %s1810_s17, 1  ;;  %s1810_s17 = sphi %s1846_s17, %s14_s17   ;;  %s1806_s16 = sphi %s1844_s16, %s2197_s16   ;;  %s1802_s15 = sphi %s1842_s15, %s2196_s15  }
   0x3   : > { %p28_p1 = scmp.ge.s32.totalorder %s26_s18, 2  ;;  %p235_p2 = scmp.lt.s32.totalorder %s1810_s17, 3 }
   0x5   : > { %s2199_s18 = smov (%p28_p1, %s26_s18), 0  ;;  %p236_p3 = pnand %p1496_p0, %p235_p2 }
   0x6   : > { %p304_p4 = scmp.lt.s32.totalorder (!%p236_p3), %s1802_s15, 1  ;;  %s1503_s27 = sshll.u32 (!%p236_p3), %s1802_s15, 3 }
   0x7   : > { %239 = sbr.rel (%p236_p3) target bundleno = 5578 (0x15ca), region = 36  ;;  %s1884_s30 = scalar_lea.vmem (!%p236_p3), [#allocation3], %s1503_s27 }
   0x8   : > { %s1966_s21 = scalar_lea.vmem (!%p236_p3), [#allocation4], %s1503_s27  ;;  %s594_s27 = smul.u32 (!%p236_p3), 56, %s1802_s15 }
   0x9   : > { %s1814_s26 = smov (!%p236_p3), 64   ;;  %s690_s5 = smul.u32 (!%p236_p3), 6, %s1802_s15 }
   0xa   : > { %s595_s25 = scalar_lea.vmem (!%p236_p3), [#allocation2], %s594_s27  ;;  %s1997_s6 = ssub.s32 (!%p236_p3), 1, %s1802_s15 }
   0xb   : > { %s2000_s9 = sadd.s32 (!%p236_p3), %s690_s5, %s1997_s6  ;;  %s1538_s11 = sshll.u32 (!%p236_p3), %s1997_s6, 1 }
   0xc   : > { %vm344_vm0 = vcmask 261120   ;;  %v1504_v0 = vld [vmem:[%s2183_s0 + $0x40] sm:$0xff]  ;;  %v1505_v1 = vld [vmem:[%s2183_s0 + $0x48] sm:$0xff]  ;;  %s1877_s28 = scalar_select %p304_p4, %s1802_s15, 1  ;;  %v1812_v6 = vmov 0.0   ;;  %v1506_v9 = vld [vmem:[%s2183_s0 + $0x50] sm:$0xff] }
   0xd   : > { %v348_v2 = vld [vmem:[%s2183_s0] sm:$0xff]  ;;  %v373_v3 = vpack.c.bf16 %v1505_v1, %v1504_v0  ;;  %v349_v4 = vld [vmem:[%s2183_s0 + $0x8] sm:$0xff]  ;;  %345 = vst.msk [vmem:[%s1884_s30] sm:$0xff] %vm344_vm0, %v1812_v6  ;;  %v1507_v10 = vld [vmem:[%s2183_s0 + $0x58] sm:$0xff]  ;;  %vm1813_vm1 = vmmov 0   ;;  %s1535_s10 = sshll.u32 %s2000_s9, 3 }
   0xe   : > { %v356_v5 = vpack.c.bf16 %v349_v4, %v348_v2  ;;  %s1562_s29 = sshll.u32 %s1877_s28, 5  ;;  %s1563_s8 = sshll.u32 %s1877_s28, 4  ;;  %v350_v12 = vld [vmem:[%s2183_s0 + $0x10] sm:$0xff]  ;;  %v351_v13 = vld [vmem:[%s2183_s0 + $0x18] sm:$0xff]  ;;  %v1508_v14 = vld [vmem:[%s2183_s0 + $0x60] sm:$0xff]  ;;  %v374_v19 = vpack.c.bf16 %v1507_v10, %v1506_v9  ;;  %347 = vst.msk [vmem:[%s1966_s21] sm:$0xff] %vm344_vm0, %v1812_v6 }
   0xf   : > { %1605 = vmatprep.mubr.msk.bf16.mxu0 %vm344_vm0, %v373_v3  ;;  %s308_s7 = scalar_lea.vmem %s2184_s1, %s1562_s29  ;;  %v1509_v15 = vld [vmem:[%s2183_s0 + $0x68] sm:$0xff]  ;;  %s313_s29 = scalar_lea.vmem %s2185_s2, %s1563_s8  ;;  %v352_v17 = vld [vmem:[%s2183_s0 + $0x20] sm:$0xff]  ;;  %v357_v20 = vpack.c.bf16 %v351_v13, %v350_v12  ;;  %v1510_v24 = vld [vmem:[%s2183_s0 + $0x70] sm:$0xff] }
  0x10   : > { %1617 = vmatprep.mubr.msk.bf16.mxu1 %vm344_vm0, %v356_v5  ;;  %v1718_v7 = vld [vmem:[%s308_s7 + $0x18] sm:$0xff]   ;;  %v1719_v8 = vld [vmem:[%s308_s7 + $0x8] sm:$0xff]   ;;  %v1720_v11 = vld [vmem:[%s308_s7 + $0x10] sm:$0xff]   ;;  %v375_v21 = vpack.c.bf16 %v1509_v15, %v1508_v14  ;;  %s316_s24 = scalar_lea.vmem %s2186_s3, %s1877_s28  ;;  %s774_s8 = smul.u32 5, %s1802_s15 }
  0x11   : > { %1601 = vmatprep.subr.bf16.mxu0 %v1718_v7  ;;  %1613 = vmatprep.subr.bf16.mxu1 %v1719_v8  ;;  %v1721_v16 = vld [vmem:[%s308_s7] sm:$0xff]   ;;  %v353_v18 = vld [vmem:[%s2183_s0 + $0x28] sm:$0xff]  ;;  %v1511_v25 = vld [vmem:[%s2183_s0 + $0x78] sm:$0xff]  ;;  %s693_s7 = scalar_lea.vmem [#allocation2], %s1535_s10  ;;  %s857_s19 = smul.u32 3, %s1997_s6 }
  0x12   : > { %1602 = vmatpush3.bf16.msra.mxu0 %v1718_v7  ;;  %1614 = vmatpush3.bf16.msra.mxu1 %v1719_v8  ;;  %v358_v22 = vpack.c.bf16 %v353_v18, %v352_v17  ;;  %v1921_v23 = vld [vmem:[%s313_s29 + $0x8] sm:$0xff]   ;;  %v354_v26 = vld [vmem:[%s2183_s0 + $0x30] sm:$0xff]  ;;  %v355_v27 = vld [vmem:[%s2183_s0 + $0x38] sm:$0xff]  ;;  %v376_v29 = vpack.c.bf16 %v1511_v25, %v1510_v24  ;;  %s2022_s12 = sadd.s32 %s1538_s11, %s774_s8  ;;  %s1542_s20 = sshll.u32 %s1802_s15, 2 }
  0x13   : > { %1603 = vmatprep.subr.bf16.mxu0 %v1720_v11  ;;  %1615 = vmatprep.subr.bf16.mxu1 %v1721_v16  ;;  %v1941_v28 = vld [vmem:[%s313_s29] sm:$0xff]   ;;  %v359_v30 = vpack.c.bf16 %v355_v27, %v354_v26  ;;  %s1815_s29 = smov 32   ;;  %s1539_s13 = sshll.u32 %s2022_s12, 3 }
  0x14   : > { %v590_v31 = vld [vmem:[%s1884_s30] sm:$0xff]  ;;  %s777_s14 = scalar_lea.vmem [#allocation2], %s1539_s13  ;;  %s2044_s22 = sadd.s32 %s1542_s20, %s857_s19 }
  0x15   : > { %v597_v32 = vpack.c.bf16 %v590_v31, %v590_v31  ;;  %v1528_v35 = vld [vmem:[%s316_s24] ss:$0 sm:$0xff]  ;;  %s1543_s23 = sshll.u32 %s2044_s22, 3  ;;  %s1546_s5 = sshll.u32 %s1997_s6, 2 }
  0x16   : > { %1604 = vmatpush3.bf16.msra.mxu0 %v1720_v11  ;;  %1616 = vmatpush3.bf16.msra.mxu1 %v1721_v16  ;;  %v592_v10 = vld [vmem:[%s1966_s21] sm:$0xff]  ;;  %s861_s24 = scalar_lea.vmem [#allocation2], %s1543_s23  ;;  %s1550_s19 = sshll.u32 %s1802_s15, 1 }
  0x17   : > { %1625 = vmatprep.subr.bf16.mxu0 %v1812_v6  ;;  %1633 = vmatprep.subr.bf16.mxu1 %v1812_v6 }
  0x19   : > { %1606 = vmatmul.mubr.msk.bf16.vlgmr.msra.gmra.mxu0 %vm344_vm0, %v374_v19  ;;  %1618 = vmatmul.mubr.msk.bf16.vlgmr.msra.gmra.mxu1 %vm344_vm0, %v357_v20 }
  0x1a   : > { %1609 = vmatprep.mubr.msk.bf16.mxu0 %vm344_vm0, %v375_v21  ;;  %1621 = vmatprep.mubr.msk.bf16.mxu1 %vm344_vm0, %v358_v22 }
  0x1b   : > { %1626 = vmatpush3.bf16.msra.mxu0 %v1921_v23  ;;  %1634 = vmatpush3.bf16.msra.mxu1 %v1921_v23 }
  0x1c   : > { %1627 = vmatprep.subr.bf16.mxu0 %v1812_v6  ;;  %1635 = vmatprep.subr.bf16.mxu1 %v1812_v6 }
  0x1f   : > { %1628 = vmatpush3.bf16.msra.mxu0 %v1941_v28  ;;  %1636 = vmatpush3.bf16.msra.mxu1 %v1941_v28 }
  0x20   : > { %1641 = vmatprep.subr.bf16.mxu0 %v1812_v6  ;;  %1649 = vmatprep.subr.bf16.mxu1 %v1812_v6 }
  0x21   : > { %1610 = vmatmul.mubr.msk.bf16.gmra.mxu0 %vm344_vm0, %v376_v29  ;;  %1622 = vmatmul.mubr.msk.bf16.gmra.mxu1 %vm344_vm0, %v359_v30 }
  0x22   : > { %1629 = vmatprep.mubr.msk.bf16.mxu0 %vm1813_vm1, %v1812_v6  ;;  %1637 = vmatprep.mubr.msk.bf16.mxu1 %vm1813_vm1, %v1812_v6 }
  0x29   : > { %1630 = vmatmul.mubr.msk.bf16.vlgmr.msra.gmra.mxu0 %vm344_vm0, %v597_v32 }
  0x2a   : > { %1642 = vmatpush3.bf16.msra.mxu0 %v1921_v23  ;;  %1645 = vmatprep.mubr.msk.bf16.mxu0 %vm1813_vm1, %v1812_v6 }
  0x2b   : > { %1643 = vmatprep.subr.bf16.mxu0 %v1812_v6 }
  0x2e   : > { %1644 = vmatpush3.bf16.msra.mxu0 %v1941_v28 }
  0x2f   : > { %1657 = vmatprep.subr.bf16.mxu0 %v1812_v6 }
  0xd9   : > { %v1607_v33 = vpop.f32.mrf.mxu0  ;;  %v1619_v34 = vpop.f32.mrf.mxu1 }
  0xda   : > { %v539_v36 = vadd.f32 %v1619_v34, %v1607_v33 }
  0xdb   : > { %v441_v37 = vpop.f32.mrf.mxu0  ;;  %v530_v38 = vpop.f32.mrf.mxu1 }
  0xdc   : > { %v570_v39 = vadd.f32 %v1528_v35, %v539_v36  ;;  %v531_v40 = vadd.f32 %v530_v38, %v441_v37 }
  0xdd   : > { %v1608_v41 = vpop.f32.mrf.mxu0  ;;  %v1620_v42 = vpop.f32.mrf.mxu1 }
  0xde   : > { %578 = vst [vmem:[#allocation2 + $0x10] sm:$0xff] %v570_v39  ;;  %v568_v43 = vadd.f32 %v1528_v35, %v531_v40  ;;  %v542_v44 = vadd.f32 %v1620_v42, %v1608_v41 }
  0xdf   : > { %v444_v45 = vpop.f32.mrf.mxu0  ;;  %v533_v46 = vpop.f32.mrf.mxu1 }
  0xe0   : > { %576 = vst [vmem:[#allocation2] sm:$0xff] %v568_v43  ;;  %v571_v47 = vadd.f32 %v1528_v35, %v542_v44  ;;  %v534_v48 = vadd.f32 %v533_v46, %v444_v45 }
  0xe1   : > { %v1611_v49 = vpop.f32.mrf.mxu0  ;;  %v1623_v50 = vpop.f32.mrf.mxu1 }
  0xe2   : > { %579 = vst [vmem:[#allocation2 + $0x18] sm:$0xff] %v571_v47  ;;  %v569_v51 = vadd.f32 %v1528_v35, %v534_v48  ;;  %v555_v52 = vadd.f32 %v1623_v50, %v1611_v49 }
  0xe3   : > { %v457_v53 = vpop.f32.mrf.mxu0  ;;  %v546_v54 = vpop.f32.mrf.mxu1 }
  0xe4   : > { %577 = vst [vmem:[#allocation2 + $0x8] sm:$0xff] %v569_v51  ;;  %v574_v55 = vadd.f32 %v1528_v35, %v555_v52  ;;  %v547_v56 = vadd.f32 %v546_v54, %v457_v53 }
  0xe5   : > { %v1612_v57 = vpop.f32.mrf.mxu0  ;;  %v1624_v58 = vpop.f32.mrf.mxu1 }
  0xe6   : > { %582 = vst [vmem:[#allocation2 + $0x30] sm:$0xff] %v574_v55  ;;  %v572_v59 = vadd.f32 %v1528_v35, %v547_v56  ;;  %v558_v60 = vadd.f32 %v1624_v58, %v1612_v57 }
  0xe7   : > { %v460_v61 = vpop.f32.mrf.mxu0  ;;  %v549_v62 = vpop.f32.mrf.mxu1 }
  0xe8   : > { %580 = vst [vmem:[#allocation2 + $0x20] sm:$0xff] %v572_v59  ;;  %v575_v63 = vadd.f32 %v1528_v35, %v558_v60  ;;  %v550_v0 = vadd.f32 %v549_v62, %v460_v61 }
  0xe9   : > { %v647_v1 = vpop.f32.mrf.mxu0 }
  0xea   : > { %583 = vst [vmem:[#allocation2 + $0x38] sm:$0xff] %v575_v63  ;;  %v573_v2 = vadd.f32 %v1528_v35, %v550_v0 }
  0xeb   : > { %v1631_v3 = vpop.f32.mrf.mxu0 }
  0xec   : > { %581 = vst [vmem:[#allocation2 + $0x28] sm:$0xff] %v573_v2 }
  0xed   : > { %v650_v4 = vpop.f32.mrf.mxu0 }
  0xef   : > { %v1632_v5 = vpop.f32.mrf.mxu0 }
  0xf3   : > { %v596_v7 = vld [vmem:[%s595_s25] sm:$0xff]  ;;  %s942_s25 = smul.u32 3, %s1802_s15 }
  0xf4   : > { %v653_v8 = vadd.f32 %v647_v1, %v596_v7  ;;  %v694_v27 = vld [vmem:[%s693_s7] sm:$0xff] }
  0xf5   : > { %v778_v49 = vld [vmem:[%s777_s14] sm:$0xff]  ;;  %s2065_s7 = sadd.s32 %s1546_s5, %s942_s25  ;;  %s1025_s14 = smul.u32 5, %s1997_s6 }
  0xf6   : > { %1724 = vtanh.f32 %v653_v8  ;;  %v1533_v11 = vmul.f32 -1.442695, %v653_v8  ;;  %v862_v7 = vld [vmem:[%s861_s24] sm:$0xff]  ;;  %s2191_s8 = sshll.u32 %s2065_s7, 3  ;;  %s1109_s5 = smul.u32 6, %s1997_s6 }
  0xf7   : > { %s945_s11 = scalar_lea.vmem [#allocation2], %s2191_s8  ;;  %s2086_s20 = sadd.s32 %s1550_s19, %s1025_s14 }
  0xf8   : > { %1726 = vpow2.f32 %v1533_v11  ;;  %s2190_s24 = sshll.u32 %s2086_s20, 3  ;;  %s1816_s8 = smov 96  }
  0xf9   : > { %s1029_s25 = scalar_lea.vmem [#allocation2], %s2190_s24  ;;  %s2193_s9 = sshll.u32 %s2086_s20, 3 }
 0x103   : > { %v1725_v9 = vpop.eup %1724 }
 0x104   : > { %667 = vrot.lane.b32.xlu0 %v1725_v9, %s1814_s26 }
 0x105   : > { %v1727_v12 = vpop.eup %1726 }
 0x106   : > { %v657_v13 = vadd.f32 1.0, %v1727_v12 }
 0x108   : > { %662 = vrot.lane.b32.xlu0 %v592_v10, %s1815_s29  ;;  %1728 = vrcp.f32 %v657_v13 }
 0x115   : > { %v1729_v14 = vpop.eup %1728 }
 0x176   : > { %v668_v15 = vpop.permute.xlu0 %667 }
 0x177   : > { %v670_v16 = vmul.f32 %v1729_v14, %v668_v15 }
 0x179   : > { %672 = vrot.lane.b32.xlu1 %v670_v16, %s1815_s29 }
 0x17a   : > { %v663_v17 = vpop.permute.xlu0 %662 }
 0x17b   : > { %v665_v18 = vmul.f32 %v1729_v14, %v663_v17 }
 0x1eb   : > { %v673_v19 = vpop.permute.xlu1 %672 }
 0x1ec   : > { %v675_v20 = vadd.f32 %v673_v19, %v665_v18 }
 0x1ee   : > { %1730 = vtanh.f32 %v675_v20 }
 0x1fb   : > { %v1731_v21 = vpop.eup %1730 }
 0x1fc   : > { %678 = vrot.lane.b32.xlu1 %v1731_v21, %s1814_s26 }
 0x26e   : > { %v679_v22 = vpop.permute.xlu1 %678 }
 0x26f   : > { %v1983_v24 = vmul.f32 %v1729_v14, %v679_v22 }
 0x271   : > { %v695_v25 = vpack.c.bf16 %v1983_v24, %v1983_v24 }
 0x273   : > { %697 = vrot.lane.b32.xlu0 %v695_v25, %s1815_s29 }
 0x2e5   : > { %v698_v26 = vpop.permute.xlu0 %697 }
 0x2e6   : > { %1638 = vmatmul.mubr.msk.bf16.vlgmr.msra.gmra.mxu1 %vm344_vm0, %v698_v26 }
 0x2e7   : > { %1650 = vmatpush3.bf16.msra.mxu1 %v1921_v23  ;;  %1653 = vmatprep.mubr.msk.bf16.mxu1 %vm1813_vm1, %v1812_v6 }
 0x2e8   : > { %1651 = vmatprep.subr.bf16.mxu1 %v1812_v6 }
 0x2eb   : > { %1652 = vmatpush3.bf16.msra.mxu1 %v1941_v28 }
 0x2ec   : > { %1665 = vmatprep.subr.bf16.mxu1 %v1812_v6 }
 0x3a6   : > { %v736_v29 = vpop.f32.mrf.mxu1 }
 0x3a7   : > { %v742_v30 = vadd.f32 %v736_v29, %v694_v27 }
 0x3a8   : > { %v1639_v31 = vpop.f32.mrf.mxu1 }
 0x3a9   : > { %1732 = vtanh.f32 %v742_v30  ;;  %v1537_v35 = vmul.f32 -1.442695, %v742_v30  ;;  %v946_v31 = vld [vmem:[%s945_s11] sm:$0xff]  ;;  %s2102_s11 = sadd.s32 %s1802_s15, %s1109_s5 }
 0x3aa   : > { %v739_v32 = vpop.f32.mrf.mxu1  ;;  %s2189_s14 = sshll.u32 %s2102_s11, 3 }
 0x3ab   : > { %1734 = vpow2.f32 %v1537_v35  ;;  %s1112_s19 = scalar_lea.vmem [#allocation2], %s2189_s14 }
 0x3ac   : > { %v1640_v33 = vpop.f32.mrf.mxu1 }
 0x3b6   : > { %v1733_v34 = vpop.eup %1732 }
 0x3b7   : > { %752 = vrot.lane.b32.xlu1 %v1733_v34, %s1814_s26 }
 0x3b8   : > { %v1735_v36 = vpop.eup %1734 }
 0x3b9   : > { %v746_v37 = vadd.f32 1.0, %v1735_v36 }
 0x3bb   : > { %1736 = vrcp.f32 %v746_v37 }
 0x3c8   : > { %v1737_v38 = vpop.eup %1736 }
 0x3c9   : > { %v750_v41 = vmul.f32 %v1737_v38, %v675_v20 }
 0x429   : > { %v753_v39 = vpop.permute.xlu1 %752 }
 0x42a   : > { %v755_v40 = vmul.f32 %v1737_v38, %v753_v39 }
 0x42c   : > { %757 = vrot.lane.b32.xlu0 %v755_v40, %s1815_s29 }
 0x49e   : > { %v758_v42 = vpop.permute.xlu0 %757 }
 0x49f   : > { %v760_v43 = vadd.f32 %v758_v42, %v750_v41 }
 0x4a1   : > { %1738 = vtanh.f32 %v760_v43 }
 0x4ae   : > { %v1739_v44 = vpop.eup %1738 }
 0x4af   : > { %763 = vrot.lane.b32.xlu1 %v1739_v44, %s1814_s26 }
 0x521   : > { %v764_v45 = vpop.permute.xlu1 %763 }
 0x522   : > { %v2008_v46 = vmul.f32 %v1737_v38, %v764_v45 }
 0x524   : > { %v779_v47 = vpack.c.bf16 %v2008_v46, %v2008_v46 }
 0x526   : > { %781 = vrot.lane.b32.xlu0 %v779_v47, %s1815_s29 }
 0x598   : > { %v782_v48 = vpop.permute.xlu0 %781 }
 0x599   : > { %1646 = vmatmul.mubr.msk.bf16.vlgmr.msra.gmra.mxu0 %vm344_vm0, %v782_v48 }
 0x59a   : > { %1658 = vmatpush3.bf16.msra.mxu0 %v1921_v23  ;;  %1661 = vmatprep.mubr.msk.bf16.mxu0 %vm1813_vm1, %v1812_v6 }
 0x59b   : > { %1659 = vmatprep.subr.bf16.mxu0 %v1812_v6 }
 0x59e   : > { %1660 = vmatpush3.bf16.msra.mxu0 %v1941_v28 }
 0x59f   : > { %1673 = vmatprep.subr.bf16.mxu0 %v1812_v6 }
 0x659   : > { %v820_v50 = vpop.f32.mrf.mxu0 }
 0x65a   : > { %v826_v51 = vadd.f32 %v820_v50, %v778_v49 }
 0x65b   : > { %v1647_v52 = vpop.f32.mrf.mxu0 }
 0x65c   : > { %1740 = vtanh.f32 %v826_v51  ;;  %v1541_v56 = vmul.f32 -1.442695, %v826_v51 }
 0x65d   : > { %v823_v53 = vpop.f32.mrf.mxu0 }
 0x65e   : > { %1742 = vpow2.f32 %v1541_v56  ;;  %v1030_v53 = vld [vmem:[%s1029_s25] sm:$0xff]  ;;  %s2188_s25 = smul.u32 56, %s1997_s6 }
 0x65f   : > { %v1648_v54 = vpop.f32.mrf.mxu0 }
 0x660   : > { %s1194_s5 = scalar_lea.vmem [#allocation2], %s2188_s25 }
 0x669   : > { %v1741_v55 = vpop.eup %1740 }
 0x66a   : > { %836 = vrot.lane.b32.xlu1 %v1741_v55, %s1814_s26 }
 0x66b   : > { %v1743_v57 = vpop.eup %1742 }
 0x66c   : > { %v830_v58 = vadd.f32 1.0, %v1743_v57 }
 0x66e   : > { %1744 = vrcp.f32 %v830_v58 }
 0x67b   : > { %v1745_v59 = vpop.eup %1744 }
 0x67c   : > { %v834_v62 = vmul.f32 %v1745_v59, %v760_v43 }
 0x6dc   : > { %v837_v60 = vpop.permute.xlu1 %836 }
 0x6dd   : > { %v839_v61 = vmul.f32 %v1745_v59, %v837_v60 }
 0x6df   : > { %841 = vrot.lane.b32.xlu0 %v839_v61, %s1815_s29 }
 0x751   : > { %v842_v63 = vpop.permute.xlu0 %841 }
 0x752   : > { %v844_v0 = vadd.f32 %v842_v63, %v834_v62 }
 0x754   : > { %1746 = vtanh.f32 %v844_v0 }
 0x761   : > { %v1747_v1 = vpop.eup %1746 }
 0x762   : > { %847 = vrot.lane.b32.xlu1 %v1747_v1, %s1814_s26 }
 0x7d4   : > { %v848_v2 = vpop.permute.xlu1 %847 }
 0x7d5   : > { %v2030_v3 = vmul.f32 %v1745_v59, %v848_v2 }
 0x7d7   : > { %v863_v4 = vpack.c.bf16 %v2030_v3, %v2030_v3 }
 0x7d9   : > { %865 = vrot.lane.b32.xlu0 %v863_v4, %s1815_s29 }
 0x84b   : > { %v866_v5 = vpop.permute.xlu0 %865 }
 0x84c   : > { %1654 = vmatmul.mubr.msk.bf16.vlgmr.msra.gmra.mxu1 %vm344_vm0, %v866_v5 }
 0x84d   : > { %1666 = vmatpush3.bf16.msra.mxu1 %v1921_v23  ;;  %1669 = vmatprep.mubr.msk.bf16.mxu1 %vm1813_vm1, %v1812_v6 }
 0x84e   : > { %1667 = vmatprep.subr.bf16.mxu1 %v1812_v6 }
 0x851   : > { %1668 = vmatpush3.bf16.msra.mxu1 %v1941_v28 }
 0x852   : > { %1681 = vmatprep.subr.bf16.mxu1 %v1812_v6 }
 0x90c   : > { %v904_v8 = vpop.f32.mrf.mxu1 }
 0x90d   : > { %v910_v9 = vadd.f32 %v904_v8, %v862_v7 }
 0x90e   : > { %v1655_v10 = vpop.f32.mrf.mxu1 }
 0x90f   : > { %1748 = vtanh.f32 %v910_v9  ;;  %v1545_v14 = vmul.f32 -1.442695, %v910_v9  ;;  %v1113_v9 = vld [vmem:[%s1112_s19] sm:$0xff]  ;;  %s1564_s19 = sshll.u32 %s1877_s28, 6 }
 0x910   : > { %v907_v11 = vpop.f32.mrf.mxu1  ;;  %s2128_s14 = scalar_lea.vmem %s2187_s4, %s1564_s19 }
 0x911   : > { %1750 = vpow2.f32 %v1545_v14  ;;  %s687_s24 = scalar_lea.vmem %s2128_s14, %s594_s27  ;;  %s771_s15 = scalar_lea.vmem %s2128_s14, %s1535_s10 }
 0x912   : > { %v1656_v12 = vpop.f32.mrf.mxu1  ;;  %s855_s28 = scalar_lea.vmem %s2128_s14, %s1539_s13  ;;  %s939_s27 = scalar_lea.vmem %s2128_s14, %s1543_s23 }
 0x913   : > { %s1107_s10 = scalar_lea.vmem %s2128_s14, %s2193_s9  ;;  %s2195_s13 = smul.u32 56, %s1997_s6 }
 0x91c   : > { %v1749_v13 = vpop.eup %1748 }
 0x91d   : > { %920 = vrot.lane.b32.xlu1 %v1749_v13, %s1814_s26 }
 0x91e   : > { %v1751_v15 = vpop.eup %1750 }
 0x91f   : > { %v914_v16 = vadd.f32 1.0, %v1751_v15 }
 0x921   : > { %1752 = vrcp.f32 %v914_v16 }
 0x92e   : > { %v1753_v17 = vpop.eup %1752 }
 0x92f   : > { %v918_v20 = vmul.f32 %v1753_v17, %v844_v0 }
 0x98f   : > { %v921_v18 = vpop.permute.xlu1 %920 }
 0x990   : > { %v923_v19 = vmul.f32 %v1753_v17, %v921_v18 }
 0x992   : > { %925 = vrot.lane.b32.xlu0 %v923_v19, %s1815_s29 }
 0xa04   : > { %v926_v21 = vpop.permute.xlu0 %925 }
 0xa05   : > { %v928_v22 = vadd.f32 %v926_v21, %v918_v20 }
 0xa07   : > { %1754 = vtanh.f32 %v928_v22 }
 0xa14   : > { %v1755_v25 = vpop.eup %1754 }
 0xa15   : > { %931 = vrot.lane.b32.xlu1 %v1755_v25, %s1814_s26 }
 0xa87   : > { %v932_v26 = vpop.permute.xlu1 %931 }
 0xa88   : > { %v2052_v27 = vmul.f32 %v1753_v17, %v932_v26 }
 0xa8a   : > { %v947_v29 = vpack.c.bf16 %v2052_v27, %v2052_v27 }
 0xa8c   : > { %949 = vrot.lane.b32.xlu0 %v947_v29, %s1815_s29 }
 0xafe   : > { %v950_v30 = vpop.permute.xlu0 %949 }
 0xaff   : > { %1662 = vmatmul.mubr.msk.bf16.vlgmr.msra.gmra.mxu0 %vm344_vm0, %v950_v30 }
 0xb00   : > { %1674 = vmatpush3.bf16.msra.mxu0 %v1921_v23  ;;  %1677 = vmatprep.mubr.msk.bf16.mxu0 %vm1813_vm1, %v1812_v6 }
 0xb01   : > { %1675 = vmatprep.subr.bf16.mxu0 %v1812_v6 }
 0xb04   : > { %1676 = vmatpush3.bf16.msra.mxu0 %v1941_v28 }
 0xbbf   : > { %v988_v32 = vpop.f32.mrf.mxu0 }
 0xbc0   : > { %v994_v33 = vadd.f32 %v988_v32, %v946_v31 }
 0xbc1   : > { %v1663_v34 = vpop.f32.mrf.mxu0 }
 0xbc2   : > { %1756 = vtanh.f32 %v994_v33  ;;  %v1549_v38 = vmul.f32 -1.442695, %v994_v33  ;;  %v1195_v34 = vld [vmem:[%s1194_s5] sm:$0xff] }
 0xbc3   : > { %v991_v35 = vpop.f32.mrf.mxu0 }
 0xbc4   : > { %1758 = vpow2.f32 %v1549_v38 }
 0xbc5   : > { %v1664_v36 = vpop.f32.mrf.mxu0 }
 0xbcf   : > { %v1757_v37 = vpop.eup %1756 }
 0xbd0   : > { %1004 = vrot.lane.b32.xlu1 %v1757_v37, %s1814_s26 }
 0xbd1   : > { %v1759_v39 = vpop.eup %1758 }
 0xbd2   : > { %v998_v40 = vadd.f32 1.0, %v1759_v39 }
 0xbd4   : > { %1760 = vrcp.f32 %v998_v40 }
 0xbe1   : > { %v1761_v41 = vpop.eup %1760 }
 0xbe2   : > { %v1002_v44 = vmul.f32 %v1761_v41, %v928_v22 }
 0xc42   : > { %v1005_v42 = vpop.permute.xlu1 %1004 }
 0xc43   : > { %v1007_v43 = vmul.f32 %v1761_v41, %v1005_v42 }
 0xc45   : > { %1009 = vrot.lane.b32.xlu0 %v1007_v43, %s1815_s29 }
 0xcb7   : > { %v1010_v45 = vpop.permute.xlu0 %1009 }
 0xcb8   : > { %v1012_v47 = vadd.f32 %v1010_v45, %v1002_v44 }
 0xcba   : > { %1762 = vtanh.f32 %v1012_v47 }
 0xcc7   : > { %v1763_v48 = vpop.eup %1762 }
 0xcc8   : > { %1015 = vrot.lane.b32.xlu1 %v1763_v48, %s1814_s26 }
 0xd3a   : > { %v1016_v49 = vpop.permute.xlu1 %1015 }
 0xd3b   : > { %v2073_v50 = vmul.f32 %v1761_v41, %v1016_v49 }
 0xd3d   : > { %v1031_v51 = vpack.c.bf16 %v2073_v50, %v2073_v50 }
 0xd3f   : > { %1033 = vrot.lane.b32.xlu0 %v1031_v51, %s1815_s29 }
 0xdb1   : > { %v1034_v52 = vpop.permute.xlu0 %1033 }
 0xdb2   : > { %1670 = vmatmul.mubr.msk.bf16.vlgmr.msra.gmra.mxu1 %vm344_vm0, %v1034_v52 }
 0xdb3   : > { %1682 = vmatpush3.bf16.msra.mxu1 %v1921_v23  ;;  %1685 = vmatprep.mubr.msk.bf16.mxu1 %vm1813_vm1, %v1812_v6 }
 0xdb4   : > { %1683 = vmatprep.subr.bf16.mxu1 %v1812_v6 }
 0xdb7   : > { %1684 = vmatpush3.bf16.msra.mxu1 %v1941_v28 }
 0xe72   : > { %v1072_v54 = vpop.f32.mrf.mxu1 }
 0xe73   : > { %v1078_v55 = vadd.f32 %v1072_v54, %v1030_v53 }
 0xe74   : > { %v1671_v23 = vpop.f32.mrf.mxu1 }
 0xe75   : > { %1764 = vtanh.f32 %v1078_v55  ;;  %v1553_v6 = vmul.f32 -1.442695, %v1078_v55 }
 0xe76   : > { %v1075_v56 = vpop.f32.mrf.mxu1 }
 0xe77   : > { %1766 = vpow2.f32 %v1553_v6 }
 0xe78   : > { %v1672_v57 = vpop.f32.mrf.mxu1 }
 0xe82   : > { %v1765_v58 = vpop.eup %1764 }
 0xe83   : > { %1088 = vrot.lane.b32.xlu1 %v1765_v58, %s1814_s26 }
 0xe84   : > { %v1767_v28 = vpop.eup %1766 }
 0xe85   : > { %v1082_v59 = vadd.f32 1.0, %v1767_v28 }
 0xe87   : > { %1768 = vrcp.f32 %v1082_v59 }
 0xe94   : > { %v1769_v60 = vpop.eup %1768 }
 0xe95   : > { %v1086_v63 = vmul.f32 %v1769_v60, %v1012_v47 }
 0xef5   : > { %v1089_v61 = vpop.permute.xlu1 %1088 }
 0xef6   : > { %v1091_v62 = vmul.f32 %v1769_v60, %v1089_v61 }
 0xef8   : > { %1093 = vrot.lane.b32.xlu0 %v1091_v62, %s1815_s29 }
 0xf6a   : > { %v1094_v0 = vpop.permute.xlu0 %1093 }
 0xf6b   : > { %v1096_v1 = vadd.f32 %v1094_v0, %v1086_v63 }
 0xf6d   : > { %1770 = vtanh.f32 %v1096_v1 }
 0xf7a   : > { %v1771_v2 = vpop.eup %1770 }
 0xf7b   : > { %1099 = vrot.lane.b32.xlu1 %v1771_v2, %s1814_s26 }
 0xfed   : > { %v1100_v4 = vpop.permute.xlu1 %1099 }
 0xfee   : > { %v2094_v5 = vmul.f32 %v1769_v60, %v1100_v4 }
 0xff0   : > { %v1114_v7 = vpack.c.bf16 %v2094_v5, %v2094_v5 }
 0xff2   : > { %1116 = vrot.lane.b32.xlu0 %v1114_v7, %s1815_s29 }
0x1064   : > { %v1117_v8 = vpop.permute.xlu0 %1116 }
0x1065   : > { %1678 = vmatmul.mubr.msk.bf16.vlgmr.msra.gmra.mxu0 %vm344_vm0, %v1117_v8 }
0x1125   : > { %v1155_v10 = vpop.f32.mrf.mxu0 }
0x1126   : > { %v1161_v11 = vadd.f32 %v1155_v10, %v1113_v9 }
0x1127   : > { %v1679_v12 = vpop.f32.mrf.mxu0 }
0x1128   : > { %1772 = vtanh.f32 %v1161_v11  ;;  %v1556_v16 = vmul.f32 -1.442695, %v1161_v11 }
0x1129   : > { %v1158_v13 = vpop.f32.mrf.mxu0 }
0x112a   : > { %1774 = vpow2.f32 %v1556_v16 }
0x112b   : > { %v1680_v14 = vpop.f32.mrf.mxu0 }
0x1135   : > { %v1773_v15 = vpop.eup %1772 }
0x1136   : > { %1171 = vrot.lane.b32.xlu1 %v1773_v15, %s1814_s26 }
0x1137   : > { %v1775_v17 = vpop.eup %1774 }
0x1138   : > { %v1165_v18 = vadd.f32 1.0, %v1775_v17 }
0x113a   : > { %1776 = vrcp.f32 %v1165_v18 }
0x1147   : > { %v1777_v19 = vpop.eup %1776 }
0x1148   : > { %v1169_v22 = vmul.f32 %v1777_v19, %v1096_v1 }
0x11a8   : > { %v1172_v20 = vpop.permute.xlu1 %1171 }
0x11a9   : > { %v1174_v21 = vmul.f32 %v1777_v19, %v1172_v20 }
0x11ab   : > { %1176 = vrot.lane.b32.xlu0 %v1174_v21, %s1815_s29 }
0x121d   : > { %v1177_v25 = vpop.permute.xlu0 %1176 }
0x121e   : > { %v1179_v26 = vadd.f32 %v1177_v25, %v1169_v22 }
0x1220   : > { %1778 = vtanh.f32 %v1179_v26 }
0x122d   : > { %v1779_v29 = vpop.eup %1778 }
0x122e   : > { %1182 = vrot.lane.b32.xlu1 %v1779_v29, %s1814_s26 }
0x12a0   : > { %v1183_v30 = vpop.permute.xlu1 %1182 }
0x12a1   : > { %v1185_v31 = vmul.f32 %v1777_v19, %v1183_v30 }
0x12a3   : > { %v1196_v32 = vpack.c.bf16 %v1185_v31, %v1185_v31 }
0x12a5   : > { %1198 = vrot.lane.b32.xlu0 %v1196_v32, %s1815_s29 }
0x1317   : > { %v1199_v33 = vpop.permute.xlu0 %1198 }
0x1318   : > { %1686 = vmatmul.mubr.msk.bf16.vlgmr.msra.gmra.mxu1 %vm344_vm0, %v1199_v33 }
0x13d8   : > { %v1237_v35 = vpop.f32.mrf.mxu1 }
0x13d9   : > { %v1243_v36 = vadd.f32 %v1237_v35, %v1195_v34 }
0x13da   : > { %v1687_v37 = vpop.f32.mrf.mxu1 }
0x13db   : > { %1780 = vtanh.f32 %v1243_v36  ;;  %v1558_v41 = vmul.f32 -1.442695, %v1243_v36 }
0x13dc   : > { %v1240_v38 = vpop.f32.mrf.mxu1 }
0x13dd   : > { %1782 = vpow2.f32 %v1558_v41 }
0x13de   : > { %v1688_v39 = vpop.f32.mrf.mxu1 }
0x13e8   : > { %v1781_v40 = vpop.eup %1780 }
0x13e9   : > { %1253 = vrot.lane.b32.xlu1 %v1781_v40, %s1814_s26 }
0x13ea   : > { %v1783_v42 = vpop.eup %1782 }
0x13eb   : > { %v1247_v43 = vadd.f32 1.0, %v1783_v42 }
0x13ed   : > { %1784 = vrcp.f32 %v1247_v43 }
0x13fa   : > { %v1785_v44 = vpop.eup %1784 }
0x13fb   : > { %v1251_v48 = vmul.f32 %v1785_v44, %v1179_v26 }
0x145b   : > { %v1254_v45 = vpop.permute.xlu1 %1253 }
0x145c   : > { %v1256_v47 = vmul.f32 %v1785_v44, %v1254_v45 }
0x145e   : > { %1258 = vrot.lane.b32.xlu0 %v1256_v47, %s1815_s29 }
0x1462   : > { %683 = vrot.lane.b32.xlu0 %v1983_v24, %s1815_s29 }
0x1466   : > { %852 = vrot.lane.b32.xlu0 %v2030_v3, %s1815_s29 }
0x146a   : > { %1020 = vrot.lane.b32.xlu0 %v2073_v50, %s1815_s29 }
0x146e   : > { %1187 = vrot.lane.b32.xlu0 %v1185_v31, %s1815_s29 }
0x14d0   : > { %v1259_v49 = vpop.permute.xlu0 %1258 }
0x14d1   : > { %v1261_v51 = vadd.f32 %v1259_v49, %v1251_v48 }
0x14d3   : > { %1786 = vtanh.f32 %v1261_v51  ;;  %1277 = vrot.lane.b32.xlu0 %v1261_v51, %s1816_s8  ;;  %s1273_s8 = scalar_lea.vmem %s2128_s14, %s2195_s13 }
0x14d4   : > { %v684_v24 = vpop.permute.xlu0 %683 }
0x14d5   : > { %688 = vst.msk [vmem:[%s687_s24] sm:$0xff] %vm344_vm0, %v684_v24 }
0x14d8   : > { %v853_v50 = vpop.permute.xlu0 %852 }
0x14dc   : > { %v1021_v52 = vpop.permute.xlu0 %1020 }
0x14e0   : > { %v1787_v3 = vpop.eup %1786  ;;  %v1188_v53 = vpop.permute.xlu0 %1187 }
0x14e1   : > { %1264 = vrot.lane.b32.xlu1 %v1787_v3, %s1814_s26  ;;  %s2192_s26 = sshll.u32 %s2065_s7, 3 }
0x14e5   : > { %768 = vrot.lane.b32.xlu1 %v2008_v46, %s1815_s29 }
0x14e9   : > { %936 = vrot.lane.b32.xlu1 %v2052_v27, %s1815_s29 }
0x14ed   : > { %1104 = vrot.lane.b32.xlu1 %v2094_v5, %s1815_s29 }
0x1545   : > { %v1278_v54 = vpop.permute.xlu0 %1277 }
0x1546   : > { %1280 = vst.msk [vmem:[%s1966_s21] sm:$0xff] %vm344_vm0, %v1278_v54  ;;  %s1023_s21 = scalar_lea.vmem %s2128_s14, %s2192_s26 }
0x1553   : > { %v1265_v46 = vpop.permute.xlu1 %1264 }
0x1554   : > { %v1267_v55 = vmul.f32 %v1785_v44, %v1265_v46 }
0x1556   : > { %1269 = vrot.lane.b32.xlu1 %v1267_v55, %s1815_s29  ;;  %s2194_s29 = sshll.u32 %s2102_s11, 3 }
0x1557   : > { %v769_v27 = vpop.permute.xlu1 %768  ;;  %s1190_s12 = scalar_lea.vmem %s2128_s14, %s2194_s29 }
0x1558   : > { %772 = vst.msk [vmem:[%s771_s15] sm:$0xff] %vm344_vm0, %v769_v27 }
0x1559   : > { %856 = vst.msk [vmem:[%s855_s28] sm:$0xff] %vm344_vm0, %v853_v50 }
0x155b   : > { %v937_v23 = vpop.permute.xlu1 %936 }
0x155c   : > { %940 = vst.msk [vmem:[%s939_s27] sm:$0xff] %vm344_vm0, %v937_v23 }
0x155d   : > { %1024 = vst.msk [vmem:[%s1023_s21] sm:$0xff] %vm344_vm0, %v1021_v52 }
0x155f   : > { %v1105_v56 = vpop.permute.xlu1 %1104 }
0x1560   : > { %1108 = vst.msk [vmem:[%s1107_s10] sm:$0xff] %vm344_vm0, %v1105_v56 }
0x1561   : > { %1191 = vst.msk [vmem:[%s1190_s12] sm:$0xff] %vm344_vm0, %v1188_v53 }
0x15c8   : > { %v1270_v57 = vpop.permute.xlu1 %1269 }
0x15c9   : > { %1274 = vst.msk [vmem:[%s1273_s8] sm:$0xff] %vm344_vm0, %v1270_v57  ;;  %1275 = vst.msk [vmem:[%s1884_s30] sm:$0xff] %vm344_vm0, %v1270_v57 }
0x15ca PF: > { %s14_s17 = sadd.s32 1, %s1810_s17   ;;  %s2196_s15 = smov %s1806_s16 }
0x15cb   : > { %p11_p5 = scmp.ge.s32.totalorder %s14_s17, 4   ;;  %s2197_s16 = smov %s2199_s18 }
0x15cd   :  { %13 = sbr.rel (!%p11_p5) target bundleno = 2 (0x2), region = 101 }

// kernel: lstm_encoder_forward.3
= control target key start
LH: loop header
LB: loop body
LE: loop exit
PB: predicated region body
PF: predicated region fallthrough
CT: control target
= control target key end

     0   :  { %s1689_s15 = smov 0   ;;  %s1691_s16 = smov 0   ;;  %s2001_s0 = inlined_call_operand.vmem [shape: f32[1,8,8,32], index: 0, kind: input, shape index: {}]   ;;  %s2002_s1 = inlined_call_operand.vmem [shape: bf16[2,1,32,128], index: 1, kind: input, shape index: {}]   ;;  %s2003_s2 = inlined_call_operand.vmem [shape: bf16[2,32,128], index: 2, kind: input, shape index: {}]   ;;  %s2004_s3 = inlined_call_operand.vmem [shape: f32[2,1,128], index: 3, kind: input, shape index: {}]   ;;  %s2005_s4 = inlined_call_operand.vmem [shape: f32[2,8,8,32], index: 4, kind: output, shape index: {}]  }
   0x1   :  { %s1693_s17 = smov 0  }
   0x2 LB: > { %s26_s18 = sadd.s32 1, %s1653_s16  ;;  %p1381_p0 = scmp.ge.s32.totalorder %s1657_s17, 1  ;;  %s1657_s17 = sphi %s1693_s17, %s14_s17   ;;  %s1653_s16 = sphi %s1691_s16, %s2015_s16   ;;  %s1649_s15 = sphi %s1689_s15, %s2014_s15  }
   0x3   : > { %p28_p1 = scmp.ge.s32.totalorder %s26_s18, 2  ;;  %p235_p2 = scmp.lt.s32.totalorder %s1657_s17, 3 }
   0x5   : > { %s2017_s18 = smov (%p28_p1, %s26_s18), 0  ;;  %p236_p3 = pnand %p1381_p0, %p235_p2 }
   0x6   : > { %p304_p4 = scmp.lt.s32.totalorder (!%p236_p3), %s1649_s15, 1  ;;  %s1388_s23 = sshll.u32 (!%p236_p3), %s1649_s15, 3 }
   0x7   : > { %239 = sbr.rel (%p236_p3) target bundleno = 5576 (0x15c8), region = 36  ;;  %s1727_s26 = scalar_lea.vmem (!%p236_p3), [#allocation3], %s1388_s23 }
   0x8   : > { %s1661_s5 = smov (!%p236_p3), 64   ;;  %s575_s7 = smul.u32 (!%p236_p3), 6, %s1649_s15 }
   0x9   : > { %s1815_s8 = ssub.s32 (!%p236_p3), 1, %s1649_s15  ;;  %s659_s12 = smul.u32 (!%p236_p3), 5, %s1649_s15 }
   0xa   : > { %s1818_s9 = sadd.s32 (!%p236_p3), %s575_s7, %s1815_s8  ;;  %s1405_s13 = sshll.u32 (!%p236_p3), %s1815_s8, 1 }
   0xb   : > { %s1402_s10 = sshll.u32 (!%p236_p3), %s1818_s9, 3  ;;  %s1840_s14 = sadd.s32 (!%p236_p3), %s1405_s13, %s659_s12 }
   0xc   : > { %vm344_vm0 = vcmask 261120   ;;  %v348_v0 = vld [vmem:[%s2001_s0] sm:$0xff]  ;;  %v349_v1 = vld [vmem:[%s2001_s0 + $0x8] sm:$0xff]  ;;  %v1659_v3 = vmov 0.0   ;;  %s1719_s24 = scalar_select %p304_p4, %s1649_s15, 1  ;;  %vm1660_vm1 = vmmov 0  }
   0xd   : > { %v356_v2 = vpack.c.bf16 %v349_v1, %v348_v0  ;;  %1474 = vmatprep.subr.bf16.mxu1 %v1659_v3  ;;  %1478 = vmatprep.mubr.msk.bf16.mxu1 %vm1660_vm1, %v1659_v3  ;;  %345 = vst.msk [vmem:[%s1727_s26] sm:$0xff] %vm344_vm0, %v1659_v3  ;;  %v350_v5 = vld [vmem:[%s2001_s0 + $0x10] sm:$0xff]  ;;  %v351_v7 = vld [vmem:[%s2001_s0 + $0x18] sm:$0xff]  ;;  %v352_v10 = vld [vmem:[%s2001_s0 + $0x20] sm:$0xff]  ;;  %s578_s11 = scalar_lea.vmem [#allocation2], %s1402_s10  ;;  %s1406_s19 = sshll.u32 %s1840_s14, 3 }
   0xe   : > { %s1429_s25 = sshll.u32 %s1719_s24, 4  ;;  %v353_v11 = vld [vmem:[%s2001_s0 + $0x28] sm:$0xff]  ;;  %v357_v13 = vpack.c.bf16 %v351_v7, %v350_v5  ;;  %v354_v16 = vld [vmem:[%s2001_s0 + $0x30] sm:$0xff]  ;;  %v355_v17 = vld [vmem:[%s2001_s0 + $0x38] sm:$0xff]  ;;  %s662_s20 = scalar_lea.vmem [#allocation2], %s1406_s19 }
   0xf   : > { %1466 = vmatprep.mubr.msk.bf16.mxu0 %vm344_vm0, %v356_v2  ;;  %s308_s29 = scalar_lea.vmem %s2002_s1, %s1429_s25  ;;  %s313_s6 = scalar_lea.vmem %s2003_s2, %s1429_s25  ;;  %v358_v14 = vpack.c.bf16 %v353_v11, %v352_v10  ;;  %v359_v18 = vpack.c.bf16 %v355_v17, %v354_v16 }
  0x10   : > { %v1567_v4 = vld [vmem:[%s308_s29 + $0x8] sm:$0xff]   ;;  %v1570_v8 = vld [vmem:[%s308_s29] sm:$0xff]   ;;  %s1784_s25 = scalar_lea.vmem [#allocation4], %s1388_s23  ;;  %s316_s29 = scalar_lea.vmem %s2004_s3, %s1719_s24 }
  0x11   : > { %1462 = vmatprep.subr.bf16.mxu0 %v1567_v4  ;;  %v1741_v6 = vld [vmem:[%s313_s6 + $0x8] sm:$0xff]   ;;  %v1746_v9 = vld [vmem:[%s313_s6] sm:$0xff]   ;;  %347 = vst.msk [vmem:[%s1784_s25] sm:$0xff] %vm344_vm0, %v1659_v3  ;;  %s479_s23 = smul.u32 56, %s1649_s15  ;;  %s1662_s6 = smov 32  }
  0x12   : > { %1463 = vmatpush3.bf16.msra.mxu0 %v1567_v4  ;;  %1475 = vmatpush3.bf16.msra.mxu1 %v1741_v6  ;;  %v1389_v19 = vld [vmem:[%s316_s29] ss:$0 sm:$0xff]  ;;  %s742_s21 = smul.u32 3, %s1815_s8  ;;  %s1409_s22 = sshll.u32 %s1649_s15, 2 }
  0x13   : > { %1464 = vmatprep.subr.bf16.mxu0 %v1570_v8  ;;  %1476 = vmatprep.subr.bf16.mxu1 %v1659_v3  ;;  %s480_s30 = scalar_lea.vmem [#allocation2], %s479_s23  ;;  %s1413_s7 = sshll.u32 %s1815_s8, 2 }
  0x14   : > { %v475_v12 = vld [vmem:[%s1727_s26] sm:$0xff]  ;;  %s1862_s27 = sadd.s32 %s1409_s22, %s742_s21  ;;  %s1417_s21 = sshll.u32 %s1649_s15, 1 }
  0x15   : > { %v482_v15 = vpack.c.bf16 %v475_v12, %v475_v12  ;;  %s1410_s28 = sshll.u32 %s1862_s27, 3 }
  0x16   : > { %1465 = vmatpush3.bf16.msra.mxu0 %v1570_v8  ;;  %1477 = vmatpush3.bf16.msra.mxu1 %v1746_v9  ;;  %s746_s29 = scalar_lea.vmem [#allocation2], %s1410_s28 }
  0x17   : > { %1490 = vmatprep.subr.bf16.mxu0 %v1659_v3  ;;  %1482 = vmatprep.subr.bf16.mxu1 %v1659_v3 }
  0x18   : > { %v477_v43 = vld [vmem:[%s1784_s25] sm:$0xff] }
  0x19   : > { %1467 = vmatmul.mubr.msk.bf16.vlgmr.msra.gmra.mxu0 %vm344_vm0, %v357_v13  ;;  %1479 = vmatmul.mubr.msk.bf16.vlgmr.msra.gmra.mxu1 %vm344_vm0, %v482_v15 }
  0x1a   : > { %1470 = vmatprep.mubr.msk.bf16.mxu0 %vm344_vm0, %v358_v14  ;;  %1483 = vmatpush3.bf16.msra.mxu1 %v1741_v6 }
  0x1b   : > { %1486 = vmatprep.mubr.msk.bf16.mxu1 %vm1660_vm1, %v1659_v3  ;;  %1484 = vmatprep.subr.bf16.mxu1 %v1659_v3 }
  0x1c   : > { %1491 = vmatpush3.bf16.msra.mxu0 %v1741_v6 }
  0x1d   : > { %1492 = vmatprep.subr.bf16.mxu0 %v1659_v3 }
  0x1e   : > { %1485 = vmatpush3.bf16.msra.mxu1 %v1746_v9 }
  0x1f   : > { %1498 = vmatprep.subr.bf16.mxu1 %v1659_v3 }
  0x20   : > { %1493 = vmatpush3.bf16.msra.mxu0 %v1746_v9 }
  0x21   : > { %1471 = vmatmul.mubr.msk.bf16.gmra.mxu0 %vm344_vm0, %v359_v18  ;;  %1506 = vmatprep.subr.bf16.mxu0 %v1659_v3 }
  0x22   : > { %1494 = vmatprep.mubr.msk.bf16.mxu0 %vm1660_vm1, %v1659_v3 }
  0xd9   : > { %v1468_v20 = vpop.f32.mrf.mxu0  ;;  %v532_v22 = vpop.f32.mrf.mxu1 }
  0xda   : > { %v439_v21 = vadd.f32 %v1468_v20, %v1389_v19 }
  0xdb   : > { %v430_v23 = vpop.f32.mrf.mxu0  ;;  %v1480_v25 = vpop.f32.mrf.mxu1 }
  0xdc   : > { %463 = vst [vmem:[#allocation2 + $0x10] sm:$0xff] %v439_v21  ;;  %v431_v24 = vadd.f32 %v1389_v19, %v430_v23 }
  0xdd   : > { %v1469_v26 = vpop.f32.mrf.mxu0  ;;  %v535_v28 = vpop.f32.mrf.mxu1 }
  0xde   : > { %461 = vst [vmem:[#allocation2] sm:$0xff] %v431_v24  ;;  %v442_v27 = vadd.f32 %v1469_v26, %v1389_v19 }
  0xdf   : > { %v433_v29 = vpop.f32.mrf.mxu0  ;;  %v1481_v31 = vpop.f32.mrf.mxu1 }
  0xe0   : > { %464 = vst [vmem:[#allocation2 + $0x18] sm:$0xff] %v442_v27  ;;  %v434_v30 = vadd.f32 %v1389_v19, %v433_v29 }
  0xe1   : > { %v1472_v32 = vpop.f32.mrf.mxu0 }
  0xe2   : > { %462 = vst [vmem:[#allocation2 + $0x8] sm:$0xff] %v434_v30  ;;  %v455_v33 = vadd.f32 %v1472_v32, %v1389_v19 }
  0xe3   : > { %v446_v34 = vpop.f32.mrf.mxu0 }
  0xe4   : > { %467 = vst [vmem:[#allocation2 + $0x30] sm:$0xff] %v455_v33  ;;  %v447_v35 = vadd.f32 %v1389_v19, %v446_v34 }
  0xe5   : > { %v1473_v36 = vpop.f32.mrf.mxu0 }
  0xe6   : > { %465 = vst [vmem:[#allocation2 + $0x20] sm:$0xff] %v447_v35  ;;  %v458_v37 = vadd.f32 %v1473_v36, %v1389_v19 }
  0xe7   : > { %v449_v38 = vpop.f32.mrf.mxu0 }
  0xe8   : > { %468 = vst [vmem:[#allocation2 + $0x38] sm:$0xff] %v458_v37  ;;  %v450_v39 = vadd.f32 %v1389_v19, %v449_v38 }
  0xea   : > { %466 = vst [vmem:[#allocation2 + $0x28] sm:$0xff] %v450_v39 }
  0xf1   : > { %v481_v40 = vld [vmem:[%s480_s30] sm:$0xff]  ;;  %s827_s30 = smul.u32 3, %s1649_s15 }
  0xf2   : > { %v538_v41 = vadd.f32 %v532_v22, %v481_v40  ;;  %v579_v59 = vld [vmem:[%s578_s11] sm:$0xff] }
  0xf3   : > { %v663_v19 = vld [vmem:[%s662_s20] sm:$0xff]  ;;  %s1883_s11 = sadd.s32 %s1413_s7, %s827_s30  ;;  %s910_s20 = smul.u32 5, %s1815_s8 }
  0xf4   : > { %1571 = vtanh.f32 %v538_v41  ;;  %v1400_v44 = vmul.f32 -1.442695, %v538_v41  ;;  %v747_v40 = vld [vmem:[%s746_s29] sm:$0xff]  ;;  %s2009_s12 = sshll.u32 %s1883_s11, 3  ;;  %s994_s7 = smul.u32 6, %s1815_s8 }
  0xf5   : > { %s830_s13 = scalar_lea.vmem [#allocation2], %s2009_s12  ;;  %s1904_s22 = sadd.s32 %s1417_s21, %s910_s20 }
  0xf6   : > { %1573 = vpow2.f32 %v1400_v44  ;;  %s2008_s29 = sshll.u32 %s1904_s22, 3  ;;  %s1663_s12 = smov 96  }
  0xf7   : > { %s914_s30 = scalar_lea.vmem [#allocation2], %s2008_s29  ;;  %s2011_s9 = sshll.u32 %s1904_s22, 3 }
 0x101   : > { %v1572_v42 = vpop.eup %1571 }
 0x102   : > { %552 = vrot.lane.b32.xlu0 %v1572_v42, %s1661_s5 }
 0x103   : > { %v1574_v45 = vpop.eup %1573 }
 0x104   : > { %v542_v46 = vadd.f32 1.0, %v1574_v45 }
 0x106   : > { %547 = vrot.lane.b32.xlu0 %v477_v43, %s1662_s6  ;;  %1575 = vrcp.f32 %v542_v46 }
 0x113   : > { %v1576_v47 = vpop.eup %1575 }
 0x174   : > { %v553_v48 = vpop.permute.xlu0 %552 }
 0x175   : > { %v555_v49 = vmul.f32 %v1576_v47, %v553_v48 }
 0x177   : > { %557 = vrot.lane.b32.xlu1 %v555_v49, %s1662_s6 }
 0x178   : > { %v548_v50 = vpop.permute.xlu0 %547 }
 0x179   : > { %v550_v51 = vmul.f32 %v1576_v47, %v548_v50 }
 0x1e9   : > { %v558_v52 = vpop.permute.xlu1 %557 }
 0x1ea   : > { %v560_v53 = vadd.f32 %v558_v52, %v550_v51 }
 0x1ec   : > { %1577 = vtanh.f32 %v560_v53 }
 0x1f9   : > { %v1578_v54 = vpop.eup %1577 }
 0x1fa   : > { %563 = vrot.lane.b32.xlu1 %v1578_v54, %s1661_s5 }
 0x26c   : > { %v564_v55 = vpop.permute.xlu1 %563 }
 0x26d   : > { %v1801_v56 = vmul.f32 %v1576_v47, %v564_v55 }
 0x26f   : > { %v580_v57 = vpack.c.bf16 %v1801_v56, %v1801_v56 }
 0x271   : > { %582 = vrot.lane.b32.xlu0 %v580_v57, %s1662_s6 }
 0x2e3   : > { %v583_v58 = vpop.permute.xlu0 %582 }
 0x2e4   : > { %1487 = vmatmul.mubr.msk.bf16.vlgmr.msra.gmra.mxu1 %vm344_vm0, %v583_v58 }
 0x2e5   : > { %1499 = vmatpush3.bf16.msra.mxu1 %v1741_v6  ;;  %1502 = vmatprep.mubr.msk.bf16.mxu1 %vm1660_vm1, %v1659_v3 }
 0x2e6   : > { %1500 = vmatprep.subr.bf16.mxu1 %v1659_v3 }
 0x2e9   : > { %1501 = vmatpush3.bf16.msra.mxu1 %v1746_v9 }
 0x2ea   : > { %1514 = vmatprep.subr.bf16.mxu1 %v1659_v3 }
 0x3a4   : > { %v621_v60 = vpop.f32.mrf.mxu1 }
 0x3a5   : > { %v627_v61 = vadd.f32 %v621_v60, %v579_v59 }
 0x3a6   : > { %v1488_v62 = vpop.f32.mrf.mxu1 }
 0x3a7   : > { %1579 = vtanh.f32 %v627_v61  ;;  %v1404_v2 = vmul.f32 -1.442695, %v627_v61  ;;  %v831_v62 = vld [vmem:[%s830_s13] sm:$0xff]  ;;  %s1920_s13 = sadd.s32 %s1649_s15, %s994_s7 }
 0x3a8   : > { %v624_v63 = vpop.f32.mrf.mxu1  ;;  %s2007_s20 = sshll.u32 %s1920_s13, 3 }
 0x3a9   : > { %1581 = vpow2.f32 %v1404_v2  ;;  %s997_s21 = scalar_lea.vmem [#allocation2], %s2007_s20 }
 0x3aa   : > { %v1489_v0 = vpop.f32.mrf.mxu1 }
 0x3b4   : > { %v1580_v1 = vpop.eup %1579 }
 0x3b5   : > { %637 = vrot.lane.b32.xlu1 %v1580_v1, %s1661_s5 }
 0x3b6   : > { %v1582_v4 = vpop.eup %1581 }
 0x3b7   : > { %v631_v5 = vadd.f32 1.0, %v1582_v4 }
 0x3b9   : > { %1583 = vrcp.f32 %v631_v5 }
 0x3c6   : > { %v1584_v7 = vpop.eup %1583 }
 0x3c7   : > { %v635_v11 = vmul.f32 %v1584_v7, %v560_v53 }
 0x427   : > { %v638_v8 = vpop.permute.xlu1 %637 }
 0x428   : > { %v640_v10 = vmul.f32 %v1584_v7, %v638_v8 }
 0x42a   : > { %642 = vrot.lane.b32.xlu0 %v640_v10, %s1662_s6 }
 0x49c   : > { %v643_v12 = vpop.permute.xlu0 %642 }
 0x49d   : > { %v645_v13 = vadd.f32 %v643_v12, %v635_v11 }
 0x49f   : > { %1585 = vtanh.f32 %v645_v13 }
 0x4ac   : > { %v1586_v14 = vpop.eup %1585 }
 0x4ad   : > { %648 = vrot.lane.b32.xlu1 %v1586_v14, %s1661_s5 }
 0x51f   : > { %v649_v15 = vpop.permute.xlu1 %648 }
 0x520   : > { %v1826_v16 = vmul.f32 %v1584_v7, %v649_v15 }
 0x522   : > { %v664_v17 = vpack.c.bf16 %v1826_v16, %v1826_v16 }
 0x524   : > { %666 = vrot.lane.b32.xlu0 %v664_v17, %s1662_s6 }
 0x596   : > { %v667_v18 = vpop.permute.xlu0 %666 }
 0x597   : > { %1495 = vmatmul.mubr.msk.bf16.vlgmr.msra.gmra.mxu0 %vm344_vm0, %v667_v18 }
 0x598   : > { %1507 = vmatpush3.bf16.msra.mxu0 %v1741_v6  ;;  %1510 = vmatprep.mubr.msk.bf16.mxu0 %vm1660_vm1, %v1659_v3 }
 0x599   : > { %1508 = vmatprep.subr.bf16.mxu0 %v1659_v3 }
 0x59c   : > { %1509 = vmatpush3.bf16.msra.mxu0 %v1746_v9 }
 0x59d   : > { %1522 = vmatprep.subr.bf16.mxu0 %v1659_v3 }
 0x657   : > { %v705_v20 = vpop.f32.mrf.mxu0 }
 0x658   : > { %v711_v21 = vadd.f32 %v705_v20, %v663_v19 }
 0x659   : > { %v1496_v22 = vpop.f32.mrf.mxu0 }
 0x65a   : > { %1587 = vtanh.f32 %v711_v21  ;;  %v1408_v26 = vmul.f32 -1.442695, %v711_v21 }
 0x65b   : > { %v708_v23 = vpop.f32.mrf.mxu0 }
 0x65c   : > { %1589 = vpow2.f32 %v1408_v26  ;;  %v915_v23 = vld [vmem:[%s914_s30] sm:$0xff]  ;;  %s2006_s30 = smul.u32 56, %s1815_s8 }
 0x65d   : > { %v1497_v24 = vpop.f32.mrf.mxu0 }
 0x65e   : > { %s1079_s7 = scalar_lea.vmem [#allocation2], %s2006_s30 }
 0x667   : > { %v1588_v25 = vpop.eup %1587 }
 0x668   : > { %721 = vrot.lane.b32.xlu1 %v1588_v25, %s1661_s5 }
 0x669   : > { %v1590_v27 = vpop.eup %1589 }
 0x66a   : > { %v715_v28 = vadd.f32 1.0, %v1590_v27 }
 0x66c   : > { %1591 = vrcp.f32 %v715_v28 }
 0x679   : > { %v1592_v29 = vpop.eup %1591 }
 0x67a   : > { %v719_v32 = vmul.f32 %v1592_v29, %v645_v13 }
 0x6da   : > { %v722_v30 = vpop.permute.xlu1 %721 }
 0x6db   : > { %v724_v31 = vmul.f32 %v1592_v29, %v722_v30 }
 0x6dd   : > { %726 = vrot.lane.b32.xlu0 %v724_v31, %s1662_s6 }
 0x74f   : > { %v727_v33 = vpop.permute.xlu0 %726 }
 0x750   : > { %v729_v34 = vadd.f32 %v727_v33, %v719_v32 }
 0x752   : > { %1593 = vtanh.f32 %v729_v34 }
 0x75f   : > { %v1594_v35 = vpop.eup %1593 }
 0x760   : > { %732 = vrot.lane.b32.xlu1 %v1594_v35, %s1661_s5 }
 0x7d2   : > { %v733_v36 = vpop.permute.xlu1 %732 }
 0x7d3   : > { %v1848_v37 = vmul.f32 %v1592_v29, %v733_v36 }
 0x7d5   : > { %v748_v38 = vpack.c.bf16 %v1848_v37, %v1848_v37 }
 0x7d7   : > { %750 = vrot.lane.b32.xlu0 %v748_v38, %s1662_s6 }
 0x849   : > { %v751_v39 = vpop.permute.xlu0 %750 }
 0x84a   : > { %1503 = vmatmul.mubr.msk.bf16.vlgmr.msra.gmra.mxu1 %vm344_vm0, %v751_v39 }
 0x84b   : > { %1515 = vmatpush3.bf16.msra.mxu1 %v1741_v6  ;;  %1518 = vmatprep.mubr.msk.bf16.mxu1 %vm1660_vm1, %v1659_v3 }
 0x84c   : > { %1516 = vmatprep.subr.bf16.mxu1 %v1659_v3 }
 0x84f   : > { %1517 = vmatpush3.bf16.msra.mxu1 %v1746_v9 }
 0x850   : > { %1530 = vmatprep.subr.bf16.mxu1 %v1659_v3 }
 0x90a   : > { %v789_v41 = vpop.f32.mrf.mxu1 }
 0x90b   : > { %v795_v42 = vadd.f32 %v789_v41, %v747_v40 }
 0x90c   : > { %v1504_v43 = vpop.f32.mrf.mxu1 }
 0x90d   : > { %1595 = vtanh.f32 %v795_v42  ;;  %v1412_v47 = vmul.f32 -1.442695, %v795_v42  ;;  %v998_v42 = vld [vmem:[%s997_s21] sm:$0xff]  ;;  %s1431_s21 = sshll.u32 %s1719_s24, 6 }
 0x90e   : > { %v792_v44 = vpop.f32.mrf.mxu1  ;;  %s1946_s20 = scalar_lea.vmem %s2005_s4, %s1431_s21 }
 0x90f   : > { %1597 = vpow2.f32 %v1412_v47  ;;  %s572_s29 = scalar_lea.vmem %s1946_s20, %s479_s23  ;;  %s656_s15 = scalar_lea.vmem %s1946_s20, %s1402_s10 }
 0x910   : > { %v1505_v45 = vpop.f32.mrf.mxu1  ;;  %s740_s24 = scalar_lea.vmem %s1946_s20, %s1406_s19  ;;  %s824_s23 = scalar_lea.vmem %s1946_s20, %s1410_s28 }
 0x911   : > { %s992_s10 = scalar_lea.vmem %s1946_s20, %s2011_s9  ;;  %s2013_s19 = smul.u32 56, %s1815_s8 }
 0x91a   : > { %v1596_v46 = vpop.eup %1595 }
 0x91b   : > { %805 = vrot.lane.b32.xlu1 %v1596_v46, %s1661_s5 }
 0x91c   : > { %v1598_v48 = vpop.eup %1597 }
 0x91d   : > { %v799_v49 = vadd.f32 1.0, %v1598_v48 }
 0x91f   : > { %1599 = vrcp.f32 %v799_v49 }
 0x92c   : > { %v1600_v50 = vpop.eup %1599 }
 0x92d   : > { %v803_v53 = vmul.f32 %v1600_v50, %v729_v34 }
 0x98d   : > { %v806_v51 = vpop.permute.xlu1 %805 }
 0x98e   : > { %v808_v52 = vmul.f32 %v1600_v50, %v806_v51 }
 0x990   : > { %810 = vrot.lane.b32.xlu0 %v808_v52, %s1662_s6 }
 0xa02   : > { %v811_v54 = vpop.permute.xlu0 %810 }
 0xa03   : > { %v813_v55 = vadd.f32 %v811_v54, %v803_v53 }
 0xa05   : > { %1601 = vtanh.f32 %v813_v55 }
 0xa12   : > { %v1602_v57 = vpop.eup %1601 }
 0xa13   : > { %816 = vrot.lane.b32.xlu1 %v1602_v57, %s1661_s5 }
 0xa85   : > { %v817_v58 = vpop.permute.xlu1 %816 }
 0xa86   : > { %v1870_v59 = vmul.f32 %v1600_v50, %v817_v58 }
 0xa88   : > { %v832_v60 = vpack.c.bf16 %v1870_v59, %v1870_v59 }
 0xa8a   : > { %834 = vrot.lane.b32.xlu0 %v832_v60, %s1662_s6 }
 0xafc   : > { %v835_v61 = vpop.permute.xlu0 %834 }
 0xafd   : > { %1511 = vmatmul.mubr.msk.bf16.vlgmr.msra.gmra.mxu0 %vm344_vm0, %v835_v61 }
 0xafe   : > { %1523 = vmatpush3.bf16.msra.mxu0 %v1741_v6  ;;  %1526 = vmatprep.mubr.msk.bf16.mxu0 %vm1660_vm1, %v1659_v3 }
 0xaff   : > { %1524 = vmatprep.subr.bf16.mxu0 %v1659_v3 }
 0xb02   : > { %1525 = vmatpush3.bf16.msra.mxu0 %v1746_v9 }
 0xbbd   : > { %v873_v63 = vpop.f32.mrf.mxu0 }
 0xbbe   : > { %v879_v0 = vadd.f32 %v873_v63, %v831_v62 }
 0xbbf   : > { %v1512_v1 = vpop.f32.mrf.mxu0 }
 0xbc0   : > { %1603 = vtanh.f32 %v879_v0  ;;  %v1416_v7 = vmul.f32 -1.442695, %v879_v0  ;;  %v1080_v1 = vld [vmem:[%s1079_s7] sm:$0xff] }
 0xbc1   : > { %v876_v2 = vpop.f32.mrf.mxu0 }
 0xbc2   : > { %1605 = vpow2.f32 %v1416_v7 }
 0xbc3   : > { %v1513_v4 = vpop.f32.mrf.mxu0 }
 0xbcd   : > { %v1604_v5 = vpop.eup %1603 }
 0xbce   : > { %889 = vrot.lane.b32.xlu1 %v1604_v5, %s1661_s5 }
 0xbcf   : > { %v1606_v8 = vpop.eup %1605 }
 0xbd0   : > { %v883_v10 = vadd.f32 1.0, %v1606_v8 }
 0xbd2   : > { %1607 = vrcp.f32 %v883_v10 }
 0xbdf   : > { %v1608_v11 = vpop.eup %1607 }
 0xbe0   : > { %v887_v14 = vmul.f32 %v1608_v11, %v813_v55 }
 0xc40   : > { %v890_v12 = vpop.permute.xlu1 %889 }
 0xc41   : > { %v892_v13 = vmul.f32 %v1608_v11, %v890_v12 }
 0xc43   : > { %894 = vrot.lane.b32.xlu0 %v892_v13, %s1662_s6 }
 0xcb5   : > { %v895_v15 = vpop.permute.xlu0 %894 }
 0xcb6   : > { %v897_v17 = vadd.f32 %v895_v15, %v887_v14 }
 0xcb8   : > { %1609 = vtanh.f32 %v897_v17 }
 0xcc5   : > { %v1610_v18 = vpop.eup %1609 }
 0xcc6   : > { %900 = vrot.lane.b32.xlu1 %v1610_v18, %s1661_s5 }
 0xd38   : > { %v901_v19 = vpop.permute.xlu1 %900 }
 0xd39   : > { %v1891_v20 = vmul.f32 %v1608_v11, %v901_v19 }
 0xd3b   : > { %v916_v21 = vpack.c.bf16 %v1891_v20, %v1891_v20 }
 0xd3d   : > { %918 = vrot.lane.b32.xlu0 %v916_v21, %s1662_s6 }
 0xdaf   : > { %v919_v22 = vpop.permute.xlu0 %918 }
 0xdb0   : > { %1519 = vmatmul.mubr.msk.bf16.vlgmr.msra.gmra.mxu1 %vm344_vm0, %v919_v22 }
 0xdb1   : > { %1531 = vmatpush3.bf16.msra.mxu1 %v1741_v6  ;;  %1534 = vmatprep.mubr.msk.bf16.mxu1 %vm1660_vm1, %v1659_v3 }
 0xdb2   : > { %1532 = vmatprep.subr.bf16.mxu1 %v1659_v3 }
 0xdb5   : > { %1533 = vmatpush3.bf16.msra.mxu1 %v1746_v9 }
 0xe70   : > { %v957_v24 = vpop.f32.mrf.mxu1 }
 0xe71   : > { %v963_v25 = vadd.f32 %v957_v24, %v915_v23 }
 0xe72   : > { %v1520_v6 = vpop.f32.mrf.mxu1 }
 0xe73   : > { %1611 = vtanh.f32 %v963_v25  ;;  %v1420_v3 = vmul.f32 -1.442695, %v963_v25 }
 0xe74   : > { %v960_v26 = vpop.f32.mrf.mxu1 }
 0xe75   : > { %1613 = vpow2.f32 %v1420_v3 }
 0xe76   : > { %v1521_v27 = vpop.f32.mrf.mxu1 }
 0xe80   : > { %v1612_v28 = vpop.eup %1611 }
 0xe81   : > { %973 = vrot.lane.b32.xlu1 %v1612_v28, %s1661_s5 }
 0xe82   : > { %v1614_v9 = vpop.eup %1613 }
 0xe83   : > { %v967_v29 = vadd.f32 1.0, %v1614_v9 }
 0xe85   : > { %1615 = vrcp.f32 %v967_v29 }
 0xe92   : > { %v1616_v30 = vpop.eup %1615 }
 0xe93   : > { %v971_v33 = vmul.f32 %v1616_v30, %v897_v17 }
 0xef3   : > { %v974_v31 = vpop.permute.xlu1 %973 }
 0xef4   : > { %v976_v32 = vmul.f32 %v1616_v30, %v974_v31 }
 0xef6   : > { %978 = vrot.lane.b32.xlu0 %v976_v32, %s1662_s6 }
 0xf68   : > { %v979_v34 = vpop.permute.xlu0 %978 }
 0xf69   : > { %v981_v35 = vadd.f32 %v979_v34, %v971_v33 }
 0xf6b   : > { %1617 = vtanh.f32 %v981_v35 }
 0xf78   : > { %v1618_v36 = vpop.eup %1617 }
 0xf79   : > { %984 = vrot.lane.b32.xlu1 %v1618_v36, %s1661_s5 }
 0xfeb   : > { %v985_v38 = vpop.permute.xlu1 %984 }
 0xfec   : > { %v1912_v39 = vmul.f32 %v1616_v30, %v985_v38 }
 0xfee   : > { %v999_v40 = vpack.c.bf16 %v1912_v39, %v1912_v39 }
 0xff0   : > { %1001 = vrot.lane.b32.xlu0 %v999_v40, %s1662_s6 }
0x1062   : > { %v1002_v41 = vpop.permute.xlu0 %1001 }
0x1063   : > { %1527 = vmatmul.mubr.msk.bf16.vlgmr.msra.gmra.mxu0 %vm344_vm0, %v1002_v41 }
0x1123   : > { %v1040_v43 = vpop.f32.mrf.mxu0 }
0x1124   : > { %v1046_v44 = vadd.f32 %v1040_v43, %v998_v42 }
0x1125   : > { %v1528_v45 = vpop.f32.mrf.mxu0 }
0x1126   : > { %1619 = vtanh.f32 %v1046_v44  ;;  %v1423_v49 = vmul.f32 -1.442695, %v1046_v44 }
0x1127   : > { %v1043_v46 = vpop.f32.mrf.mxu0 }
0x1128   : > { %1621 = vpow2.f32 %v1423_v49 }
0x1129   : > { %v1529_v47 = vpop.f32.mrf.mxu0 }
0x1133   : > { %v1620_v48 = vpop.eup %1619 }
0x1134   : > { %1056 = vrot.lane.b32.xlu1 %v1620_v48, %s1661_s5 }
0x1135   : > { %v1622_v50 = vpop.eup %1621 }
0x1136   : > { %v1050_v51 = vadd.f32 1.0, %v1622_v50 }
0x1138   : > { %1623 = vrcp.f32 %v1050_v51 }
0x1145   : > { %v1624_v52 = vpop.eup %1623 }
0x1146   : > { %v1054_v55 = vmul.f32 %v1624_v52, %v981_v35 }
0x11a6   : > { %v1057_v53 = vpop.permute.xlu1 %1056 }
0x11a7   : > { %v1059_v54 = vmul.f32 %v1624_v52, %v1057_v53 }
0x11a9   : > { %1061 = vrot.lane.b32.xlu0 %v1059_v54, %s1662_s6 }
0x121b   : > { %v1062_v57 = vpop.permute.xlu0 %1061 }
0x121c   : > { %v1064_v58 = vadd.f32 %v1062_v57, %v1054_v55 }
0x121e   : > { %1625 = vtanh.f32 %v1064_v58 }
0x122b   : > { %v1626_v60 = vpop.eup %1625 }
0x122c   : > { %1067 = vrot.lane.b32.xlu1 %v1626_v60, %s1661_s5 }
0x129e   : > { %v1068_v61 = vpop.permute.xlu1 %1067 }
0x129f   : > { %v1070_v62 = vmul.f32 %v1624_v52, %v1068_v61 }
0x12a1   : > { %v1081_v63 = vpack.c.bf16 %v1070_v62, %v1070_v62 }
0x12a3   : > { %1083 = vrot.lane.b32.xlu0 %v1081_v63, %s1662_s6 }
0x1315   : > { %v1084_v0 = vpop.permute.xlu0 %1083 }
0x1316   : > { %1535 = vmatmul.mubr.msk.bf16.vlgmr.msra.gmra.mxu1 %vm344_vm0, %v1084_v0 }
0x13d6   : > { %v1122_v2 = vpop.f32.mrf.mxu1 }
0x13d7   : > { %v1128_v4 = vadd.f32 %v1122_v2, %v1080_v1 }
0x13d8   : > { %v1536_v5 = vpop.f32.mrf.mxu1 }
0x13d9   : > { %1627 = vtanh.f32 %v1128_v4  ;;  %v1425_v11 = vmul.f32 -1.442695, %v1128_v4 }
0x13da   : > { %v1125_v7 = vpop.f32.mrf.mxu1 }
0x13db   : > { %1629 = vpow2.f32 %v1425_v11 }
0x13dc   : > { %v1537_v8 = vpop.f32.mrf.mxu1 }
0x13e6   : > { %v1628_v10 = vpop.eup %1627 }
0x13e7   : > { %1138 = vrot.lane.b32.xlu1 %v1628_v10, %s1661_s5 }
0x13e8   : > { %v1630_v12 = vpop.eup %1629 }
0x13e9   : > { %v1132_v13 = vadd.f32 1.0, %v1630_v12 }
0x13eb   : > { %1631 = vrcp.f32 %v1132_v13 }
0x13f8   : > { %v1632_v14 = vpop.eup %1631 }
0x13f9   : > { %v1136_v18 = vmul.f32 %v1632_v14, %v1064_v58 }
0x1459   : > { %v1139_v15 = vpop.permute.xlu1 %1138 }
0x145a   : > { %v1141_v17 = vmul.f32 %v1632_v14, %v1139_v15 }
0x145c   : > { %1143 = vrot.lane.b32.xlu0 %v1141_v17, %s1662_s6 }
0x1460   : > { %568 = vrot.lane.b32.xlu0 %v1801_v56, %s1662_s6 }
0x1464   : > { %737 = vrot.lane.b32.xlu0 %v1848_v37, %s1662_s6 }
0x1468   : > { %905 = vrot.lane.b32.xlu0 %v1891_v20, %s1662_s6 }
0x146c   : > { %1072 = vrot.lane.b32.xlu0 %v1070_v62, %s1662_s6 }
0x14ce   : > { %v1144_v19 = vpop.permute.xlu0 %1143 }
0x14cf   : > { %v1146_v21 = vadd.f32 %v1144_v19, %v1136_v18 }
0x14d1   : > { %1633 = vtanh.f32 %v1146_v21  ;;  %1162 = vrot.lane.b32.xlu0 %v1146_v21, %s1663_s12  ;;  %s1158_s12 = scalar_lea.vmem %s1946_s20, %s2013_s19 }
0x14d2   : > { %v569_v56 = vpop.permute.xlu0 %568 }
0x14d3   : > { %573 = vst.msk [vmem:[%s572_s29] sm:$0xff] %vm344_vm0, %v569_v56 }
0x14d6   : > { %v738_v20 = vpop.permute.xlu0 %737 }
0x14da   : > { %v906_v22 = vpop.permute.xlu0 %905 }
0x14de   : > { %v1634_v37 = vpop.eup %1633  ;;  %v1073_v23 = vpop.permute.xlu0 %1072 }
0x14df   : > { %1149 = vrot.lane.b32.xlu1 %v1634_v37, %s1661_s5  ;;  %s2010_s5 = sshll.u32 %s1883_s11, 3 }
0x14e3   : > { %653 = vrot.lane.b32.xlu1 %v1826_v16, %s1662_s6 }
0x14e7   : > { %821 = vrot.lane.b32.xlu1 %v1870_v59, %s1662_s6 }
0x14eb   : > { %989 = vrot.lane.b32.xlu1 %v1912_v39, %s1662_s6 }
0x1543   : > { %v1163_v24 = vpop.permute.xlu0 %1162 }
0x1544   : > { %1165 = vst.msk [vmem:[%s1784_s25] sm:$0xff] %vm344_vm0, %v1163_v24  ;;  %s908_s25 = scalar_lea.vmem %s1946_s20, %s2010_s5 }
0x1551   : > { %v1150_v16 = vpop.permute.xlu1 %1149 }
0x1552   : > { %v1152_v25 = vmul.f32 %v1632_v14, %v1150_v16 }
0x1554   : > { %1154 = vrot.lane.b32.xlu1 %v1152_v25, %s1662_s6  ;;  %s2012_s6 = sshll.u32 %s1920_s13, 3 }
0x1555   : > { %v654_v59 = vpop.permute.xlu1 %653  ;;  %s1075_s14 = scalar_lea.vmem %s1946_s20, %s2012_s6 }
0x1556   : > { %657 = vst.msk [vmem:[%s656_s15] sm:$0xff] %vm344_vm0, %v654_v59 }
0x1557   : > { %741 = vst.msk [vmem:[%s740_s24] sm:$0xff] %vm344_vm0, %v738_v20 }
0x1559   : > { %v822_v6 = vpop.permute.xlu1 %821 }
0x155a   : > { %825 = vst.msk [vmem:[%s824_s23] sm:$0xff] %vm344_vm0, %v822_v6 }
0x155b   : > { %909 = vst.msk [vmem:[%s908_s25] sm:$0xff] %vm344_vm0, %v906_v22 }
0x155d   : > { %v990_v26 = vpop.permute.xlu1 %989 }
0x155e   : > { %993 = vst.msk [vmem:[%s992_s10] sm:$0xff] %vm344_vm0, %v990_v26 }
0x155f   : > { %1076 = vst.msk [vmem:[%s1075_s14] sm:$0xff] %vm344_vm0, %v1073_v23 }
0x15c6   : > { %v1155_v27 = vpop.permute.xlu1 %1154 }
0x15c7   : > { %1159 = vst.msk [vmem:[%s1158_s12] sm:$0xff] %vm344_vm0, %v1155_v27  ;;  %1160 = vst.msk [vmem:[%s1727_s26] sm:$0xff] %vm344_vm0, %v1155_v27 }
0x15c8 PF: > { %s14_s17 = sadd.s32 1, %s1657_s17   ;;  %s2014_s15 = smov %s1653_s16 }
0x15c9   : > { %p11_p5 = scmp.ge.s32.totalorder %s14_s17, 4   ;;  %s2015_s16 = smov %s2017_s18 }
0x15cb   :  { %13 = sbr.rel (!%p11_p5) target bundleno = 2 (0x2), region = 99 }

</bundles_post_ra>
